<compile_context>
chip_gen: v7x
topology: tpu7x:2x2x1
jax: 0.10.0
libtpu: 0.0.40
codegen_flags: <defaults>
</compile_context>

<pallas_src>
import functools

import jax
import jax.numpy as jnp
from jax import lax
from jax.experimental import pallas as pl
from jax.experimental.pallas import tpu as pltpu


# ----------------------------------------------------------------------------
# Pallas kernel: one grid step == `bblk` batch elements.
# ----------------------------------------------------------------------------
def residual_block_kernel(x_ref, t_ref, sel_ref, selt_ref,
                          wres_ref, bres_ref, wlin_ref, blin_ref,
                          g1_ref, be1_ref, g2_ref, be2_ref,
                          w1_ref, w2_ref, m1_ref, m1t_ref, m2_ref, m2t_ref,
                          o_ref, zp1_ref, zp2_ref,
                          *, H, W, groups, eps, pad):
    f32 = jnp.float32
    Bblk, N, Cin = x_ref.shape
    Cout = o_ref.shape[-1]
    BN = Bblk * N
    padded = zp1_ref.shape[1]
    padb = padded - pad - N

    def silu(v):
        # v * sigmoid(v): exp -> EUP, reciprocal instead of a divide.
        return v * pl.reciprocal(1.0 + jnp.exp(-v), approx=False)

    sel = sel_ref[...]            # (Bblk, BN)  one-hot: sample -> its rows
    selt = selt_ref[...]          # (BN, Bblk)

    def gnorm(v, gamma, beta, m, mt, cpg):
        # v: (BN, C).  Per-sample / per-group statistics via matmuls only.
        rcnt = 1.0 / (N * cpg)
        s = jnp.dot(sel, v, preferred_element_type=f32)              # (Bblk, C)
        ss = jnp.dot(sel, v * v, preferred_element_type=f32)         # (Bblk, C)
        gmean = jnp.dot(s, m, preferred_element_type=f32) * rcnt     # (Bblk, G)
        gmsq = jnp.dot(ss, m, preferred_element_type=f32) * rcnt     # (Bblk, G)
        mean = jnp.dot(gmean, mt, preferred_element_type=f32)        # (Bblk, C)
        msq = jnp.dot(gmsq, mt, preferred_element_type=f32)          # (Bblk, C)
        var = msq - mean * mean
        inv = lax.rsqrt(var + eps)
        scale = inv * gamma                                          # (Bblk, C)
        shift = beta - mean * scale
        scale_r = jnp.dot(selt, scale, preferred_element_type=f32)   # (BN, C)
        shift_r = jnp.dot(selt, shift, preferred_element_type=f32)   # (BN, C)
        return v * scale_r + shift_r

    # Row-wise masks for the kx = -1 / +1 taps, hoisted and reused by both convs.
    w_coord = lax.broadcasted_iota(jnp.int32, (BN, 1), 0) % W
    mask_l = w_coord > 0              # valid rows for kx = -1
    mask_r = w_coord < (W - 1)        # valid rows for kx = +1

    def conv3x3(zp_ref, w_ref, cin, acc):
        # acc: (BN, Cout) initial value (temb / residual already folded in).
        # TODO(synk): at tiny C an im2col fusion of the 9 taps into a single
        # K=9*C (bf16) matmul would raise MXU contraction fill further; kept
        # as nine f32 K=C taps to preserve the module's f32 numerics and
        # fully portable lowering (no unaligned lane concat / offset stores).
        for kxi, mask in ((0, mask_l), (1, None), (2, mask_r)):
            part = None
            for kyi in range(3):
                shift = (kyi - 1) * W + (kxi - 1)
                a = pad + shift
                patch = zp_ref[:, a:a + N, :].reshape(BN, cin)
                d = jnp.dot(patch, w_ref[kyi * 3 + kxi],
                            preferred_element_type=f32)
                part = d if part is None else part + d
            if mask is not None:          # mask once per kx column group
                part = jnp.where(mask, part, 0.0)
            acc = acc + part
        return acc

    x = x_ref[...].reshape(BN, Cin)

    # Time embedding -> conv1 accumulator init (folds away the "+temb" pass).
    t_act = silu(t_ref[...].astype(f32))                            # (Bblk, 1, Td)
    t_rows = jnp.broadcast_to(
        t_act, (Bblk, N, t_act.shape[-1])).reshape(BN, -1)          # (BN, Td)
    init1 = jnp.dot(t_rows, wlin_ref[...],
                    preferred_element_type=f32) + blin_ref[...]     # (BN, Cout)

    # ---- main branch: GN1 -> SiLU -> conv1 (+ temb) ----
    h = gnorm(x, g1_ref[...], be1_ref[...], m1_ref[...], m1t_ref[...],
              Cin // groups)
    h = silu(h)
    # zero only the halo rows; the interior is fully overwritten right below
    zp1_ref[:, :pad, :] = jnp.zeros((Bblk, pad, Cin), f32)
    zp1_ref[:, pad + N:, :] = jnp.zeros((Bblk, padb, Cin), f32)
    zp1_ref[:, pad:pad + N, :] = h.reshape(Bblk, N, Cin)
    h = conv3x3(zp1_ref, w1_ref, Cin, init1)                        # (BN, Cout)

    # ---- GN2 -> SiLU -> conv2 (+ residual) ----
    h = gnorm(h, g2_ref[...], be2_ref[...], m2_ref[...], m2t_ref[...],
              Cout // groups)
    h = silu(h)

    # residual 1x1 conv computed late so it is only live across conv2
    res = jnp.dot(x, wres_ref[...],
                  preferred_element_type=f32) + bres_ref[...]       # (BN, Cout)

    zp2_ref[:, :pad, :] = jnp.zeros((Bblk, pad, Cout), f32)
    zp2_ref[:, pad + N:, :] = jnp.zeros((Bblk, padb, Cout), f32)
    zp2_ref[:, pad:pad + N, :] = h.reshape(Bblk, N, Cout)
    out = conv3x3(zp2_ref, w2_ref, Cout, res)

    o_ref[...] = out.reshape(Bblk, N, Cout).astype(o_ref.dtype)


# ----------------------------------------------------------------------------
# Wrapper
# ----------------------------------------------------------------------------
def residual_block_forward(x_nchw, t, params, *, groups, bblk=None):
    # NOTE: the Identity residual (Cin == Cout) is expressed exactly by
    # passing an identity w_res and zero b_res.
    B, Cin, H, W = x_nchw.shape
    Cout = params["w1"].shape[-1]
    N = H * W
    t_dim = t.shape[-1]

    if bblk is None:
        # Largest divisor of B that is <= 8: amortizes the ~0.35us per-step
        # overhead while leaving >1 grid step for megacore on larger batches.
        bblk = max(d for d in range(1, min(B, 8) + 1) if B % d == 0)
    assert B % bblk == 0

    pad = -(-(W + 1) // 8) * 8          # sublane-aligned halo (>= W + 1)
    padded_rows = pad + N + pad

    x_flat = jnp.transpose(x_nchw, (0, 2, 3, 1)).reshape(B, N, Cin)
    t3 = t.reshape(B, 1, t_dim)

    # one-hot row->sample selector for a block (constant across grid steps)
    rows = jnp.arange(bblk * N) // N
    sel = (rows[None, :] == jnp.arange(bblk)[:, None]).astype(jnp.float32)
    selt = sel.T

    consts = [sel, selt,
              params["w_res"], params["b_res"], params["w_lin"], params["b_lin"],
              params["g1"], params["be1"], params["g2"], params["be2"],
              params["w1"], params["w2"],
              params["m1"], params["m1t"], params["m2"], params["m2t"]]

    def full_spec(a):
        nd = a.ndim
        return pl.BlockSpec(a.shape, lambda i, _nd=nd: (0,) * _nd)

    in_specs = ([pl.BlockSpec((bblk, N, Cin), lambda i: (i, 0, 0)),
                 pl.BlockSpec((bblk, 1, t_dim), lambda i: (i, 0, 0))]
                + [full_spec(a) for a in consts])

    kernel = functools.partial(residual_block_kernel,
                               H=H, W=W, groups=groups, eps=1e-5, pad=pad)

    out = pl.pallas_call(
        kernel,
        out_shape=jax.ShapeDtypeStruct((B, N, Cout), jnp.float32),
        grid_spec=pltpu.PrefetchScalarGridSpec(
            num_scalar_prefetch=0,
            grid=(B // bblk,),
            in_specs=in_specs,
            out_specs=pl.BlockSpec((bblk, N, Cout), lambda i: (i, 0, 0)),
            # TODO(synk): for large H*W (v7x has only 64 MiB VMEM) tile the
            # grid over bands of H rows with a 1-row halo instead of whole
            # images so per-step VMEM stays bounded.
            scratch_shapes=[
                pltpu.VMEM((bblk, padded_rows, Cin), jnp.float32),
                pltpu.VMEM((bblk, padded_rows, Cout), jnp.float32)]),
        compiler_params=pltpu.CompilerParams(
            dimension_semantics=("parallel",),     # batch steps independent
            vmem_limit_bytes=64 * 1024 * 1024),
    )(x_flat, t3, *consts)

    return jnp.transpose(out.reshape(B, H, W, Cout), (0, 3, 1, 2))


# ----------------------------------------------------------------------------
# Pure-JAX reference (NCHW, same semantics as the PyTorch module)
# ----------------------------------------------------------------------------
def _group_norm_ref(x, G, gamma, beta, eps=1e-5):
    B, C, H, W = x.shape
    xg = x.reshape(B, G, C // G, H, W)
    mean = xg.mean(axis=(2, 3, 4), keepdims=True)
    var = ((xg - mean) ** 2).mean(axis=(2, 3, 4), keepdims=True)
    xn = ((xg - mean) / jnp.sqrt(var + eps)).reshape(B, C, H, W)
    return xn * gamma.reshape(1, C, 1, 1) + beta.reshape(1, C, 1, 1)


def reference_forward(x, t, tp, *, groups):
    hp = lax.Precision.HIGHEST
    dn = ("NCHW", "OIHW", "NCHW")
    res = lax.conv_general_dilated(x, tp["w_res_oihw"], (1, 1), "SAME",
                                   dimension_numbers=dn, precision=hp)
    res = res + tp["b_res"].reshape(1, -1, 1, 1)
    temb = jnp.dot(jax.nn.silu(t), tp["w_lin_t"].T, precision=hp) + tp["b_lin"]
    h = _group_norm_ref(x, groups, tp["g1"], tp["be1"])
    h = jax.nn.silu(h)
    h = lax.conv_general_dilated(h, tp["w1_oihw"], (1, 1), "SAME",
                                 dimension_numbers=dn, precision=hp)
    h = h + temb[:, :, None, None]
    h = _group_norm_ref(h, groups, tp["g2"], tp["be2"])
    h = jax.nn.silu(h)
    h = lax.conv_general_dilated(h, tp["w2_oihw"], (1, 1), "SAME",
                                 dimension_numbers=dn, precision=hp)
    return h + res


# ----------------------------------------------------------------------------
if __name__ == "__main__":
    B, Cin, Cout, H, W, t_dim, groups = 2, 8, 16, 8, 8, 32, 4

    key = jax.random.PRNGKey(0)
    ks = jax.random.split(key, 12)
    f32 = jnp.float32

    # "torch-layout" parameters (deterministic synthetic init)
    tp = {
        "w_res_oihw": 0.1 * jax.random.normal(ks[0], (Cout, Cin, 1, 1), f32),
        "b_res":      0.1 * jax.random.normal(ks[1], (Cout,), f32),
        "w_lin_t":    0.1 * jax.random.normal(ks[2], (Cout, t_dim), f32),  # (out,in)
        "b_lin":      0.1 * jax.random.normal(ks[3], (Cout,), f32),
        "g1":   1.0 + 0.1 * jax.random.normal(ks[4], (Cin,), f32),
        "be1":        0.1 * jax.random.normal(ks[5], (Cin,), f32),
        "g2":   1.0 + 0.1 * jax.random.normal(ks[6], (Cout,), f32),
        "be2":        0.1 * jax.random.normal(ks[7], (Cout,), f32),
        "w1_oihw":    0.1 * jax.random.normal(ks[8], (Cout, Cin, 3, 3), f32),
        "w2_oihw":    0.1 * jax.random.normal(ks[9], (Cout, Cout, 3, 3), f32),
    }

    x = jax.random.normal(ks[10], (B, Cin, H, W), f32)
    t = jax.random.normal(ks[11], (B, t_dim), f32)

    # one-hot group assignment matrices (contiguous channel groups, as PyTorch)
    def group_mats(C, G):
        m = (jnp.arange(C)[:, None] // (C // G)
             == jnp.arange(G)[None, :]).astype(f32)
        return m, m.T

    m1, m1t = group_mats(Cin, groups)
    m2, m2t = group_mats(Cout, groups)

    # kernel-layout parameters
    kparams = {
        "w_res": tp["w_res_oihw"].reshape(Cout, Cin).T,          # (Cin, Cout)
        "b_res": tp["b_res"].reshape(1, Cout),
        "w_lin": tp["w_lin_t"].T,                                # (t_dim, Cout)
        "b_lin": tp["b_lin"].reshape(1, Cout),
        "g1": tp["g1"].reshape(1, Cin), "be1": tp["be1"].reshape(1, Cin),
        "g2": tp["g2"].reshape(1, Cout), "be2": tp["be2"].reshape(1, Cout),
        # (ky, kx, cin, cout) flattened to (9, cin, cout), k = ky*3 + kx
        "w1": jnp.transpose(tp["w1_oihw"], (2, 3, 1, 0)).reshape(9, Cin, Cout),
        "w2": jnp.transpose(tp["w2_oihw"], (2, 3, 1, 0)).reshape(9, Cout, Cout),
        "m1": m1, "m1t": m1t, "m2": m2, "m2t": m2t,
    }

    out = residual_block_forward(x, t, kparams, groups=groups)
    out = jax.block_until_ready(out)
    assert out.shape == (B, Cout, H, W)

    ref = jax.block_until_ready(reference_forward(x, t, tp, groups=groups))
    max_err = float(jnp.max(jnp.abs(out - ref)))
    if not bool(jnp.allclose(out, ref, atol=2e-3, rtol=2e-3)):
        raise AssertionError(f"Pallas kernel mismatch vs reference, max_err={max_err}")

    print("KERNEL_OK")
</pallas_src>

<mosaic_0001>
module attributes {stable_mosaic.version = 11 : i64} {
  func.func @residual_block_kernel(%arg0: i32, %arg1: memref<2x64x8xf32, #tpu.memory_space<vmem>>, %arg2: memref<2x1x32xf32, #tpu.memory_space<vmem>>, %arg3: memref<2x128xf32, #tpu.memory_space<vmem>>, %arg4: memref<128x2xf32, #tpu.memory_space<vmem>>, %arg5: memref<8x16xf32, #tpu.memory_space<vmem>>, %arg6: memref<1x16xf32, #tpu.memory_space<vmem>>, %arg7: memref<32x16xf32, #tpu.memory_space<vmem>>, %arg8: memref<1x16xf32, #tpu.memory_space<vmem>>, %arg9: memref<1x8xf32, #tpu.memory_space<vmem>>, %arg10: memref<1x8xf32, #tpu.memory_space<vmem>>, %arg11: memref<1x16xf32, #tpu.memory_space<vmem>>, %arg12: memref<1x16xf32, #tpu.memory_space<vmem>>, %arg13: memref<9x8x16xf32, #tpu.memory_space<vmem>>, %arg14: memref<9x16x16xf32, #tpu.memory_space<vmem>>, %arg15: memref<8x4xf32, #tpu.memory_space<vmem>>, %arg16: memref<4x8xf32, #tpu.memory_space<vmem>>, %arg17: memref<16x4xf32, #tpu.memory_space<vmem>>, %arg18: memref<4x16xf32, #tpu.memory_space<vmem>>, %arg19: memref<2x64x16xf32, #tpu.memory_space<vmem>>, %arg20: memref<2x96x8xf32, #tpu.memory_space<vmem>>, %arg21: memref<2x96x16xf32, #tpu.memory_space<vmem>>) attributes {dimension_semantics = [#tpu.dimension_semantics<parallel>], iteration_bounds = array<i64: 1>, scalar_prefetch = 0 : i64, scratch_operands = 2 : i64, tpu.core_type = #tpu.core_type<tc>, window_params = [{transform_indices = @transform_0, window_bounds = array<i64: 2, 64, 8>}, {transform_indices = @transform_1, window_bounds = array<i64: 2, 1, 32>}, {pipeline_mode = #tpu.pipeline_mode<synchronous>, transform_indices = @transform_2, window_bounds = array<i64: 2, 128>}, {pipeline_mode = #tpu.pipeline_mode<synchronous>, transform_indices = @transform_3, window_bounds = array<i64: 128, 2>}, {pipeline_mode = #tpu.pipeline_mode<synchronous>, transform_indices = @transform_4, window_bounds = array<i64: 8, 16>}, {pipeline_mode = #tpu.pipeline_mode<synchronous>, transform_indices = @transform_5, window_bounds = array<i64: 1, 16>}, {pipeline_mode = #tpu.pipeline_mode<synchronous>, transform_indices = @transform_6, window_bounds = array<i64: 32, 16>}, {pipeline_mode = #tpu.pipeline_mode<synchronous>, transform_indices = @transform_7, window_bounds = array<i64: 1, 16>}, {pipeline_mode = #tpu.pipeline_mode<synchronous>, transform_indices = @transform_8, window_bounds = array<i64: 1, 8>}, {pipeline_mode = #tpu.pipeline_mode<synchronous>, transform_indices = @transform_9, window_bounds = array<i64: 1, 8>}, {pipeline_mode = #tpu.pipeline_mode<synchronous>, transform_indices = @transform_10, window_bounds = array<i64: 1, 16>}, {pipeline_mode = #tpu.pipeline_mode<synchronous>, transform_indices = @transform_11, window_bounds = array<i64: 1, 16>}, {pipeline_mode = #tpu.pipeline_mode<synchronous>, transform_indices = @transform_12, window_bounds = array<i64: 9, 8, 16>}, {pipeline_mode = #tpu.pipeline_mode<synchronous>, transform_indices = @transform_13, window_bounds = array<i64: 9, 16, 16>}, {pipeline_mode = #tpu.pipeline_mode<synchronous>, transform_indices = @transform_14, window_bounds = array<i64: 8, 4>}, {pipeline_mode = #tpu.pipeline_mode<synchronous>, transform_indices = @transform_15, window_bounds = array<i64: 4, 8>}, {pipeline_mode = #tpu.pipeline_mode<synchronous>, transform_indices = @transform_16, window_bounds = array<i64: 16, 4>}, {pipeline_mode = #tpu.pipeline_mode<synchronous>, transform_indices = @transform_17, window_bounds = array<i64: 4, 16>}, {transform_indices = @transform_18, window_bounds = array<i64: 2, 64, 16>}]} {
    %c0 = arith.constant 0 : index
    %c0_0 = arith.constant 0 : index
    %0 = vector.load %arg3[%c0, %c0_0] : memref<2x128xf32, #tpu.memory_space<vmem>>, vector<2x128xf32>
    %c0_1 = arith.constant 0 : index
    %c0_2 = arith.constant 0 : index
    %1 = vector.load %arg4[%c0_1, %c0_2] : memref<128x2xf32, #tpu.memory_space<vmem>>, vector<128x2xf32>
    %2 = tpu.iota {dimensions = array<i32: 0>} : vector<128x1xi32>
    %c8_i32 = arith.constant 8 : i32
    %c0_i32 = arith.constant 0 : i32
    %3 = arith.cmpi eq, %c8_i32, %c0_i32 : i32
    %c1_i32 = arith.constant 1 : i32
    %4 = arith.select %3, %c1_i32, %c8_i32 : i32
    %5 = vector.broadcast %4 : i32 to vector<128x1xi32>
    %6 = arith.remsi %2, %5 : vector<128x1xi32>
    %c0_i32_3 = arith.constant 0 : i32
    %7 = vector.broadcast %c0_i32_3 : i32 to vector<128x1xi32>
    %8 = arith.cmpi ne, %6, %7 : vector<128x1xi32>
    %c0_i32_4 = arith.constant 0 : i32
    %9 = vector.broadcast %c0_i32_4 : i32 to vector<128x1xi32>
    %10 = arith.cmpi slt, %6, %9 : vector<128x1xi32>
    %c0_i32_5 = arith.constant 0 : i32
    %11 = arith.cmpi slt, %4, %c0_i32_5 : i32
    %12 = vector.broadcast %11 : i1 to vector<128x1xi1>
    %13 = vector.broadcast %12 : vector<128x1xi1> to vector<128x1xi1>
    %14 = arith.xori %10, %13 : vector<128x1xi1>
    %15 = arith.andi %14, %8 : vector<128x1xi1>
    %16 = vector.broadcast %4 : i32 to vector<128x1xi32>
    %17 = arith.addi %6, %16 : vector<128x1xi32>
    %18 = arith.select %15, %17, %6 : vector<128x1xi1>, vector<128x1xi32>
    %c0_i32_6 = arith.constant 0 : i32
    %19 = vector.broadcast %c0_i32_6 : i32 to vector<128x1xi32>
    %20 = arith.cmpi sgt, %18, %19 : vector<128x1xi32>
    %c7_i32 = arith.constant 7 : i32
    %21 = vector.broadcast %c7_i32 : i32 to vector<128x1xi32>
    %22 = arith.cmpi slt, %18, %21 : vector<128x1xi32>
    %c0_7 = arith.constant 0 : index
    %c0_8 = arith.constant 0 : index
    %c0_9 = arith.constant 0 : index
    %23 = vector.load %arg1[%c0_7, %c0_8, %c0_9] : memref<2x64x8xf32, #tpu.memory_space<vmem>>, vector<2x64x8xf32>
    %24 = vector.shape_cast %23 : vector<2x64x8xf32> to vector<128x8xf32>
    %c0_10 = arith.constant 0 : index
    %c0_11 = arith.constant 0 : index
    %c0_12 = arith.constant 0 : index
    %25 = vector.load %arg2[%c0_10, %c0_11, %c0_12] : memref<2x1x32xf32, #tpu.memory_space<vmem>>, vector<2x1x32xf32>
    %cst = arith.constant 0.000000e+00 : f32
    %26 = vector.broadcast %cst : f32 to vector<2x1x32xf32>
    %27 = arith.subf %26, %25 : vector<2x1x32xf32>
    %28 = math.exp %27 : vector<2x1x32xf32>
    %cst_13 = arith.constant 1.000000e+00 : f32
    %29 = vector.broadcast %cst_13 : f32 to vector<2x1x32xf32>
    %30 = arith.addf %29, %28 : vector<2x1x32xf32>
    %31 = tpu.reciprocal %30 : vector<2x1x32xf32> -> vector<2x1x32xf32>
    %32 = arith.mulf %25, %31 : vector<2x1x32xf32>
    %33 = vector.shape_cast %32 : vector<2x1x32xf32> to vector<2x1x32xf32>
    %34 = vector.broadcast %33 : vector<2x1x32xf32> to vector<2x64x32xf32>
    %35 = vector.shape_cast %34 : vector<2x64x32xf32> to vector<128x32xf32>
    %c0_14 = arith.constant 0 : index
    %c0_15 = arith.constant 0 : index
    %36 = vector.load %arg7[%c0_14, %c0_15] : memref<32x16xf32, #tpu.memory_space<vmem>>, vector<32x16xf32>
    %cst_16 = arith.constant dense<0.000000e+00> : vector<128x16xf32>
    %37 = tpu.matmul %35, %36, %cst_16 {dimension_numbers = #tpu.dot_dimension_numbers<[1], [0], [0], [1], [0, 0, 1, 1], [], []>} : vector<128x32xf32>, vector<32x16xf32>, vector<128x16xf32> -> vector<128x16xf32>
    %c0_17 = arith.constant 0 : index
    %c0_18 = arith.constant 0 : index
    %38 = vector.load %arg8[%c0_17, %c0_18] : memref<1x16xf32, #tpu.memory_space<vmem>>, vector<1x16xf32>
    %39 = vector.broadcast %38 : vector<1x16xf32> to vector<128x16xf32>
    %40 = arith.addf %37, %39 : vector<128x16xf32>
    %c0_19 = arith.constant 0 : index
    %c0_20 = arith.constant 0 : index
    %41 = vector.load %arg9[%c0_19, %c0_20] : memref<1x8xf32, #tpu.memory_space<vmem>>, vector<1x8xf32>
    %c0_21 = arith.constant 0 : index
    %c0_22 = arith.constant 0 : index
    %42 = vector.load %arg10[%c0_21, %c0_22] : memref<1x8xf32, #tpu.memory_space<vmem>>, vector<1x8xf32>
    %c0_23 = arith.constant 0 : index
    %c0_24 = arith.constant 0 : index
    %43 = vector.load %arg15[%c0_23, %c0_24] : memref<8x4xf32, #tpu.memory_space<vmem>>, vector<8x4xf32>
    %c0_25 = arith.constant 0 : index
    %c0_26 = arith.constant 0 : index
    %44 = vector.load %arg16[%c0_25, %c0_26] : memref<4x8xf32, #tpu.memory_space<vmem>>, vector<4x8xf32>
    %cst_27 = arith.constant dense<0.000000e+00> : vector<2x8xf32>
    %45 = tpu.matmul %0, %24, %cst_27 {dimension_numbers = #tpu.dot_dimension_numbers<[1], [0], [0], [1], [0, 0, 1, 1], [], []>} : vector<2x128xf32>, vector<128x8xf32>, vector<2x8xf32> -> vector<2x8xf32>
    %46 = arith.mulf %24, %24 : vector<128x8xf32>
    %cst_28 = arith.constant dense<0.000000e+00> : vector<2x8xf32>
    %47 = tpu.matmul %0, %46, %cst_28 {dimension_numbers = #tpu.dot_dimension_numbers<[1], [0], [0], [1], [0, 0, 1, 1], [], []>} : vector<2x128xf32>, vector<128x8xf32>, vector<2x8xf32> -> vector<2x8xf32>
    %cst_29 = arith.constant dense<0.000000e+00> : vector<2x4xf32>
    %48 = tpu.matmul %45, %43, %cst_29 {dimension_numbers = #tpu.dot_dimension_numbers<[1], [0], [0], [1], [0, 0, 1, 1], [], []>} : vector<2x8xf32>, vector<8x4xf32>, vector<2x4xf32> -> vector<2x4xf32>
    %cst_30 = arith.constant 7.812500e-03 : f32
    %49 = vector.broadcast %cst_30 : f32 to vector<2x4xf32>
    %50 = arith.mulf %48, %49 : vector<2x4xf32>
    %cst_31 = arith.constant dense<0.000000e+00> : vector<2x4xf32>
    %51 = tpu.matmul %47, %43, %cst_31 {dimension_numbers = #tpu.dot_dimension_numbers<[1], [0], [0], [1], [0, 0, 1, 1], [], []>} : vector<2x8xf32>, vector<8x4xf32>, vector<2x4xf32> -> vector<2x4xf32>
    %cst_32 = arith.constant 7.812500e-03 : f32
    %52 = vector.broadcast %cst_32 : f32 to vector<2x4xf32>
    %53 = arith.mulf %51, %52 : vector<2x4xf32>
    %cst_33 = arith.constant dense<0.000000e+00> : vector<2x8xf32>
    %54 = tpu.matmul %50, %44, %cst_33 {dimension_numbers = #tpu.dot_dimension_numbers<[1], [0], [0], [1], [0, 0, 1, 1], [], []>} : vector<2x4xf32>, vector<4x8xf32>, vector<2x8xf32> -> vector<2x8xf32>
    %cst_34 = arith.constant dense<0.000000e+00> : vector<2x8xf32>
    %55 = tpu.matmul %53, %44, %cst_34 {dimension_numbers = #tpu.dot_dimension_numbers<[1], [0], [0], [1], [0, 0, 1, 1], [], []>} : vector<2x4xf32>, vector<4x8xf32>, vector<2x8xf32> -> vector<2x8xf32>
    %56 = arith.mulf %54, %54 : vector<2x8xf32>
    %57 = arith.subf %55, %56 : vector<2x8xf32>
    %cst_35 = arith.constant 9.99999974E-6 : f32
    %58 = vector.broadcast %cst_35 : f32 to vector<2x8xf32>
    %59 = arith.addf %57, %58 : vector<2x8xf32>
    %60 = math.rsqrt %59 : vector<2x8xf32>
    %61 = vector.broadcast %41 : vector<1x8xf32> to vector<2x8xf32>
    %62 = arith.mulf %60, %61 : vector<2x8xf32>
    %63 = arith.mulf %54, %62 : vector<2x8xf32>
    %64 = vector.broadcast %42 : vector<1x8xf32> to vector<2x8xf32>
    %65 = arith.subf %64, %63 : vector<2x8xf32>
    %cst_36 = arith.constant dense<0.000000e+00> : vector<128x8xf32>
    %66 = tpu.matmul %1, %62, %cst_36 {dimension_numbers = #tpu.dot_dimension_numbers<[1], [0], [0], [1], [0, 0, 1, 1], [], []>} : vector<128x2xf32>, vector<2x8xf32>, vector<128x8xf32> -> vector<128x8xf32>
    %cst_37 = arith.constant dense<0.000000e+00> : vector<128x8xf32>
    %67 = tpu.matmul %1, %65, %cst_37 {dimension_numbers = #tpu.dot_dimension_numbers<[1], [0], [0], [1], [0, 0, 1, 1], [], []>} : vector<128x2xf32>, vector<2x8xf32>, vector<128x8xf32> -> vector<128x8xf32>
    %68 = arith.mulf %24, %66 : vector<128x8xf32>
    %69 = arith.addf %68, %67 : vector<128x8xf32>
    %cst_38 = arith.constant 0.000000e+00 : f32
    %70 = vector.broadcast %cst_38 : f32 to vector<128x8xf32>
    %71 = arith.subf %70, %69 : vector<128x8xf32>
    %72 = math.exp %71 : vector<128x8xf32>
    %cst_39 = arith.constant 1.000000e+00 : f32
    %73 = vector.broadcast %cst_39 : f32 to vector<128x8xf32>
    %74 = arith.addf %73, %72 : vector<128x8xf32>
    %75 = tpu.reciprocal %74 : vector<128x8xf32> -> vector<128x8xf32>
    %76 = arith.mulf %69, %75 : vector<128x8xf32>
    %cst_40 = arith.constant 0.000000e+00 : f32
    %77 = vector.broadcast %cst_40 : f32 to vector<2x16x8xf32>
    %c0_41 = arith.constant 0 : index
    %c0_42 = arith.constant 0 : index
    %c0_43 = arith.constant 0 : index
    %78 = vector.load %arg20[%c0_41, %c0_42, %c0_43] : memref<2x96x8xf32, #tpu.memory_space<vmem>>, vector<2x16x8xf32>
    tpu.vector_store %arg20[%c0_41, %c0_42, %c0_43], %77 {strides = array<i32>} : memref<2x96x8xf32, #tpu.memory_space<vmem>>, vector<2x16x8xf32>,
    %cst_44 = arith.constant 0.000000e+00 : f32
    %79 = vector.broadcast %cst_44 : f32 to vector<2x16x8xf32>
    %c0_45 = arith.constant 0 : index
    %c80 = arith.constant 80 : index
    %c0_46 = arith.constant 0 : index
    %80 = vector.load %arg20[%c0_45, %c80, %c0_46] : memref<2x96x8xf32, #tpu.memory_space<vmem>>, vector<2x16x8xf32>
    tpu.vector_store %arg20[%c0_45, %c80, %c0_46], %79 {strides = array<i32>} : memref<2x96x8xf32, #tpu.memory_space<vmem>>, vector<2x16x8xf32>,
    %81 = vector.shape_cast %76 : vector<128x8xf32> to vector<2x64x8xf32>
    %c0_47 = arith.constant 0 : index
    %c16 = arith.constant 16 : index
    %c0_48 = arith.constant 0 : index
    %82 = vector.load %arg20[%c0_47, %c16, %c0_48] : memref<2x96x8xf32, #tpu.memory_space<vmem>>, vector<2x64x8xf32>
    tpu.vector_store %arg20[%c0_47, %c16, %c0_48], %81 {strides = array<i32>} : memref<2x96x8xf32, #tpu.memory_space<vmem>>, vector<2x64x8xf32>,
    %c0_49 = arith.constant 0 : index
    %c7 = arith.constant 7 : index
    %c0_50 = arith.constant 0 : index
    %83 = vector.load %arg20[%c0_49, %c7, %c0_50] : memref<2x96x8xf32, #tpu.memory_space<vmem>>, vector<2x64x8xf32>
    %84 = vector.shape_cast %83 : vector<2x64x8xf32> to vector<128x8xf32>
    %c0_51 = arith.constant 0 : index
    %c0_52 = arith.constant 0 : index
    %c0_53 = arith.constant 0 : index
    %85 = vector.load %arg13[%c0_51, %c0_52, %c0_53] : memref<9x8x16xf32, #tpu.memory_space<vmem>>, vector<1x8x16xf32>
    %86 = vector.shape_cast %85 : vector<1x8x16xf32> to vector<8x16xf32>
    %cst_54 = arith.constant dense<0.000000e+00> : vector<128x16xf32>
    %87 = tpu.matmul %84, %86, %cst_54 {dimension_numbers = #tpu.dot_dimension_numbers<[1], [0], [0], [1], [0, 0, 1, 1], [], []>} : vector<128x8xf32>, vector<8x16xf32>, vector<128x16xf32> -> vector<128x16xf32>
    %c0_55 = arith.constant 0 : index
    %c15 = arith.constant 15 : index
    %c0_56 = arith.constant 0 : index
    %88 = vector.load %arg20[%c0_55, %c15, %c0_56] : memref<2x96x8xf32, #tpu.memory_space<vmem>>, vector<2x64x8xf32>
    %89 = vector.shape_cast %88 : vector<2x64x8xf32> to vector<128x8xf32>
    %c3 = arith.constant 3 : index
    %c0_57 = arith.constant 0 : index
    %c0_58 = arith.constant 0 : index
    %90 = vector.load %arg13[%c3, %c0_57, %c0_58] : memref<9x8x16xf32, #tpu.memory_space<vmem>>, vector<1x8x16xf32>
    %91 = vector.shape_cast %90 : vector<1x8x16xf32> to vector<8x16xf32>
    %cst_59 = arith.constant dense<0.000000e+00> : vector<128x16xf32>
    %92 = tpu.matmul %89, %91, %cst_59 {dimension_numbers = #tpu.dot_dimension_numbers<[1], [0], [0], [1], [0, 0, 1, 1], [], []>} : vector<128x8xf32>, vector<8x16xf32>, vector<128x16xf32> -> vector<128x16xf32>
    %93 = arith.addf %87, %92 : vector<128x16xf32>
    %c0_60 = arith.constant 0 : index
    %c23 = arith.constant 23 : index
    %c0_61 = arith.constant 0 : index
    %94 = vector.load %arg20[%c0_60, %c23, %c0_61] : memref<2x96x8xf32, #tpu.memory_space<vmem>>, vector<2x64x8xf32>
    %95 = vector.shape_cast %94 : vector<2x64x8xf32> to vector<128x8xf32>
    %c6 = arith.constant 6 : index
    %c0_62 = arith.constant 0 : index
    %c0_63 = arith.constant 0 : index
    %96 = vector.load %arg13[%c6, %c0_62, %c0_63] : memref<9x8x16xf32, #tpu.memory_space<vmem>>, vector<1x8x16xf32>
    %97 = vector.shape_cast %96 : vector<1x8x16xf32> to vector<8x16xf32>
    %cst_64 = arith.constant dense<0.000000e+00> : vector<128x16xf32>
    %98 = tpu.matmul %95, %97, %cst_64 {dimension_numbers = #tpu.dot_dimension_numbers<[1], [0], [0], [1], [0, 0, 1, 1], [], []>} : vector<128x8xf32>, vector<8x16xf32>, vector<128x16xf32> -> vector<128x16xf32>
    %99 = arith.addf %93, %98 : vector<128x16xf32>
    %cst_65 = arith.constant 0.000000e+00 : f32
    %100 = vector.shape_cast %20 : vector<128x1xi1> to vector<128x1xi1>
    %101 = vector.broadcast %100 : vector<128x1xi1> to vector<128x16xi1>
    %102 = vector.broadcast %cst_65 : f32 to vector<128x16xf32>
    %103 = arith.select %101, %99, %102 : vector<128x16xi1>, vector<128x16xf32>
    %104 = arith.addf %40, %103 : vector<128x16xf32>
    %c0_66 = arith.constant 0 : index
    %c8 = arith.constant 8 : index
    %c0_67 = arith.constant 0 : index
    %105 = vector.load %arg20[%c0_66, %c8, %c0_67] : memref<2x96x8xf32, #tpu.memory_space<vmem>>, vector<2x64x8xf32>
    %106 = vector.shape_cast %105 : vector<2x64x8xf32> to vector<128x8xf32>
    %c1 = arith.constant 1 : index
    %c0_68 = arith.constant 0 : index
    %c0_69 = arith.constant 0 : index
    %107 = vector.load %arg13[%c1, %c0_68, %c0_69] : memref<9x8x16xf32, #tpu.memory_space<vmem>>, vector<1x8x16xf32>
    %108 = vector.shape_cast %107 : vector<1x8x16xf32> to vector<8x16xf32>
    %cst_70 = arith.constant dense<0.000000e+00> : vector<128x16xf32>
    %109 = tpu.matmul %106, %108, %cst_70 {dimension_numbers = #tpu.dot_dimension_numbers<[1], [0], [0], [1], [0, 0, 1, 1], [], []>} : vector<128x8xf32>, vector<8x16xf32>, vector<128x16xf32> -> vector<128x16xf32>
    %c0_71 = arith.constant 0 : index
    %c16_72 = arith.constant 16 : index
    %c0_73 = arith.constant 0 : index
    %110 = vector.load %arg20[%c0_71, %c16_72, %c0_73] : memref<2x96x8xf32, #tpu.memory_space<vmem>>, vector<2x64x8xf32>
    %111 = vector.shape_cast %110 : vector<2x64x8xf32> to vector<128x8xf32>
    %c4 = arith.constant 4 : index
    %c0_74 = arith.constant 0 : index
    %c0_75 = arith.constant 0 : index
    %112 = vector.load %arg13[%c4, %c0_74, %c0_75] : memref<9x8x16xf32, #tpu.memory_space<vmem>>, vector<1x8x16xf32>
    %113 = vector.shape_cast %112 : vector<1x8x16xf32> to vector<8x16xf32>
    %cst_76 = arith.constant dense<0.000000e+00> : vector<128x16xf32>
    %114 = tpu.matmul %111, %113, %cst_76 {dimension_numbers = #tpu.dot_dimension_numbers<[1], [0], [0], [1], [0, 0, 1, 1], [], []>} : vector<128x8xf32>, vector<8x16xf32>, vector<128x16xf32> -> vector<128x16xf32>
    %115 = arith.addf %109, %114 : vector<128x16xf32>
    %c0_77 = arith.constant 0 : index
    %c24 = arith.constant 24 : index
    %c0_78 = arith.constant 0 : index
    %116 = vector.load %arg20[%c0_77, %c24, %c0_78] : memref<2x96x8xf32, #tpu.memory_space<vmem>>, vector<2x64x8xf32>
    %117 = vector.shape_cast %116 : vector<2x64x8xf32> to vector<128x8xf32>
    %c7_79 = arith.constant 7 : index
    %c0_80 = arith.constant 0 : index
    %c0_81 = arith.constant 0 : index
    %118 = vector.load %arg13[%c7_79, %c0_80, %c0_81] : memref<9x8x16xf32, #tpu.memory_space<vmem>>, vector<1x8x16xf32>
    %119 = vector.shape_cast %118 : vector<1x8x16xf32> to vector<8x16xf32>
    %cst_82 = arith.constant dense<0.000000e+00> : vector<128x16xf32>
    %120 = tpu.matmul %117, %119, %cst_82 {dimension_numbers = #tpu.dot_dimension_numbers<[1], [0], [0], [1], [0, 0, 1, 1], [], []>} : vector<128x8xf32>, vector<8x16xf32>, vector<128x16xf32> -> vector<128x16xf32>
    %121 = arith.addf %115, %120 : vector<128x16xf32>
    %122 = arith.addf %104, %121 : vector<128x16xf32>
    %c0_83 = arith.constant 0 : index
    %c9 = arith.constant 9 : index
    %c0_84 = arith.constant 0 : index
    %123 = vector.load %arg20[%c0_83, %c9, %c0_84] : memref<2x96x8xf32, #tpu.memory_space<vmem>>, vector<2x64x8xf32>
    %124 = vector.shape_cast %123 : vector<2x64x8xf32> to vector<128x8xf32>
    %c2 = arith.constant 2 : index
    %c0_85 = arith.constant 0 : index
    %c0_86 = arith.constant 0 : index
    %125 = vector.load %arg13[%c2, %c0_85, %c0_86] : memref<9x8x16xf32, #tpu.memory_space<vmem>>, vector<1x8x16xf32>
    %126 = vector.shape_cast %125 : vector<1x8x16xf32> to vector<8x16xf32>
    %cst_87 = arith.constant dense<0.000000e+00> : vector<128x16xf32>
    %127 = tpu.matmul %124, %126, %cst_87 {dimension_numbers = #tpu.dot_dimension_numbers<[1], [0], [0], [1], [0, 0, 1, 1], [], []>} : vector<128x8xf32>, vector<8x16xf32>, vector<128x16xf32> -> vector<128x16xf32>
    %c0_88 = arith.constant 0 : index
    %c17 = arith.constant 17 : index
    %c0_89 = arith.constant 0 : index
    %128 = vector.load %arg20[%c0_88, %c17, %c0_89] : memref<2x96x8xf32, #tpu.memory_space<vmem>>, vector<2x64x8xf32>
    %129 = vector.shape_cast %128 : vector<2x64x8xf32> to vector<128x8xf32>
    %c5 = arith.constant 5 : index
    %c0_90 = arith.constant 0 : index
    %c0_91 = arith.constant 0 : index
    %130 = vector.load %arg13[%c5, %c0_90, %c0_91] : memref<9x8x16xf32, #tpu.memory_space<vmem>>, vector<1x8x16xf32>
    %131 = vector.shape_cast %130 : vector<1x8x16xf32> to vector<8x16xf32>
    %cst_92 = arith.constant dense<0.000000e+00> : vector<128x16xf32>
    %132 = tpu.matmul %129, %131, %cst_92 {dimension_numbers = #tpu.dot_dimension_numbers<[1], [0], [0], [1], [0, 0, 1, 1], [], []>} : vector<128x8xf32>, vector<8x16xf32>, vector<128x16xf32> -> vector<128x16xf32>
    %133 = arith.addf %127, %132 : vector<128x16xf32>
    %c0_93 = arith.constant 0 : index
    %c25 = arith.constant 25 : index
    %c0_94 = arith.constant 0 : index
    %134 = vector.load %arg20[%c0_93, %c25, %c0_94] : memref<2x96x8xf32, #tpu.memory_space<vmem>>, vector<2x64x8xf32>
    %135 = vector.shape_cast %134 : vector<2x64x8xf32> to vector<128x8xf32>
    %c8_95 = arith.constant 8 : index
    %c0_96 = arith.constant 0 : index
    %c0_97 = arith.constant 0 : index
    %136 = vector.load %arg13[%c8_95, %c0_96, %c0_97] : memref<9x8x16xf32, #tpu.memory_space<vmem>>, vector<1x8x16xf32>
    %137 = vector.shape_cast %136 : vector<1x8x16xf32> to vector<8x16xf32>
    %cst_98 = arith.constant dense<0.000000e+00> : vector<128x16xf32>
    %138 = tpu.matmul %135, %137, %cst_98 {dimension_numbers = #tpu.dot_dimension_numbers<[1], [0], [0], [1], [0, 0, 1, 1], [], []>} : vector<128x8xf32>, vector<8x16xf32>, vector<128x16xf32> -> vector<128x16xf32>
    %139 = arith.addf %133, %138 : vector<128x16xf32>
    %cst_99 = arith.constant 0.000000e+00 : f32
    %140 = vector.shape_cast %22 : vector<128x1xi1> to vector<128x1xi1>
    %141 = vector.broadcast %140 : vector<128x1xi1> to vector<128x16xi1>
    %142 = vector.broadcast %cst_99 : f32 to vector<128x16xf32>
    %143 = arith.select %141, %139, %142 : vector<128x16xi1>, vector<128x16xf32>
    %144 = arith.addf %122, %143 : vector<128x16xf32>
    %c0_100 = arith.constant 0 : index
    %c0_101 = arith.constant 0 : index
    %145 = vector.load %arg11[%c0_100, %c0_101] : memref<1x16xf32, #tpu.memory_space<vmem>>, vector<1x16xf32>
    %c0_102 = arith.constant 0 : index
    %c0_103 = arith.constant 0 : index
    %146 = vector.load %arg12[%c0_102, %c0_103] : memref<1x16xf32, #tpu.memory_space<vmem>>, vector<1x16xf32>
    %c0_104 = arith.constant 0 : index
    %c0_105 = arith.constant 0 : index
    %147 = vector.load %arg17[%c0_104, %c0_105] : memref<16x4xf32, #tpu.memory_space<vmem>>, vector<16x4xf32>
    %c0_106 = arith.constant 0 : index
    %c0_107 = arith.constant 0 : index
    %148 = vector.load %arg18[%c0_106, %c0_107] : memref<4x16xf32, #tpu.memory_space<vmem>>, vector<4x16xf32>
    %cst_108 = arith.constant dense<0.000000e+00> : vector<2x16xf32>
    %149 = tpu.matmul %0, %144, %cst_108 {dimension_numbers = #tpu.dot_dimension_numbers<[1], [0], [0], [1], [0, 0, 1, 1], [], []>} : vector<2x128xf32>, vector<128x16xf32>, vector<2x16xf32> -> vector<2x16xf32>
    %150 = arith.mulf %144, %144 : vector<128x16xf32>
    %cst_109 = arith.constant dense<0.000000e+00> : vector<2x16xf32>
    %151 = tpu.matmul %0, %150, %cst_109 {dimension_numbers = #tpu.dot_dimension_numbers<[1], [0], [0], [1], [0, 0, 1, 1], [], []>} : vector<2x128xf32>, vector<128x16xf32>, vector<2x16xf32> -> vector<2x16xf32>
    %cst_110 = arith.constant dense<0.000000e+00> : vector<2x4xf32>
    %152 = tpu.matmul %149, %147, %cst_110 {dimension_numbers = #tpu.dot_dimension_numbers<[1], [0], [0], [1], [0, 0, 1, 1], [], []>} : vector<2x16xf32>, vector<16x4xf32>, vector<2x4xf32> -> vector<2x4xf32>
    %cst_111 = arith.constant 3.906250e-03 : f32
    %153 = vector.broadcast %cst_111 : f32 to vector<2x4xf32>
    %154 = arith.mulf %152, %153 : vector<2x4xf32>
    %cst_112 = arith.constant dense<0.000000e+00> : vector<2x4xf32>
    %155 = tpu.matmul %151, %147, %cst_112 {dimension_numbers = #tpu.dot_dimension_numbers<[1], [0], [0], [1], [0, 0, 1, 1], [], []>} : vector<2x16xf32>, vector<16x4xf32>, vector<2x4xf32> -> vector<2x4xf32>
    %cst_113 = arith.constant 3.906250e-03 : f32
    %156 = vector.broadcast %cst_113 : f32 to vector<2x4xf32>
    %157 = arith.mulf %155, %156 : vector<2x4xf32>
    %cst_114 = arith.constant dense<0.000000e+00> : vector<2x16xf32>
    %158 = tpu.matmul %154, %148, %cst_114 {dimension_numbers = #tpu.dot_dimension_numbers<[1], [0], [0], [1], [0, 0, 1, 1], [], []>} : vector<2x4xf32>, vector<4x16xf32>, vector<2x16xf32> -> vector<2x16xf32>
    %cst_115 = arith.constant dense<0.000000e+00> : vector<2x16xf32>
    %159 = tpu.matmul %157, %148, %cst_115 {dimension_numbers = #tpu.dot_dimension_numbers<[1], [0], [0], [1], [0, 0, 1, 1], [], []>} : vector<2x4xf32>, vector<4x16xf32>, vector<2x16xf32> -> vector<2x16xf32>
    %160 = arith.mulf %158, %158 : vector<2x16xf32>
    %161 = arith.subf %159, %160 : vector<2x16xf32>
    %cst_116 = arith.constant 9.99999974E-6 : f32
    %162 = vector.broadcast %cst_116 : f32 to vector<2x16xf32>
    %163 = arith.addf %161, %162 : vector<2x16xf32>
    %164 = math.rsqrt %163 : vector<2x16xf32>
    %165 = vector.broadcast %145 : vector<1x16xf32> to vector<2x16xf32>
    %166 = arith.mulf %164, %165 : vector<2x16xf32>
    %167 = arith.mulf %158, %166 : vector<2x16xf32>
    %168 = vector.broadcast %146 : vector<1x16xf32> to vector<2x16xf32>
    %169 = arith.subf %168, %167 : vector<2x16xf32>
    %cst_117 = arith.constant dense<0.000000e+00> : vector<128x16xf32>
    %170 = tpu.matmul %1, %166, %cst_117 {dimension_numbers = #tpu.dot_dimension_numbers<[1], [0], [0], [1], [0, 0, 1, 1], [], []>} : vector<128x2xf32>, vector<2x16xf32>, vector<128x16xf32> -> vector<128x16xf32>
    %cst_118 = arith.constant dense<0.000000e+00> : vector<128x16xf32>
    %171 = tpu.matmul %1, %169, %cst_118 {dimension_numbers = #tpu.dot_dimension_numbers<[1], [0], [0], [1], [0, 0, 1, 1], [], []>} : vector<128x2xf32>, vector<2x16xf32>, vector<128x16xf32> -> vector<128x16xf32>
    %172 = arith.mulf %144, %170 : vector<128x16xf32>
    %173 = arith.addf %172, %171 : vector<128x16xf32>
    %cst_119 = arith.constant 0.000000e+00 : f32
    %174 = vector.broadcast %cst_119 : f32 to vector<128x16xf32>
    %175 = arith.subf %174, %173 : vector<128x16xf32>
    %176 = math.exp %175 : vector<128x16xf32>
    %cst_120 = arith.constant 1.000000e+00 : f32
    %177 = vector.broadcast %cst_120 : f32 to vector<128x16xf32>
    %178 = arith.addf %177, %176 : vector<128x16xf32>
    %179 = tpu.reciprocal %178 : vector<128x16xf32> -> vector<128x16xf32>
    %180 = arith.mulf %173, %179 : vector<128x16xf32>
    %c0_121 = arith.constant 0 : index
    %c0_122 = arith.constant 0 : index
    %181 = vector.load %arg5[%c0_121, %c0_122] : memref<8x16xf32, #tpu.memory_space<vmem>>, vector<8x16xf32>
    %cst_123 = arith.constant dense<0.000000e+00> : vector<128x16xf32>
    %182 = tpu.matmul %24, %181, %cst_123 {dimension_numbers = #tpu.dot_dimension_numbers<[1], [0], [0], [1], [0, 0, 1, 1], [], []>} : vector<128x8xf32>, vector<8x16xf32>, vector<128x16xf32> -> vector<128x16xf32>
    %c0_124 = arith.constant 0 : index
    %c0_125 = arith.constant 0 : index
    %183 = vector.load %arg6[%c0_124, %c0_125] : memref<1x16xf32, #tpu.memory_space<vmem>>, vector<1x16xf32>
    %184 = vector.broadcast %183 : vector<1x16xf32> to vector<128x16xf32>
    %185 = arith.addf %182, %184 : vector<128x16xf32>
    %cst_126 = arith.constant 0.000000e+00 : f32
    %186 = vector.broadcast %cst_126 : f32 to vector<2x16x16xf32>
    %c0_127 = arith.constant 0 : index
    %c0_128 = arith.constant 0 : index
    %c0_129 = arith.constant 0 : index
    %187 = vector.load %arg21[%c0_127, %c0_128, %c0_129] : memref<2x96x16xf32, #tpu.memory_space<vmem>>, vector<2x16x16xf32>
    tpu.vector_store %arg21[%c0_127, %c0_128, %c0_129], %186 {strides = array<i32>} : memref<2x96x16xf32, #tpu.memory_space<vmem>>, vector<2x16x16xf32>,
    %cst_130 = arith.constant 0.000000e+00 : f32
    %188 = vector.broadcast %cst_130 : f32 to vector<2x16x16xf32>
    %c0_131 = arith.constant 0 : index
    %c80_132 = arith.constant 80 : index
    %c0_133 = arith.constant 0 : index
    %189 = vector.load %arg21[%c0_131, %c80_132, %c0_133] : memref<2x96x16xf32, #tpu.memory_space<vmem>>, vector<2x16x16xf32>
    tpu.vector_store %arg21[%c0_131, %c80_132, %c0_133], %188 {strides = array<i32>} : memref<2x96x16xf32, #tpu.memory_space<vmem>>, vector<2x16x16xf32>,
    %190 = vector.shape_cast %180 : vector<128x16xf32> to vector<2x64x16xf32>
    %c0_134 = arith.constant 0 : index
    %c16_135 = arith.constant 16 : index
    %c0_136 = arith.constant 0 : index
    %191 = vector.load %arg21[%c0_134, %c16_135, %c0_136] : memref<2x96x16xf32, #tpu.memory_space<vmem>>, vector<2x64x16xf32>
    tpu.vector_store %arg21[%c0_134, %c16_135, %c0_136], %190 {strides = array<i32>} : memref<2x96x16xf32, #tpu.memory_space<vmem>>, vector<2x64x16xf32>,
    %c0_137 = arith.constant 0 : index
    %c7_138 = arith.constant 7 : index
    %c0_139 = arith.constant 0 : index
    %192 = vector.load %arg21[%c0_137, %c7_138, %c0_139] : memref<2x96x16xf32, #tpu.memory_space<vmem>>, vector<2x64x16xf32>
    %193 = vector.shape_cast %192 : vector<2x64x16xf32> to vector<128x16xf32>
    %c0_140 = arith.constant 0 : index
    %c0_141 = arith.constant 0 : index
    %c0_142 = arith.constant 0 : index
    %194 = vector.load %arg14[%c0_140, %c0_141, %c0_142] : memref<9x16x16xf32, #tpu.memory_space<vmem>>, vector<1x16x16xf32>
    %195 = vector.shape_cast %194 : vector<1x16x16xf32> to vector<16x16xf32>
    %cst_143 = arith.constant dense<0.000000e+00> : vector<128x16xf32>
    %196 = tpu.matmul %193, %195, %cst_143 {dimension_numbers = #tpu.dot_dimension_numbers<[1], [0], [0], [1], [0, 0, 1, 1], [], []>} : vector<128x16xf32>, vector<16x16xf32>, vector<128x16xf32> -> vector<128x16xf32>
    %c0_144 = arith.constant 0 : index
    %c15_145 = arith.constant 15 : index
    %c0_146 = arith.constant 0 : index
    %197 = vector.load %arg21[%c0_144, %c15_145, %c0_146] : memref<2x96x16xf32, #tpu.memory_space<vmem>>, vector<2x64x16xf32>
    %198 = vector.shape_cast %197 : vector<2x64x16xf32> to vector<128x16xf32>
    %c3_147 = arith.constant 3 : index
    %c0_148 = arith.constant 0 : index
    %c0_149 = arith.constant 0 : index
    %199 = vector.load %arg14[%c3_147, %c0_148, %c0_149] : memref<9x16x16xf32, #tpu.memory_space<vmem>>, vector<1x16x16xf32>
    %200 = vector.shape_cast %199 : vector<1x16x16xf32> to vector<16x16xf32>
    %cst_150 = arith.constant dense<0.000000e+00> : vector<128x16xf32>
    %201 = tpu.matmul %198, %200, %cst_150 {dimension_numbers = #tpu.dot_dimension_numbers<[1], [0], [0], [1], [0, 0, 1, 1], [], []>} : vector<128x16xf32>, vector<16x16xf32>, vector<128x16xf32> -> vector<128x16xf32>
    %202 = arith.addf %196, %201 : vector<128x16xf32>
    %c0_151 = arith.constant 0 : index
    %c23_152 = arith.constant 23 : index
    %c0_153 = arith.constant 0 : index
    %203 = vector.load %arg21[%c0_151, %c23_152, %c0_153] : memref<2x96x16xf32, #tpu.memory_space<vmem>>, vector<2x64x16xf32>
    %204 = vector.shape_cast %203 : vector<2x64x16xf32> to vector<128x16xf32>
    %c6_154 = arith.constant 6 : index
    %c0_155 = arith.constant 0 : index
    %c0_156 = arith.constant 0 : index
    %205 = vector.load %arg14[%c6_154, %c0_155, %c0_156] : memref<9x16x16xf32, #tpu.memory_space<vmem>>, vector<1x16x16xf32>
    %206 = vector.shape_cast %205 : vector<1x16x16xf32> to vector<16x16xf32>
    %cst_157 = arith.constant dense<0.000000e+00> : vector<128x16xf32>
    %207 = tpu.matmul %204, %206, %cst_157 {dimension_numbers = #tpu.dot_dimension_numbers<[1], [0], [0], [1], [0, 0, 1, 1], [], []>} : vector<128x16xf32>, vector<16x16xf32>, vector<128x16xf32> -> vector<128x16xf32>
    %208 = arith.addf %202, %207 : vector<128x16xf32>
    %cst_158 = arith.constant 0.000000e+00 : f32
    %209 = vector.shape_cast %20 : vector<128x1xi1> to vector<128x1xi1>
    %210 = vector.broadcast %209 : vector<128x1xi1> to vector<128x16xi1>
    %211 = vector.broadcast %cst_158 : f32 to vector<128x16xf32>
    %212 = arith.select %210, %208, %211 : vector<128x16xi1>, vector<128x16xf32>
    %213 = arith.addf %185, %212 : vector<128x16xf32>
    %c0_159 = arith.constant 0 : index
    %c8_160 = arith.constant 8 : index
    %c0_161 = arith.constant 0 : index
    %214 = vector.load %arg21[%c0_159, %c8_160, %c0_161] : memref<2x96x16xf32, #tpu.memory_space<vmem>>, vector<2x64x16xf32>
    %215 = vector.shape_cast %214 : vector<2x64x16xf32> to vector<128x16xf32>
    %c1_162 = arith.constant 1 : index
    %c0_163 = arith.constant 0 : index
    %c0_164 = arith.constant 0 : index
    %216 = vector.load %arg14[%c1_162, %c0_163, %c0_164] : memref<9x16x16xf32, #tpu.memory_space<vmem>>, vector<1x16x16xf32>
    %217 = vector.shape_cast %216 : vector<1x16x16xf32> to vector<16x16xf32>
    %cst_165 = arith.constant dense<0.000000e+00> : vector<128x16xf32>
    %218 = tpu.matmul %215, %217, %cst_165 {dimension_numbers = #tpu.dot_dimension_numbers<[1], [0], [0], [1], [0, 0, 1, 1], [], []>} : vector<128x16xf32>, vector<16x16xf32>, vector<128x16xf32> -> vector<128x16xf32>
    %c0_166 = arith.constant 0 : index
    %c16_167 = arith.constant 16 : index
    %c0_168 = arith.constant 0 : index
    %219 = vector.load %arg21[%c0_166, %c16_167, %c0_168] : memref<2x96x16xf32, #tpu.memory_space<vmem>>, vector<2x64x16xf32>
    %220 = vector.shape_cast %219 : vector<2x64x16xf32> to vector<128x16xf32>
    %c4_169 = arith.constant 4 : index
    %c0_170 = arith.constant 0 : index
    %c0_171 = arith.constant 0 : index
    %221 = vector.load %arg14[%c4_169, %c0_170, %c0_171] : memref<9x16x16xf32, #tpu.memory_space<vmem>>, vector<1x16x16xf32>
    %222 = vector.shape_cast %221 : vector<1x16x16xf32> to vector<16x16xf32>
    %cst_172 = arith.constant dense<0.000000e+00> : vector<128x16xf32>
    %223 = tpu.matmul %220, %222, %cst_172 {dimension_numbers = #tpu.dot_dimension_numbers<[1], [0], [0], [1], [0, 0, 1, 1], [], []>} : vector<128x16xf32>, vector<16x16xf32>, vector<128x16xf32> -> vector<128x16xf32>
    %224 = arith.addf %218, %223 : vector<128x16xf32>
    %c0_173 = arith.constant 0 : index
    %c24_174 = arith.constant 24 : index
    %c0_175 = arith.constant 0 : index
    %225 = vector.load %arg21[%c0_173, %c24_174, %c0_175] : memref<2x96x16xf32, #tpu.memory_space<vmem>>, vector<2x64x16xf32>
    %226 = vector.shape_cast %225 : vector<2x64x16xf32> to vector<128x16xf32>
    %c7_176 = arith.constant 7 : index
    %c0_177 = arith.constant 0 : index
    %c0_178 = arith.constant 0 : index
    %227 = vector.load %arg14[%c7_176, %c0_177, %c0_178] : memref<9x16x16xf32, #tpu.memory_space<vmem>>, vector<1x16x16xf32>
    %228 = vector.shape_cast %227 : vector<1x16x16xf32> to vector<16x16xf32>
    %cst_179 = arith.constant dense<0.000000e+00> : vector<128x16xf32>
    %229 = tpu.matmul %226, %228, %cst_179 {dimension_numbers = #tpu.dot_dimension_numbers<[1], [0], [0], [1], [0, 0, 1, 1], [], []>} : vector<128x16xf32>, vector<16x16xf32>, vector<128x16xf32> -> vector<128x16xf32>
    %230 = arith.addf %224, %229 : vector<128x16xf32>
    %231 = arith.addf %213, %230 : vector<128x16xf32>
    %c0_180 = arith.constant 0 : index
    %c9_181 = arith.constant 9 : index
    %c0_182 = arith.constant 0 : index
    %232 = vector.load %arg21[%c0_180, %c9_181, %c0_182] : memref<2x96x16xf32, #tpu.memory_space<vmem>>, vector<2x64x16xf32>
    %233 = vector.shape_cast %232 : vector<2x64x16xf32> to vector<128x16xf32>
    %c2_183 = arith.constant 2 : index
    %c0_184 = arith.constant 0 : index
    %c0_185 = arith.constant 0 : index
    %234 = vector.load %arg14[%c2_183, %c0_184, %c0_185] : memref<9x16x16xf32, #tpu.memory_space<vmem>>, vector<1x16x16xf32>
    %235 = vector.shape_cast %234 : vector<1x16x16xf32> to vector<16x16xf32>
    %cst_186 = arith.constant dense<0.000000e+00> : vector<128x16xf32>
    %236 = tpu.matmul %233, %235, %cst_186 {dimension_numbers = #tpu.dot_dimension_numbers<[1], [0], [0], [1], [0, 0, 1, 1], [], []>} : vector<128x16xf32>, vector<16x16xf32>, vector<128x16xf32> -> vector<128x16xf32>
    %c0_187 = arith.constant 0 : index
    %c17_188 = arith.constant 17 : index
    %c0_189 = arith.constant 0 : index
    %237 = vector.load %arg21[%c0_187, %c17_188, %c0_189] : memref<2x96x16xf32, #tpu.memory_space<vmem>>, vector<2x64x16xf32>
    %238 = vector.shape_cast %237 : vector<2x64x16xf32> to vector<128x16xf32>
    %c5_190 = arith.constant 5 : index
    %c0_191 = arith.constant 0 : index
    %c0_192 = arith.constant 0 : index
    %239 = vector.load %arg14[%c5_190, %c0_191, %c0_192] : memref<9x16x16xf32, #tpu.memory_space<vmem>>, vector<1x16x16xf32>
    %240 = vector.shape_cast %239 : vector<1x16x16xf32> to vector<16x16xf32>
    %cst_193 = arith.constant dense<0.000000e+00> : vector<128x16xf32>
    %241 = tpu.matmul %238, %240, %cst_193 {dimension_numbers = #tpu.dot_dimension_numbers<[1], [0], [0], [1], [0, 0, 1, 1], [], []>} : vector<128x16xf32>, vector<16x16xf32>, vector<128x16xf32> -> vector<128x16xf32>
    %242 = arith.addf %236, %241 : vector<128x16xf32>
    %c0_194 = arith.constant 0 : index
    %c25_195 = arith.constant 25 : index
    %c0_196 = arith.constant 0 : index
    %243 = vector.load %arg21[%c0_194, %c25_195, %c0_196] : memref<2x96x16xf32, #tpu.memory_space<vmem>>, vector<2x64x16xf32>
    %244 = vector.shape_cast %243 : vector<2x64x16xf32> to vector<128x16xf32>
    %c8_197 = arith.constant 8 : index
    %c0_198 = arith.constant 0 : index
    %c0_199 = arith.constant 0 : index
    %245 = vector.load %arg14[%c8_197, %c0_198, %c0_199] : memref<9x16x16xf32, #tpu.memory_space<vmem>>, vector<1x16x16xf32>
    %246 = vector.shape_cast %245 : vector<1x16x16xf32> to vector<16x16xf32>
    %cst_200 = arith.constant dense<0.000000e+00> : vector<128x16xf32>
    %247 = tpu.matmul %244, %246, %cst_200 {dimension_numbers = #tpu.dot_dimension_numbers<[1], [0], [0], [1], [0, 0, 1, 1], [], []>} : vector<128x16xf32>, vector<16x16xf32>, vector<128x16xf32> -> vector<128x16xf32>
    %248 = arith.addf %242, %247 : vector<128x16xf32>
    %cst_201 = arith.constant 0.000000e+00 : f32
    %249 = vector.shape_cast %22 : vector<128x1xi1> to vector<128x1xi1>
    %250 = vector.broadcast %249 : vector<128x1xi1> to vector<128x16xi1>
    %251 = vector.broadcast %cst_201 : f32 to vector<128x16xf32>
    %252 = arith.select %250, %248, %251 : vector<128x16xi1>, vector<128x16xf32>
    %253 = arith.addf %231, %252 : vector<128x16xf32>
    %254 = vector.shape_cast %253 : vector<128x16xf32> to vector<2x64x16xf32>
    %c0_202 = arith.constant 0 : index
    %c0_203 = arith.constant 0 : index
    %c0_204 = arith.constant 0 : index
    %255 = vector.load %arg19[%c0_202, %c0_203, %c0_204] : memref<2x64x16xf32, #tpu.memory_space<vmem>>, vector<2x64x16xf32>
    tpu.vector_store %arg19[%c0_202, %c0_203, %c0_204], %254 {strides = array<i32>} : memref<2x64x16xf32, #tpu.memory_space<vmem>>, vector<2x64x16xf32>,
    return
  }
  func.func @transform_0(%arg0: i32) -> (i32, i32, i32) {
    %c0_i32 = arith.constant 0 : i32
    %c0_i32_0 = arith.constant 0 : i32
    %c0_i32_1 = arith.constant 0 : i32
    return %arg0, %c0_i32, %c0_i32_0 : i32, i32, i32
  }
  func.func @transform_1(%arg0: i32) -> (i32, i32, i32) {
    %c0_i32 = arith.constant 0 : i32
    %c0_i32_0 = arith.constant 0 : i32
    %c0_i32_1 = arith.constant 0 : i32
    return %arg0, %c0_i32, %c0_i32_0 : i32, i32, i32
  }
  func.func @transform_2(%arg0: i32) -> (i32, i32) {
    %c0_i32 = arith.constant 0 : i32
    %c0_i32_0 = arith.constant 0 : i32
    %c0_i32_1 = arith.constant 0 : i32
    return %c0_i32, %c0_i32_0 : i32, i32
  }
  func.func @transform_3(%arg0: i32) -> (i32, i32) {
    %c0_i32 = arith.constant 0 : i32
    %c0_i32_0 = arith.constant 0 : i32
    %c0_i32_1 = arith.constant 0 : i32
    return %c0_i32, %c0_i32_0 : i32, i32
  }
  func.func @transform_4(%arg0: i32) -> (i32, i32) {
    %c0_i32 = arith.constant 0 : i32
    %c0_i32_0 = arith.constant 0 : i32
    %c0_i32_1 = arith.constant 0 : i32
    return %c0_i32, %c0_i32_0 : i32, i32
  }
  func.func @transform_5(%arg0: i32) -> (i32, i32) {
    %c0_i32 = arith.constant 0 : i32
    %c0_i32_0 = arith.constant 0 : i32
    %c0_i32_1 = arith.constant 0 : i32
    return %c0_i32, %c0_i32_0 : i32, i32
  }
  func.func @transform_6(%arg0: i32) -> (i32, i32) {
    %c0_i32 = arith.constant 0 : i32
    %c0_i32_0 = arith.constant 0 : i32
    %c0_i32_1 = arith.constant 0 : i32
    return %c0_i32, %c0_i32_0 : i32, i32
  }
  func.func @transform_7(%arg0: i32) -> (i32, i32) {
    %c0_i32 = arith.constant 0 : i32
    %c0_i32_0 = arith.constant 0 : i32
    %c0_i32_1 = arith.constant 0 : i32
    return %c0_i32, %c0_i32_0 : i32, i32
  }
  func.func @transform_8(%arg0: i32) -> (i32, i32) {
    %c0_i32 = arith.constant 0 : i32
    %c0_i32_0 = arith.constant 0 : i32
    %c0_i32_1 = arith.constant 0 : i32
    return %c0_i32, %c0_i32_0 : i32, i32
  }
  func.func @transform_9(%arg0: i32) -> (i32, i32) {
    %c0_i32 = arith.constant 0 : i32
    %c0_i32_0 = arith.constant 0 : i32
    %c0_i32_1 = arith.constant 0 : i32
    return %c0_i32, %c0_i32_0 : i32, i32
  }
  func.func @transform_10(%arg0: i32) -> (i32, i32) {
    %c0_i32 = arith.constant 0 : i32
    %c0_i32_0 = arith.constant 0 : i32
    %c0_i32_1 = arith.constant 0 : i32
    return %c0_i32, %c0_i32_0 : i32, i32
  }
  func.func @transform_11(%arg0: i32) -> (i32, i32) {
    %c0_i32 = arith.constant 0 : i32
    %c0_i32_0 = arith.constant 0 : i32
    %c0_i32_1 = arith.constant 0 : i32
    return %c0_i32, %c0_i32_0 : i32, i32
  }
  func.func @transform_12(%arg0: i32) -> (i32, i32, i32) {
    %c0_i32 = arith.constant 0 : i32
    %c0_i32_0 = arith.constant 0 : i32
    %c0_i32_1 = arith.constant 0 : i32
    %c0_i32_2 = arith.constant 0 : i32
    return %c0_i32, %c0_i32_0, %c0_i32_1 : i32, i32, i32
  }
  func.func @transform_13(%arg0: i32) -> (i32, i32, i32) {
    %c0_i32 = arith.constant 0 : i32
    %c0_i32_0 = arith.constant 0 : i32
    %c0_i32_1 = arith.constant 0 : i32
    %c0_i32_2 = arith.constant 0 : i32
    return %c0_i32, %c0_i32_0, %c0_i32_1 : i32, i32, i32
  }
  func.func @transform_14(%arg0: i32) -> (i32, i32) {
    %c0_i32 = arith.constant 0 : i32
    %c0_i32_0 = arith.constant 0 : i32
    %c0_i32_1 = arith.constant 0 : i32
    return %c0_i32, %c0_i32_0 : i32, i32
  }
  func.func @transform_15(%arg0: i32) -> (i32, i32) {
    %c0_i32 = arith.constant 0 : i32
    %c0_i32_0 = arith.constant 0 : i32
    %c0_i32_1 = arith.constant 0 : i32
    return %c0_i32, %c0_i32_0 : i32, i32
  }
  func.func @transform_16(%arg0: i32) -> (i32, i32) {
    %c0_i32 = arith.constant 0 : i32
    %c0_i32_0 = arith.constant 0 : i32
    %c0_i32_1 = arith.constant 0 : i32
    return %c0_i32, %c0_i32_0 : i32, i32
  }
  func.func @transform_17(%arg0: i32) -> (i32, i32) {
    %c0_i32 = arith.constant 0 : i32
    %c0_i32_0 = arith.constant 0 : i32
    %c0_i32_1 = arith.constant 0 : i32
    return %c0_i32, %c0_i32_0 : i32, i32
  }
  func.func @transform_18(%arg0: i32) -> (i32, i32, i32) {
    %c0_i32 = arith.constant 0 : i32
    %c0_i32_0 = arith.constant 0 : i32
    %c0_i32_1 = arith.constant 0 : i32
    return %arg0, %c0_i32, %c0_i32_0 : i32, i32, i32
  }
}

</mosaic_0001>

<bundles_post_ra>
// kernel: tpu_custom_call.1
= control target key start
LH: loop header
LB: loop body
LE: loop exit
PB: predicated region body
PF: predicated region fallthrough
CT: control target
= control target key end

     0   :  { %s11580_s0 = inlined_call_operand.hbm [shape: f32[2,64,8], index: 0, kind: input, shape index: {}]   ;;  %s11581_s1 = inlined_call_operand.hbm [shape: f32[2,1,32], index: 1, kind: input, shape index: {}]   ;;  %s11582_s2 = inlined_call_operand.hbm [shape: f32[2,128], index: 2, kind: input, shape index: {}]   ;;  %s11583_s3 = inlined_call_operand.hbm [shape: f32[128,2], index: 3, kind: input, shape index: {}]   ;;  %s11584_s4 = inlined_call_operand.hbm [shape: f32[8,16], index: 4, kind: input, shape index: {}]   ;;  %s11585_s5 = inlined_call_operand.hbm [shape: f32[1,16], index: 5, kind: input, shape index: {}]   ;;  %s11586_s6 = inlined_call_operand.hbm [shape: f32[32,16], index: 6, kind: input, shape index: {}]   ;;  %s11587_s7 = inlined_call_operand.hbm [shape: f32[1,16], index: 7, kind: input, shape index: {}]   ;;  %s11588_s8 = inlined_call_operand.hbm [shape: f32[1,8], index: 8, kind: input, shape index: {}]   ;;  %s11589_s9 = inlined_call_operand.hbm [shape: f32[1,8], index: 9, kind: input, shape index: {}]   ;;  %s11590_s10 = inlined_call_operand.hbm [shape: f32[1,16], index: 10, kind: input, shape index: {}]   ;;  %s11591_s11 = inlined_call_operand.hbm [shape: f32[1,16], index: 11, kind: input, shape index: {}]   ;;  %s11592_s12 = inlined_call_operand.hbm [shape: f32[9,8,16], index: 12, kind: input, shape index: {}]   ;;  %s11593_s13 = inlined_call_operand.hbm [shape: f32[9,16,16], index: 13, kind: input, shape index: {}]   ;;  %s11594_s14 = inlined_call_operand.hbm [shape: f32[8,4], index: 14, kind: input, shape index: {}]   ;;  %s11595_s15 = inlined_call_operand.hbm [shape: f32[4,8], index: 15, kind: input, shape index: {}]   ;;  %s11596_s16 = inlined_call_operand.hbm [shape: f32[16,4], index: 16, kind: input, shape index: {}]   ;;  %s11597_s17 = inlined_call_operand.hbm [shape: f32[4,16], index: 17, kind: input, shape index: {}]   ;;  %s11598_s18 = inlined_call_operand.hbm [shape: f32[2,64,16], index: 18, kind: output, shape index: {}]  }
   0x1   :  { %11658 = sst [smem:[#allocation60_spill]] %s11580_s0 }
   0x2   :  { %11659 = sst [smem:[#allocation61_spill]] %s11581_s1 }
   0x3   :  { %11660 = sst [smem:[#allocation62_spill]] %s11582_s2 }
   0x4   :  { %11661 = sst [smem:[#allocation63_spill]] %s11597_s17 }
   0x5   :  { %11662 = sst [smem:[#allocation64_spill]] %s11598_s18 }
   0x6   :  { %23 = vsyncpa [#allocation5], 0 }
   0x7   :  { %24 = vsyncpa [#allocation8], 0 }
   0x8   :  { %25 = vsyncpa [#allocation11], 0 }
   0x9   :  { %26 = vsyncpa [#allocation14], 0 }
   0xa   :  { %27 = vsyncpa [#allocation17], 0 }
   0xb   :  { %28 = vsyncpa [#allocation20], 0 }
   0xc   :  { %29 = vsyncpa [#allocation23], 0 }
   0xd   :  { %30 = vsyncpa [#allocation26], 0 }
   0xe   :  { %31 = vsyncpa [#allocation29], 0 }
   0xf   :  { %32 = vsyncpa [#allocation32], 0 }
  0x10   :  { %33 = vsyncpa [#allocation6], 0  ;;  %s9495_s27 = smov [#allocation7]   ;;  %s11663_s0 = sld [smem:[#allocation61_spill]] }
  0x11   :  { %s51_s28 = sshll.u32 %s9495_s27, 4  ;;  %s52_s28 = int_to_ptr.vmem [resolvable:$true] %s51_s28 }
  0x16   :  { %s9055_s19 = scalar_lea.hbm %s11663_s0, 32 }
  0x17   :  { %p9056_p0 = scmp.ne.s32.totalorder %s11663_s0, %s9055_s19  ;;  %p9059_p1 = scmp.lt.u32.totalorder %s9055_s19, %s11663_s0 }
  0x19   :  { %p9061_p2 = pnand %p9059_p1, %p9056_p0 }
  0x1b   :  { %9064 = shalt.err (!%p9061_p2)
}
  0x1c   :  { %s9065_s2 = scalar_lea.vmem %s52_s28, 32  ;;  %p9070_p4 = scmp.lt.s32.totalorder %s52_s28, %s52_s28 }
  0x1d   :  { %p9066_p3 = scmp.ne.s32.totalorder %s52_s28, %s9065_s2  ;;  %p9071_p5 = scmp.lt.s32.totalorder %s9065_s2, %s9065_s2 }
  0x1f   :  { %p9072_p6 = por %p9071_p5, %p9070_p4 }
  0x21   :  { %p9073_p7 = pnand %p9072_p6, %p9066_p3 }
  0x23   :  { %9076 = shalt.err (!%p9073_p7)
}
  0x24   :  { %s9496_s23 = smov 16   ;;  %s9497_s24 = smov 1  }
  0x25   :  { %57 = dma.hbm_to_vmem [thread:$0]  %s11663_s0, 32, %s52_s28, [#allocation8], %s9496_s23, %s9496_s23, %s9497_s24  }
  0x26   :  { %s9498_s27 = smov [#allocation10]   ;;  %s9499_s30 = smov [#allocation13]  }
  0x27   :  { %s73_s29 = sshll.u32 %s9498_s27, 4  ;;  %s96_s19 = sshll.u32 %s9499_s30, 4  ;;  %s74_s29 = int_to_ptr.vmem [resolvable:$true] %s73_s29  ;;  %s97_s19 = int_to_ptr.vmem [resolvable:$true] %s96_s19 }
  0x28   :  { %s9077_s21 = scalar_lea.hbm %s11583_s3, 2048 }
  0x29   :  { %p9078_p8 = scmp.ne.s32.totalorder %s11583_s3, %s9077_s21  ;;  %p9081_p9 = scmp.lt.u32.totalorder %s9077_s21, %s11583_s3 }
  0x2b   :  { %p9083_p10 = pnand %p9081_p9, %p9078_p8 }
  0x2d   :  { %9086 = shalt.err (!%p9083_p10)
}
  0x2e   :  { %s9087_s28 = scalar_lea.vmem %s74_s29, 2048  ;;  %p9092_p12 = scmp.lt.s32.totalorder %s74_s29, %s74_s29 }
  0x2f   :  { %p9088_p11 = scmp.ne.s32.totalorder %s74_s29, %s9087_s28  ;;  %p9093_p13 = scmp.lt.s32.totalorder %s9087_s28, %s9087_s28 }
  0x31   :  { %p9094_p0 = por %p9093_p13, %p9092_p12 }
  0x33   :  { %p9095_p1 = pnand %p9094_p0, %p9088_p11 }
  0x35   :  { %9098 = shalt.err (!%p9095_p1)
}
  0x36   :  { %s9500_s0 = smov 128   ;;  %s9501_s23 = smov 8  }
  0x37   :  { %79 = dma.hbm_to_vmem [thread:$0]  %s11583_s3, 2048, %s74_s29, [#allocation11], %s9500_s0, %s9500_s0, %s9501_s23  }
  0x38   :  { %s9099_s26 = scalar_lea.hbm %s11585_s5, 16 }
  0x39   :  { %p9100_p2 = scmp.ne.s32.totalorder %s11585_s5, %s9099_s26  ;;  %p9103_p3 = scmp.lt.u32.totalorder %s9099_s26, %s11585_s5 }
  0x3b   :  { %p9105_p4 = pnand %p9103_p3, %p9100_p2 }
  0x3d   :  { %9108 = shalt.err (!%p9105_p4)
}
  0x3e   :  { %s9109_s21 = scalar_lea.vmem %s97_s19, 16  ;;  %s9113_s22 = scalar_lea.vmem %s97_s19, 32 }
  0x3f   :  { %p9110_p5 = scmp.ne.s32.totalorder %s97_s19, %s9109_s21  ;;  %p9114_p6 = scmp.lt.s32.totalorder %s97_s19, %s97_s19 }
  0x40   :  { %p9115_p7 = scmp.lt.s32.totalorder %s9113_s22, %s9109_s21 }
  0x42   :  { %p9116_p8 = por %p9115_p7, %p9114_p6 }
  0x44   :  { %p9117_p9 = pnand %p9116_p8, %p9110_p5 }
  0x46   :  { %9120 = shalt.err (!%p9117_p9)
}
  0x47   :  { %99 = dma.hbm_to_vmem [thread:$0]  %s11585_s5, 16, %s97_s19, [#allocation14]  }
  0x48   :  { %s9502_s2 = smov [#allocation16]   ;;  %s9503_s24 = smov [#allocation19]  }
  0x49   :  { %s118_s28 = sshll.u32 %s9502_s2, 4  ;;  %s138_s25 = sshll.u32 %s9503_s24, 4  ;;  %s119_s28 = int_to_ptr.vmem [resolvable:$true] %s118_s28  ;;  %s139_s25 = int_to_ptr.vmem [resolvable:$true] %s138_s25 }
  0x4a   :  { %s9121_s26 = scalar_lea.hbm %s11587_s7, 16 }
  0x4b   :  { %p9122_p10 = scmp.ne.s32.totalorder %s11587_s7, %s9121_s26  ;;  %p9125_p11 = scmp.lt.u32.totalorder %s9121_s26, %s11587_s7 }
  0x4d   :  { %p9127_p12 = pnand %p9125_p11, %p9122_p10 }
  0x4f   :  { %9130 = shalt.err (!%p9127_p12)
}
  0x50   :  { %s9131_s5 = scalar_lea.vmem %s119_s28, 16  ;;  %s9135_s19 = scalar_lea.vmem %s119_s28, 32 }
  0x51   :  { %p9132_p13 = scmp.ne.s32.totalorder %s119_s28, %s9131_s5  ;;  %p9136_p0 = scmp.lt.s32.totalorder %s119_s28, %s119_s28 }
  0x52   :  { %p9137_p1 = scmp.lt.s32.totalorder %s9135_s19, %s9131_s5 }
  0x54   :  { %p9138_p2 = por %p9137_p1, %p9136_p0 }
  0x56   :  { %p9139_p3 = pnand %p9138_p2, %p9132_p13 }
  0x58   :  { %9142 = shalt.err (!%p9139_p3)
}
  0x59   :  { %121 = dma.hbm_to_vmem [thread:$0]  %s11587_s7, 16, %s119_s28, [#allocation17]  }
  0x5a   :  { %s9143_s2 = scalar_lea.hbm %s11589_s9, 16 }
  0x5b   :  { %p9144_p4 = scmp.ne.s32.totalorder %s11589_s9, %s9143_s2  ;;  %p9147_p5 = scmp.lt.u32.totalorder %s9143_s2, %s11589_s9 }
  0x5d   :  { %p9149_p6 = pnand %p9147_p5, %p9144_p4 }
  0x5f   :  { %9152 = shalt.err (!%p9149_p6)
}
  0x60   :  { %s9153_s27 = scalar_lea.vmem %s139_s25, 16  ;;  %s9157_s30 = scalar_lea.vmem %s139_s25, 32 }
  0x61   :  { %p9154_p7 = scmp.ne.s32.totalorder %s139_s25, %s9153_s27  ;;  %p9158_p8 = scmp.lt.s32.totalorder %s139_s25, %s139_s25 }
  0x62   :  { %p9159_p9 = scmp.lt.s32.totalorder %s9157_s30, %s9153_s27 }
  0x64   :  { %p9160_p10 = por %p9159_p9, %p9158_p8 }
  0x66   :  { %p9161_p11 = pnand %p9160_p10, %p9154_p7 }
  0x68   :  { %9164 = shalt.err (!%p9161_p11)
}
  0x69   :  { %141 = dma.hbm_to_vmem [thread:$0]  %s11589_s9, 16, %s139_s25, [#allocation20]  }
  0x6a   :  { %s9504_s1 = smov [#allocation22]   ;;  %s9505_s5 = smov [#allocation25]  }
  0x6b   :  { %s158_s20 = sshll.u32 %s9504_s1, 4  ;;  %s179_s19 = sshll.u32 %s9505_s5, 4  ;;  %s159_s20 = int_to_ptr.vmem [resolvable:$true] %s158_s20  ;;  %s180_s19 = int_to_ptr.vmem [resolvable:$true] %s179_s19 }
  0x6c   :  { %s9165_s3 = scalar_lea.hbm %s11591_s11, 16 }
  0x6d   :  { %p9166_p12 = scmp.ne.s32.totalorder %s11591_s11, %s9165_s3  ;;  %p9169_p13 = scmp.lt.u32.totalorder %s9165_s3, %s11591_s11 }
  0x6f   :  { %p9171_p0 = pnand %p9169_p13, %p9166_p12 }
  0x71   :  { %9174 = shalt.err (!%p9171_p0)
}
  0x72   :  { %s9175_s9 = scalar_lea.vmem %s159_s20, 16  ;;  %s9179_s25 = scalar_lea.vmem %s159_s20, 32 }
  0x73   :  { %p9176_p1 = scmp.ne.s32.totalorder %s159_s20, %s9175_s9  ;;  %p9180_p2 = scmp.lt.s32.totalorder %s159_s20, %s159_s20 }
  0x74   :  { %p9181_p3 = scmp.lt.s32.totalorder %s9179_s25, %s9175_s9 }
  0x76   :  { %p9182_p4 = por %p9181_p3, %p9180_p2 }
  0x78   :  { %p9183_p5 = pnand %p9182_p4, %p9176_p1 }
  0x7a   :  { %9186 = shalt.err (!%p9183_p5)
}
  0x7b   :  { %161 = dma.hbm_to_vmem [thread:$0]  %s11591_s11, 16, %s159_s20, [#allocation23]  }
  0x7c   :  { %s9187_s7 = scalar_lea.hbm %s11593_s13, 2304 }
  0x7d   :  { %p9188_p6 = scmp.ne.s32.totalorder %s11593_s13, %s9187_s7  ;;  %p9191_p7 = scmp.lt.u32.totalorder %s9187_s7, %s11593_s13 }
  0x7f   :  { %p9193_p8 = pnand %p9191_p7, %p9188_p6 }
  0x81   :  { %9196 = shalt.err (!%p9193_p8)
}
  0x82   :  { %s9197_s22 = scalar_lea.vmem %s180_s19, 2304  ;;  %p9202_p10 = scmp.lt.s32.totalorder %s180_s19, %s180_s19 }
  0x83   :  { %p9198_p9 = scmp.ne.s32.totalorder %s180_s19, %s9197_s22  ;;  %p9203_p11 = scmp.lt.s32.totalorder %s9197_s22, %s9197_s22 }
  0x85   :  { %p9204_p12 = por %p9203_p11, %p9202_p10 }
  0x87   :  { %p9205_p13 = pnand %p9204_p12, %p9198_p9 }
  0x89   :  { %9208 = shalt.err (!%p9205_p13)
}
  0x8a   :  { %185 = dma.hbm_to_vmem [thread:$0]  %s11593_s13, 2304, %s180_s19, [#allocation26], %s9500_s0, %s9500_s0, %s9501_s23  }
  0x8b   :  { %s9506_s3 = smov [#allocation28]   ;;  %s9507_s2 = smov [#allocation4]  }
  0x8c   :  { %s202_s29 = sshll.u32 %s9506_s3, 4  ;;  %s39_s24 = sshll.u32 %s9507_s2, 4  ;;  %s203_s29 = int_to_ptr.vmem [resolvable:$true] %s202_s29  ;;  %s40_s24 = int_to_ptr.vmem [resolvable:$true] %s39_s24 }
  0x8d   :  { %s9209_s25 = scalar_lea.hbm %s11595_s15, 64 }
  0x8e   :  { %p9210_p0 = scmp.ne.s32.totalorder %s11595_s15, %s9209_s25  ;;  %p9213_p1 = scmp.lt.u32.totalorder %s9209_s25, %s11595_s15 }
  0x90   :  { %p9215_p2 = pnand %p9213_p1, %p9210_p0 }
  0x92   :  { %9218 = shalt.err (!%p9215_p2)
}
  0x93   :  { %s9219_s13 = scalar_lea.vmem %s203_s29, 64  ;;  %p9224_p4 = scmp.lt.s32.totalorder %s203_s29, %s203_s29 }
  0x94   :  { %p9220_p3 = scmp.ne.s32.totalorder %s203_s29, %s9219_s13  ;;  %p9225_p5 = scmp.lt.s32.totalorder %s9219_s13, %s9219_s13 }
  0x96   :  { %p9226_p6 = por %p9225_p5, %p9224_p4 }
  0x98   :  { %p9227_p7 = pnand %p9226_p6, %p9220_p3 }
  0x9a   :  { %9230 = shalt.err (!%p9227_p7)
}
  0x9b   :  { %205 = dma.hbm_to_vmem [thread:$0]  %s11595_s15, 64, %s203_s29, [#allocation29]  }
  0x9c   :  { %s11664_s5 = sld [smem:[#allocation60_spill]] }
  0xa2   :  { %s9231_s21 = scalar_lea.hbm %s11664_s5, 2048 }
  0xa3   :  { %p9232_p8 = scmp.ne.s32.totalorder %s11664_s5, %s9231_s21  ;;  %p9235_p9 = scmp.lt.u32.totalorder %s9231_s21, %s11664_s5 }
  0xa5   :  { %p9237_p10 = pnand %p9235_p9, %p9232_p8 }
  0xa7   :  { %9240 = shalt.err (!%p9237_p10)
}
  0xa8   :  { %s9241_s2 = scalar_lea.vmem %s40_s24, 2048  ;;  %p9246_p12 = scmp.lt.s32.totalorder %s40_s24, %s40_s24 }
  0xa9   :  { %p9242_p11 = scmp.ne.s32.totalorder %s40_s24, %s9241_s2  ;;  %p9247_p13 = scmp.lt.s32.totalorder %s9241_s2, %s9241_s2 }
  0xab   :  { %p9248_p0 = por %p9247_p13, %p9246_p12 }
  0xad   :  { %p9249_p1 = pnand %p9248_p0, %p9242_p11 }
  0xaf   :  { %9252 = shalt.err (!%p9249_p1)
}
  0xb0   :  { %45 = dma.hbm_to_vmem [thread:$0]  %s11664_s5, 2048, %s40_s24, [#allocation5], %s9500_s0, %s9500_s0, %s9501_s23  }
  0xb1   :  { %s9508_s17 = smov [#allocation9]   ;;  %s9509_s25 = smov [#allocation12]  }
  0xb2   :  { %s64_s9 = sshll.u32 %s9508_s17, 4  ;;  %s86_s18 = sshll.u32 %s9509_s25, 4  ;;  %s65_s9 = int_to_ptr.vmem [resolvable:$true] %s64_s9  ;;  %s87_s18 = int_to_ptr.vmem [resolvable:$true] %s86_s18 }
  0xb3   :  { %s11665_s30 = sld [smem:[#allocation62_spill]] }
  0xb9   :  { %s9253_s13 = scalar_lea.hbm %s11665_s30, 32 }
  0xba   :  { %p9254_p2 = scmp.ne.s32.totalorder %s11665_s30, %s9253_s13  ;;  %p9257_p3 = scmp.lt.u32.totalorder %s9253_s13, %s11665_s30 }
  0xbc   :  { %p9259_p4 = pnand %p9257_p3, %p9254_p2 }
  0xbe   :  { %9262 = shalt.err (!%p9259_p4)
}
  0xbf   :  { %s9263_s24 = scalar_lea.vmem %s65_s9, 32  ;;  %p9268_p6 = scmp.lt.s32.totalorder %s65_s9, %s65_s9 }
  0xc0   :  { %p9264_p5 = scmp.ne.s32.totalorder %s65_s9, %s9263_s24  ;;  %p9269_p7 = scmp.lt.s32.totalorder %s9263_s24, %s9263_s24 }
  0xc2   :  { %p9270_p8 = por %p9269_p7, %p9268_p6 }
  0xc4   :  { %p9271_p9 = pnand %p9270_p8, %p9264_p5 }
  0xc6   :  { %9274 = shalt.err (!%p9271_p9)
}
  0xc7   :  { %67 = dma.hbm_to_vmem [thread:$0]  %s11665_s30, 32, %s65_s9, [#allocation8]  }
  0xc8   :  { %s9275_s20 = scalar_lea.hbm %s11584_s4, 128 }
  0xc9   :  { %p9276_p10 = scmp.ne.s32.totalorder %s11584_s4, %s9275_s20  ;;  %p9279_p11 = scmp.lt.u32.totalorder %s9275_s20, %s11584_s4 }
  0xcb   :  { %p9281_p12 = pnand %p9279_p11, %p9276_p10 }
  0xcd   :  { %9284 = shalt.err (!%p9281_p12)
}
  0xce   :  { %s9285_s17 = scalar_lea.vmem %s87_s18, 128  ;;  %p9290_p0 = scmp.lt.s32.totalorder %s87_s18, %s87_s18 }
  0xcf   :  { %p9286_p13 = scmp.ne.s32.totalorder %s87_s18, %s9285_s17  ;;  %p9291_p1 = scmp.lt.s32.totalorder %s9285_s17, %s9285_s17 }
  0xd1   :  { %p9292_p2 = por %p9291_p1, %p9290_p0 }
  0xd3   :  { %p9293_p3 = pnand %p9292_p2, %p9286_p13 }
  0xd5   :  { %9296 = shalt.err (!%p9293_p3)
}
  0xd6   :  { %89 = dma.hbm_to_vmem [thread:$0]  %s11584_s4, 128, %s87_s18, [#allocation11]  }
  0xd7   :  { %s9510_s26 = smov [#allocation15]   ;;  %s9511_s30 = smov [#allocation18]  }
  0xd8   :  { %s105_s27 = sshll.u32 %s9510_s26, 4  ;;  %s128_s13 = sshll.u32 %s9511_s30, 4  ;;  %s106_s27 = int_to_ptr.vmem [resolvable:$true] %s105_s27  ;;  %s129_s13 = int_to_ptr.vmem [resolvable:$true] %s128_s13 }
  0xd9   :  { %s9297_s28 = scalar_lea.hbm %s11586_s6, 512 }
  0xda   :  { %p9298_p4 = scmp.ne.s32.totalorder %s11586_s6, %s9297_s28  ;;  %p9301_p5 = scmp.lt.u32.totalorder %s9297_s28, %s11586_s6 }
  0xdc   :  { %p9303_p6 = pnand %p9301_p5, %p9298_p4 }
  0xde   :  { %9306 = shalt.err (!%p9303_p6)
}
  0xdf   :  { %s9307_s4 = scalar_lea.vmem %s106_s27, 512  ;;  %p9312_p8 = scmp.lt.s32.totalorder %s106_s27, %s106_s27 }
  0xe0   :  { %p9308_p7 = scmp.ne.s32.totalorder %s106_s27, %s9307_s4  ;;  %p9313_p9 = scmp.lt.s32.totalorder %s9307_s4, %s9307_s4 }
  0xe2   :  { %p9314_p10 = por %p9313_p9, %p9312_p8 }
  0xe4   :  { %p9315_p11 = pnand %p9314_p10, %p9308_p7 }
  0xe6   :  { %9318 = shalt.err (!%p9315_p11)
}
  0xe7   :  { %111 = dma.hbm_to_vmem [thread:$0]  %s11586_s6, 512, %s106_s27, [#allocation14], %s9500_s0, %s9500_s0, %s9501_s23  }
  0xe8   :  { %s9319_s3 = scalar_lea.hbm %s11588_s8, 16 }
  0xe9   :  { %p9320_p12 = scmp.ne.s32.totalorder %s11588_s8, %s9319_s3  ;;  %p9323_p13 = scmp.lt.u32.totalorder %s9319_s3, %s11588_s8 }
  0xeb   :  { %p9325_p0 = pnand %p9323_p13, %p9320_p12 }
  0xed   :  { %9328 = shalt.err (!%p9325_p0)
}
  0xee   :  { %s9329_s9 = scalar_lea.vmem %s129_s13, 16  ;;  %s9333_s25 = scalar_lea.vmem %s129_s13, 32 }
  0xef   :  { %p9330_p1 = scmp.ne.s32.totalorder %s129_s13, %s9329_s9  ;;  %p9334_p2 = scmp.lt.s32.totalorder %s129_s13, %s129_s13 }
  0xf0   :  { %p9335_p3 = scmp.lt.s32.totalorder %s9333_s25, %s9329_s9 }
  0xf2   :  { %p9336_p4 = por %p9335_p3, %p9334_p2 }
  0xf4   :  { %p9337_p5 = pnand %p9336_p4, %p9330_p1 }
  0xf6   :  { %9340 = shalt.err (!%p9337_p5)
}
  0xf7   :  { %131 = dma.hbm_to_vmem [thread:$0]  %s11588_s8, 16, %s129_s13, [#allocation17]  }
  0xf8   :  { %s9512_s27 = smov [#allocation21]   ;;  %s9513_s19 = smov [#allocation24]  }
  0xf9   :  { %s148_s30 = sshll.u32 %s9512_s27, 4  ;;  %s167_s7 = sshll.u32 %s9513_s19, 4  ;;  %s149_s30 = int_to_ptr.vmem [resolvable:$true] %s148_s30  ;;  %s168_s7 = int_to_ptr.vmem [resolvable:$true] %s167_s7 }
  0xfa   :  { %s9341_s24 = scalar_lea.hbm %s11590_s10, 16 }
  0xfb   :  { %p9342_p6 = scmp.ne.s32.totalorder %s11590_s10, %s9341_s24  ;;  %p9345_p7 = scmp.lt.u32.totalorder %s9341_s24, %s11590_s10 }
  0xfd   :  { %p9347_p8 = pnand %p9345_p7, %p9342_p6 }
  0xff   :  { %9350 = shalt.err (!%p9347_p8)
}
 0x100   :  { %s9351_s8 = scalar_lea.vmem %s149_s30, 16  ;;  %s9355_s13 = scalar_lea.vmem %s149_s30, 32 }
 0x101   :  { %p9352_p9 = scmp.ne.s32.totalorder %s149_s30, %s9351_s8  ;;  %p9356_p10 = scmp.lt.s32.totalorder %s149_s30, %s149_s30 }
 0x102   :  { %p9357_p11 = scmp.lt.s32.totalorder %s9355_s13, %s9351_s8 }
 0x104   :  { %p9358_p12 = por %p9357_p11, %p9356_p10 }
 0x106   :  { %p9359_p13 = pnand %p9358_p12, %p9352_p9 }
 0x108   :  { %9362 = shalt.err (!%p9359_p13)
}
 0x109   :  { %151 = dma.hbm_to_vmem [thread:$0]  %s11590_s10, 16, %s149_s30, [#allocation20]  }
 0x10a   :  { %s9363_s2 = scalar_lea.hbm %s11592_s12, 1152 }
 0x10b   :  { %p9364_p0 = scmp.ne.s32.totalorder %s11592_s12, %s9363_s2  ;;  %p9367_p1 = scmp.lt.u32.totalorder %s9363_s2, %s11592_s12 }
 0x10d   :  { %p9369_p2 = pnand %p9367_p1, %p9364_p0 }
 0x10f   :  { %9372 = shalt.err (!%p9369_p2)
}
 0x110   :  { %s9373_s25 = scalar_lea.vmem %s168_s7, 1152  ;;  %p9378_p4 = scmp.lt.s32.totalorder %s168_s7, %s168_s7 }
 0x111   :  { %p9374_p3 = scmp.ne.s32.totalorder %s168_s7, %s9373_s25  ;;  %p9379_p5 = scmp.lt.s32.totalorder %s9373_s25, %s9373_s25 }
 0x113   :  { %p9380_p6 = por %p9379_p5, %p9378_p4 }
 0x115   :  { %p9381_p7 = pnand %p9380_p6, %p9374_p3 }
 0x117   :  { %9384 = shalt.err (!%p9381_p7)
}
 0x118   :  { %173 = dma.hbm_to_vmem [thread:$0]  %s11592_s12, 1152, %s168_s7, [#allocation23], %s9500_s0, %s9500_s0, %s9501_s23  }
 0x119   :  { %s9514_s26 = smov [#allocation27]   ;;  %s9515_s30 = smov [#allocation30]  }
 0x11a   :  { %s192_s27 = sshll.u32 %s9514_s26, 4  ;;  %s211_s19 = sshll.u32 %s9515_s30, 4  ;;  %s193_s27 = int_to_ptr.vmem [resolvable:$true] %s192_s27  ;;  %s212_s19 = int_to_ptr.vmem [resolvable:$true] %s211_s19 }
 0x11b   :  { %s9385_s24 = scalar_lea.hbm %s11594_s14, 128 }
 0x11c   :  { %p9386_p8 = scmp.ne.s32.totalorder %s11594_s14, %s9385_s24  ;;  %p9389_p9 = scmp.lt.u32.totalorder %s9385_s24, %s11594_s14 }
 0x11e   :  { %p9391_p10 = pnand %p9389_p9, %p9386_p8 }
 0x120   :  { %9394 = shalt.err (!%p9391_p10)
}
 0x121   :  { %s9395_s12 = scalar_lea.vmem %s193_s27, 128  ;;  %p9400_p12 = scmp.lt.s32.totalorder %s193_s27, %s193_s27 }
 0x122   :  { %p9396_p11 = scmp.ne.s32.totalorder %s193_s27, %s9395_s12  ;;  %p9401_p13 = scmp.lt.s32.totalorder %s9395_s12, %s9395_s12 }
 0x124   :  { %p9402_p0 = por %p9401_p13, %p9400_p12 }
 0x126   :  { %p9403_p1 = pnand %p9402_p0, %p9396_p11 }
 0x128   :  { %9406 = shalt.err (!%p9403_p1)
}
 0x129   :  { %195 = dma.hbm_to_vmem [thread:$0]  %s11594_s14, 128, %s193_s27, [#allocation26]  }
 0x12a   :  { %s9407_s11 = scalar_lea.hbm %s11596_s16, 256 }
 0x12b   :  { %p9408_p2 = scmp.ne.s32.totalorder %s11596_s16, %s9407_s11  ;;  %p9411_p3 = scmp.lt.u32.totalorder %s9407_s11, %s11596_s16 }
 0x12d   :  { %p9413_p4 = pnand %p9411_p3, %p9408_p2 }
 0x12f   :  { %9416 = shalt.err (!%p9413_p4)
}
 0x130   :  { %s9417_s29 = scalar_lea.vmem %s212_s19, 256  ;;  %p9422_p6 = scmp.lt.s32.totalorder %s212_s19, %s212_s19 }
 0x131   :  { %p9418_p5 = scmp.ne.s32.totalorder %s212_s19, %s9417_s29  ;;  %p9423_p7 = scmp.lt.s32.totalorder %s9417_s29, %s9417_s29 }
 0x133   :  { %p9424_p8 = por %p9423_p7, %p9422_p6 }
 0x135   :  { %p9425_p9 = pnand %p9424_p8, %p9418_p5 }
 0x137   :  { %9428 = shalt.err (!%p9425_p9)
}
 0x138   :  { %217 = dma.hbm_to_vmem [thread:$0]  %s11596_s16, 256, %s212_s19, [#allocation29], %s9500_s0, %s9500_s0, %s9501_s23  }
 0x139   :  { %s9516_s9 = smov [#allocation31]   ;;  %s11666_s26 = sld [smem:[#allocation63_spill]] }
 0x13a   :  { %s224_s25 = sshll.u32 %s9516_s9, 4  ;;  %s225_s25 = int_to_ptr.vmem [resolvable:$true] %s224_s25 }
 0x13f   :  { %s9429_s27 = scalar_lea.hbm %s11666_s26, 64 }
 0x140   :  { %p9430_p10 = scmp.ne.s32.totalorder %s11666_s26, %s9429_s27  ;;  %p9433_p11 = scmp.lt.u32.totalorder %s9429_s27, %s11666_s26 }
 0x142   :  { %p9435_p12 = pnand %p9433_p11, %p9430_p10 }
 0x144   :  { %9438 = shalt.err (!%p9435_p12)
}
 0x145   :  { %s9439_s5 = scalar_lea.vmem %s225_s25, 64  ;;  %p9444_p0 = scmp.lt.s32.totalorder %s225_s25, %s225_s25 }
 0x146   :  { %p9440_p13 = scmp.ne.s32.totalorder %s225_s25, %s9439_s5  ;;  %p9445_p1 = scmp.lt.s32.totalorder %s9439_s5, %s9439_s5 }
 0x148   :  { %p9446_p2 = por %p9445_p1, %p9444_p0 }
 0x14a   :  { %p9447_p3 = pnand %p9446_p2, %p9440_p13 }
 0x14c   :  { %9450 = shalt.err (!%p9447_p3)
}
 0x14d   :  { %227 = dma.hbm_to_vmem [thread:$0]  %s11666_s26, 64, %s225_s25, [#allocation32]  }
 0x14e   :  { %9473 = dma.done.wait [#allocation5], 2048  }
 0x14f   :  { %9474 = vsyncadd [#allocation5], 4294965248 }
 0x150   :  { %9475 = dma.done.wait [#allocation8], 64  }
 0x151   :  { %9476 = vsyncadd [#allocation8], 4294967232 }
 0x152   :  { %9477 = dma.done.wait [#allocation11], 2176  }
 0x153   :  { %9478 = vsyncadd [#allocation11], 4294965120 }
 0x154   :  { %9479 = dma.done.wait [#allocation14], 528  }
 0x155   :  { %9480 = vsyncadd [#allocation14], 4294966768 }
 0x156   :  { %9481 = dma.done.wait [#allocation17], 32  }
 0x157   :  { %9482 = vsyncadd [#allocation17], 4294967264 }
 0x158   :  { %9483 = dma.done.wait [#allocation20], 32  }
 0x159   :  { %9484 = vsyncadd [#allocation20], 4294967264 }
 0x15a   :  { %9485 = dma.done.wait [#allocation23], 1168  }
 0x15b   :  { %9486 = vsyncadd [#allocation23], 4294966128 }
 0x15c   :  { %9487 = dma.done.wait [#allocation26], 2432  }
 0x15d   :  { %9488 = vsyncadd [#allocation26], 4294964864 }
 0x15e   :  { %9489 = dma.done.wait [#allocation29], 320  }
 0x15f   :  { %9490 = vsyncadd [#allocation29], 4294966976 }
 0x160   :  { %9491 = dma.done.wait [#allocation32], 64  }
 0x161   :  { %9492 = vsyncadd [#allocation32], 4294967232  ;;  %v11610_v0 = vmov 0.0   ;;  %vm11608_vm0 = vmmov 0   ;;  %v580_v1 = vld [vmem:[#allocation15] sm:$0xff]  ;;  %v581_v2 = vld [vmem:[#allocation15 + $0x8] sm:$0xff]  ;;  %v299_v17 = vlaneseq }
 0x162   :  { %7690 = vmatprep.subr.mxu1 %v11610_v0  ;;  %7692 = vmatprep.mubr.msk.f32.mxu1 %vm11608_vm0, %v11610_v0  ;;  %v582_v3 = vld [vmem:[#allocation15 + $0x10] sm:$0xff]  ;;  %v8420_v4 = vpack.c.bf16 %v581_v2, %v580_v1  ;;  %v583_v5 = vld [vmem:[#allocation15 + $0x18] sm:$0xff]  ;;  %v11612_v13 = vmov 0.0|0.0   ;;  %vm591_vm1 = vcmask 261120   ;;  %v9863_v27 = vld [vmem:[#allocation4 + $0x10] sm:$0xff]  ;;  %vm11614_vm2 = vcmask 64512  }
 0x163   :  { %v556_v6 = vld [vmem:[#allocation7] sm:$0x1]  ;;  %v8424_v7 = vpack.c.bf16 %v583_v5, %v582_v3  ;;  %v557_v10 = vld [vmem:[#allocation7 + $0x1] sm:$0x1]  ;;  %v9854_v19 = vshrl.u32 %v299_v17, 7  ;;  %v9859_v23 = vld [vmem:[#allocation4 + $0x8] sm:$0xff]  ;;  %v817_v55 = vmul.f32 %v9863_v27, %v9863_v27 }
 0x164   :  { %v558_v8 = vsub.f32 0.0, %v556_v6  ;;  %8421 = vmatprep.subr.bf16.mxu0 %v8420_v4  ;;  %v559_v11 = vsub.f32 0.0, %v557_v10  ;;  %v9857_v22 = vld [vmem:[#allocation4] sm:$0xff]  ;;  %v9865_v28 = vld [vmem:[#allocation4 + $0x18] sm:$0xff]  ;;  %v9875_v32 = vld [vmem:[#allocation4 + $0x28] sm:$0xff]  ;;  %v816_v52 = vmul.f32 %v9859_v23, %v9859_v23  ;;  %1694 = vst.msk [vmem:[#allocation2] sm:$0xff] %vm11614_vm2, %v11610_v0 }
 0x165   :  { %8423 = vmatpush3.bf16.msra.mxu0 %v8420_v4  ;;  %v574_v20 = vsub.s32 0, %v9854_v19  ;;  %v8429_v26 = vpack.c.bf16 %v9859_v23, %v9857_v22  ;;  %v8432_v29 = vpack.c.bf16 %v9865_v28, %v9863_v27  ;;  %v9873_v31 = vld [vmem:[#allocation4 + $0x20] sm:$0xff]  ;;  %v9882_v35 = vld [vmem:[#allocation4 + $0x30] sm:$0xff]  ;;  %v9884_v36 = vld [vmem:[#allocation4 + $0x38] sm:$0xff]  ;;  %v815_v51 = vmul.f32 %v9857_v22, %v9857_v22  ;;  %1695 = vst.msk [vmem:[#allocation2 + $0x8] sm:$0xff] %vm11614_vm2, %v11610_v0  ;;  %s9520_s21 = smov [#allocation33]  }
 0x166   :  { %v560_v9 = vmul.f32 1.442695, %v558_v8  ;;  %8425 = vmatprep.subr.bf16.mxu0 %v8424_v7  ;;  %v562_v12 = vmul.f32 1.442695, %v559_v11  ;;  %v8435_v33 = vpack.c.bf16 %v9875_v32, %v9873_v31  ;;  %v8438_v37 = vpack.c.bf16 %v9884_v36, %v9882_v35  ;;  %v9891_v39 = vld [vmem:[#allocation4 + $0x40] sm:$0xff]  ;;  %v9893_v40 = vld [vmem:[#allocation4 + $0x48] sm:$0xff] }
 0x167   :  { %v8441_v41 = vpack.c.bf16 %v9893_v40, %v9891_v39  ;;  %v9900_v42 = vld [vmem:[#allocation4 + $0x50] sm:$0xff]  ;;  %v9902_v43 = vld [vmem:[#allocation4 + $0x58] sm:$0xff]  ;;  %v9909_v45 = vld [vmem:[#allocation4 + $0x60] sm:$0xff]  ;;  %v8453_v54 = vpack.c.bf16 %v816_v52, %v815_v51  ;;  %v818_v56 = vmul.f32 %v9865_v28, %v9865_v28  ;;  %v819_v58 = vmul.f32 %v9873_v31, %v9873_v31  ;;  %1696 = vst.msk [vmem:[#allocation2 + $0x60] sm:$0xff] %vm11614_vm2, %v11610_v0  ;;  %s6655_s4 = sshll.u32 %s9520_s21, 4  ;;  %s6656_s4 = int_to_ptr.vmem [resolvable:$true] %s6655_s4 }
 0x168   :  { %8882 = vpow2.f32 %v560_v9  ;;  %v8444_v44 = vpack.c.bf16 %v9902_v43, %v9900_v42  ;;  %v9911_v46 = vld [vmem:[#allocation4 + $0x68] sm:$0xff]  ;;  %v9918_v48 = vld [vmem:[#allocation4 + $0x70] sm:$0xff]  ;;  %v9920_v49 = vld [vmem:[#allocation4 + $0x78] sm:$0xff]  ;;  %v820_v59 = vmul.f32 %v9875_v32, %v9875_v32  ;;  %v821_v61 = vmul.f32 %v9882_v35, %v9882_v35  ;;  %1697 = vst.msk [vmem:[#allocation2 + $0x68] sm:$0xff] %vm11614_vm2, %v11610_v0  ;;  %s9451_s18 = scalar_lea.vmem %s6656_s4, 2048  ;;  %p9456_p5 = scmp.lt.s32.totalorder %s6656_s4, %s6656_s4 }
 0x169   :  { %8427 = vmatpush3.bf16.msra.mxu0 %v8424_v7  ;;  %8884 = vpow2.f32 %v562_v12  ;;  %v8447_v47 = vpack.c.bf16 %v9911_v46, %v9909_v45  ;;  %v8450_v50 = vpack.c.bf16 %v9920_v49, %v9918_v48  ;;  %v282_v53 = vld [vmem:[#allocation9] sm:$0x3]  ;;  %v8456_v57 = vpack.c.bf16 %v818_v56, %v817_v55  ;;  %1698 = vst.msk [vmem:[#allocation2 + $0x50] sm:$0xff] %vm11614_vm2, %v11610_v0  ;;  %v6699_v52 = vld [vmem:[#allocation18] ss:$0 sm:$0xff]  ;;  %p9452_p4 = scmp.ne.s32.totalorder %s6656_s4, %s9451_s18  ;;  %p9457_p6 = scmp.lt.s32.totalorder %s9451_s18, %s9451_s18 }
 0x16a   :  { %8428 = vmatprep.subr.bf16.mxu0 %v11612_v13  ;;  %v8459_v60 = vpack.c.bf16 %v820_v59, %v819_v58  ;;  %v822_v62 = vmul.f32 %v9884_v36, %v9884_v36  ;;  %v823_v1 = vmul.f32 %v9891_v39, %v9891_v39  ;;  %v824_v2 = vmul.f32 %v9893_v40, %v9893_v40  ;;  %v296_v55 = vld [vmem:[#allocation10 + $0x68] sm:$0xff]  ;;  %v297_v59 = vld [vmem:[#allocation10 + $0x70] sm:$0xff] }
 0x16b   :  { %v825_v4 = vmul.f32 %v9900_v42, %v9900_v42  ;;  %v826_v5 = vmul.f32 %v9902_v43, %v9902_v43  ;;  %v827_v7 = vmul.f32 %v9909_v45, %v9909_v45  ;;  %v828_v8 = vmul.f32 %v9911_v46, %v9911_v46  ;;  %1699 = vst.msk [vmem:[#allocation2 + $0x58] sm:$0xff] %vm11614_vm2, %v11610_v0  ;;  %v6700_v56 = vld [vmem:[#allocation19] ss:$0 sm:$0xff]  ;;  %p9458_p7 = por %p9457_p6, %p9456_p5 }
 0x16c   :  { %v8462_v63 = vpack.c.bf16 %v822_v62, %v821_v61  ;;  %v8465_v3 = vpack.c.bf16 %v824_v2, %v823_v1  ;;  %v830_v11 = vmul.f32 %v9920_v49, %v9920_v49  ;;  %1700 = vst.msk [vmem:[#allocation2 + $0xb0] sm:$0xff] %vm11614_vm2, %v11610_v0  ;;  %1701 = vst.msk [vmem:[#allocation2 + $0xb8] sm:$0xff] %vm11614_vm2, %v11610_v0  ;;  %vm11607_vm3 = vcmask 1043456   ;;  %v298_v62 = vld [vmem:[#allocation10 + $0x78] sm:$0xff]  ;;  %v287_v1 = vld [vmem:[#allocation10 + $0x20] sm:$0xff] }
 0x16d   :  { %v8471_v9 = vpack.c.bf16 %v828_v8, %v827_v7  ;;  %vm11606_vm4 = vcmask 31744   ;;  %vm11605_vm5 = vcmask 15360   ;;  %vm11604_vm6 = vcmask 1041408   ;;  %v288_v2 = vld [vmem:[#allocation10 + $0x28] sm:$0xff]  ;;  %v293_v7 = vld [vmem:[#allocation10 + $0x50] sm:$0xff]  ;;  %v294_v8 = vld [vmem:[#allocation10 + $0x58] sm:$0xff]  ;;  %p9459_p8 = pnand %p9458_p7, %p9452_p4 }
 0x172   :  { %v8883_v14 = vpop.eup %8882 }
 0x173   :  { %v564_v15 = vadd.f32 1.0, %v8883_v14  ;;  %v8885_v16 = vpop.eup %8884  ;;  %v743_v14 = vld [vmem:[#allocation27] sm:$0xff] }
 0x174   :  { %v565_v18 = vadd.f32 1.0, %v8885_v16  ;;  %7691 = vmatpush3.msra.mxu1 %v743_v14 }
 0x175   :  { %8886 = vrcp.f32 %v564_v15  ;;  %7695 = vmatprep.subr.mxu1 %v11610_v0 }
 0x176   :  { %8888 = vrcp.f32 %v565_v18 }
 0x17f   :  { %v8887_v21 = vpop.eup %8886 }
 0x180   :  { %v568_v24 = vmul.f32 %v8887_v21, %v556_v6  ;;  %v8889_v30 = vpop.eup %8888  ;;  %v8468_v6 = vpack.c.bf16 %v826_v5, %v825_v4  ;;  %v290_v4 = vld [vmem:[#allocation10 + $0x38] sm:$0xff]  ;;  %v291_v5 = vld [vmem:[#allocation10 + $0x40] sm:$0xff] }
 0x181   :  { %v569_v34 = vmul.f32 %v8889_v30, %v557_v10  ;;  %v829_v10 = vmul.f32 %v9918_v48, %v9918_v48 }
 0x182   :  { %v575_v25 = vrot.slane %v568_v24, %v574_v20 }
 0x183   :  { %v579_v38 = vrot.slane %v569_v34, %v574_v20  ;;  %v8474_v12 = vpack.c.bf16 %v830_v11, %v829_v10  ;;  %v744_v20 = vld [vmem:[#allocation28] sm:$0xf]  ;;  %v283_v34 = vld [vmem:[#allocation10] sm:$0xff] }
 0x184   :  { %7596 = vmatprep.mubr.msk.f32.mxu0 %vm591_vm1, %v575_v25  ;;  %v3004_v10 = vld [vmem:[#allocation24 + $0x28] sm:$0xff]  ;;  %v10045_v11 = vld [vmem:[#allocation24] sm:$0xff] }
 0x185   :  { %7597 = vmatmul.mubr.msk.f32.vlgmr.msra.gmra.mrb[0].mxu0 %vm591_vm1, %v575_v25 }
 0x186   :  { %8430 = vmatpush3.bf16.msra.mxu0 %v8429_v26  ;;  %7599 = vmatprep.mubr.msk.f32.mxu0 %vm591_vm1, %v575_v25 }
 0x187   :  { %8431 = vmatprep.subr.bf16.mxu0 %v11612_v13 }
 0x189   :  { %7600 = vmatmul.mubr.msk.f32.gmra.mrb[2].mxu0 %vm591_vm1, %v575_v25 }
 0x18a   :  { %8433 = vmatpush3.bf16.msra.mxu0 %v8432_v29  ;;  %7602 = vmatprep.mubr.msk.f32.mxu0 %vm591_vm1, %v575_v25 }
 0x18b   :  { %8434 = vmatprep.subr.bf16.mxu0 %v11612_v13 }
 0x18d   :  { %7603 = vmatmul.mubr.msk.f32.gmra.mrb[4].mxu0 %vm591_vm1, %v575_v25 }
 0x18e   :  { %8436 = vmatpush3.bf16.msra.mxu0 %v8435_v33  ;;  %7605 = vmatprep.mubr.msk.f32.mxu0 %vm591_vm1, %v575_v25  ;;  %v10003_v33 = vld [vmem:[#allocation10 + $0x60] sm:$0xff] }
 0x18f   :  { %8437 = vmatprep.subr.bf16.mxu0 %v11612_v13 }
 0x191   :  { %7606 = vmatmul.mubr.msk.f32.gmra.mrb[6].mxu0 %vm591_vm1, %v575_v25 }
 0x192   :  { %8439 = vmatpush3.bf16.msra.mxu0 %v8438_v37  ;;  %7608 = vmatprep.mubr.msk.f32.mxu0 %vm591_vm1, %v579_v38 }
 0x193   :  { %8440 = vmatprep.subr.bf16.mxu0 %v11612_v13 }
 0x195   :  { %7609 = vmatmul.mubr.msk.f32.gmra.mrb[8].mxu0 %vm591_vm1, %v579_v38 }
 0x196   :  { %8442 = vmatpush3.bf16.msra.mxu0 %v8441_v41  ;;  %7611 = vmatprep.mubr.msk.f32.mxu0 %vm591_vm1, %v579_v38 }
 0x197   :  { %8443 = vmatprep.subr.bf16.mxu0 %v11612_v13 }
 0x199   :  { %7612 = vmatmul.mubr.msk.f32.gmra.mrb[10].mxu0 %vm591_vm1, %v579_v38 }
 0x19a   :  { %8445 = vmatpush3.bf16.msra.mxu0 %v8444_v44  ;;  %7614 = vmatprep.mubr.msk.f32.mxu0 %vm591_vm1, %v579_v38 }
 0x19b   :  { %8446 = vmatprep.subr.bf16.mxu0 %v11612_v13 }
 0x19d   :  { %7615 = vmatmul.mubr.msk.f32.gmra.mrb[12].mxu0 %vm591_vm1, %v579_v38 }
 0x19e   :  { %8448 = vmatpush3.bf16.msra.mxu0 %v8447_v47  ;;  %7617 = vmatprep.mubr.msk.f32.mxu0 %vm591_vm1, %v579_v38 }
 0x19f   :  { %8449 = vmatprep.subr.bf16.mxu0 %v11612_v13 }
 0x1a1   :  { %7618 = vmatmul.mubr.msk.f32.gmra.mrb[14].mxu0 %vm591_vm1, %v579_v38 }
 0x1a2   :  { %8451 = vmatpush3.bf16.msra.mxu0 %v8450_v50  ;;  %7652 = vmatprep.mubr.msk.f32.mxu0 %vm11608_vm0, %v11610_v0 }
 0x1a3   :  { %8452 = vmatprep.subr.bf16.mxu0 %v11612_v13 }
 0x1a5   :  { %7653 = vmatmul.mubr.f32.vlgmr.msra.gmra.mrb[16].mxu0 %v282_v53 }
 0x1a6   :  { %8454 = vmatpush3.bf16.msra.mxu0 %v8453_v54  ;;  %7687 = vmatprep.mubr.msk.f32.mxu0 %vm11608_vm0, %v11610_v0 }
 0x1a7   :  { %8455 = vmatprep.subr.bf16.mxu0 %v11612_v13 }
 0x1aa   :  { %8457 = vmatpush3.bf16.msra.mxu0 %v8456_v57  ;;  %v284_v57 = vld [vmem:[#allocation10 + $0x8] sm:$0xff] }
 0x1ab   :  { %8458 = vmatprep.subr.bf16.mxu0 %v11612_v13 }
 0x1ae   :  { %8460 = vmatpush3.bf16.msra.mxu0 %v8459_v60  ;;  %v285_v60 = vld [vmem:[#allocation10 + $0x10] sm:$0xff] }
 0x1af   :  { %8461 = vmatprep.subr.bf16.mxu0 %v11612_v13 }
 0x1b2   :  { %8463 = vmatpush3.bf16.msra.mxu0 %v8462_v63  ;;  %v286_v63 = vld [vmem:[#allocation10 + $0x18] sm:$0xff] }
 0x1b3   :  { %8464 = vmatprep.subr.bf16.mxu0 %v11612_v13 }
 0x1b6   :  { %8466 = vmatpush3.bf16.msra.mxu0 %v8465_v3  ;;  %v289_v3 = vld [vmem:[#allocation10 + $0x30] sm:$0xff] }
 0x1b7   :  { %8467 = vmatprep.subr.bf16.mxu0 %v11612_v13 }
 0x1ba   :  { %8469 = vmatpush3.bf16.msra.mxu0 %v8468_v6  ;;  %v292_v6 = vld [vmem:[#allocation10 + $0x48] sm:$0xff] }
 0x1bb   :  { %8470 = vmatprep.subr.bf16.mxu0 %v11612_v13 }
 0x1be   :  { %8472 = vmatpush3.bf16.msra.mxu0 %v8471_v9  ;;  %v1738_v9 = vld [vmem:[#allocation24 + $0x18] sm:$0xff] }
 0x1bf   :  { %8473 = vmatprep.subr.bf16.mxu0 %v11612_v13 }
 0x1c2   :  { %8475 = vmatpush3.bf16.msra.mxu0 %v8474_v12  ;;  %v10048_v12 = vld [vmem:[#allocation24 + $0x10] sm:$0xff] }
 0x1c3   :  { %7700 = vmatprep.subr.mxu0 %v11610_v0 }
 0x1c5   :  { %7688 = vmatmul.mubr.f32.vlgmr.msra.gmra.mrb[18].mxu0 %v282_v53 }
 0x1c6   :  { %7702 = vmatprep.mubr.msk.f32.mxu0 %vm11608_vm0, %v11610_v0  ;;  %7701 = vmatpush3.msk.msra.mxu0 %vm11607_vm3, %v744_v20 }
 0x278   :  { %v811_v15 = vpop.f32.mrb[16].mxu0 }
 0x279   :  { %v7654_v16 = vpop.f32.mrb[17].mxu0  ;;  %7693 = vmatmul.mubr.msk.f32.vlgmr.msra.gmra.mrb[0].mxu1 %vm11614_vm2, %v811_v15 }
 0x27a   :  { %7696 = vmatpush3.msra.mxu1 %v743_v14  ;;  %7697 = vmatprep.mubr.msk.f32.mxu1 %vm11608_vm0, %v11610_v0 }
 0x27b   :  { %7705 = vmatprep.subr.mxu1 %v11610_v0 }
 0x298   :  { %v897_v17 = vpop.f32.mrb[18].mxu0 }
 0x299   :  { %v7689_v18 = vpop.f32.mrb[19].mxu0  ;;  %7698 = vmatmul.mubr.msk.f32.vlgmr.msra.gmra.mrb[2].mxu1 %vm11614_vm2, %v897_v17 }
 0x29a   :  { %7707 = vmatprep.mubr.msk.f32.mxu1 %vm11608_vm0, %v11610_v0  ;;  %7706 = vmatpush3.msk.msra.mxu1 %vm11607_vm3, %v744_v20 }
 0x34c   :  { %v971_v21 = vpop.f32.mrb[0].mxu1 }
 0x34d   :  { %v975_v24 = vmul.f32 0.0078125, %v971_v21  ;;  %v7694_v25 = vpop.f32.mrb[1].mxu1 }
 0x34f   :  { %7703 = vmatmul.mubr.msk.f32.vlgmr.msra.gmra.mrb[20].mxu0 %vm11606_vm4, %v975_v24 }
 0x350   :  { %7712 = vmatprep.mubr.msk.f32.mxu0 %vm11605_vm5, %v283_v34 }
 0x36c   :  { %v1045_v26 = vpop.f32.mrb[2].mxu1 }
 0x36d   :  { %v1049_v29 = vmul.f32 0.0078125, %v1045_v26  ;;  %v7699_v30 = vpop.f32.mrb[3].mxu1 }
 0x36f   :  { %7708 = vmatmul.mubr.msk.f32.vlgmr.msra.gmra.mrb[4].mxu1 %vm11606_vm4, %v1049_v29 }
 0x370   :  { %7730 = vmatprep.mubr.msk.f32.mxu1 %vm11605_vm5, %v10003_v33 }
 0x422   :  { %v1124_v37 = vpop.f32.mrb[20].mxu0 }
 0x423   :  { %v7704_v38 = vpop.f32.mrb[21].mxu0  ;;  %v1201_v41 = vmul.f32 %v1124_v37, %v1124_v37 }
 0x442   :  { %v1197_v44 = vpop.f32.mrb[4].mxu1 }
 0x443   :  { %v1202_v47 = vsub.f32 %v1197_v44, %v1201_v41  ;;  %v7709_v50 = vpop.f32.mrb[5].mxu1 }
 0x445   :  { %v1203_v51 = vadd.f32 1e-05, %v1202_v47 }
 0x447   :  { %8890 = vrsqrt.f32 %v1203_v51 }
 0x451   :  { %v8891_v53 = vpop.eup %8890 }
 0x452   :  { %v1211_v54 = vmul.f32 %v8891_v53, %v6699_v52 }
 0x454   :  { %7710 = vmatprep.subr.msk.mxu0 %vm11604_vm6, %v1211_v54  ;;  %8566 = vmatprep.subr.msk.mxu1 %vm11604_vm6, %v1211_v54  ;;  %v1212_v58 = vmul.f32 %v1211_v54, %v1124_v37 }
 0x455   :  { %7711 = vmatpush3.msk.msra.mxu0 %vm11604_vm6, %v1211_v54  ;;  %8567 = vmatpush3.msk.msra.mxu1 %vm11604_vm6, %v1211_v54 }
 0x456   :  { %7731 = vmatmul.mubr.msk.f32.vlgmr.msra.gmra.mrb[6].mxu1 %vm11605_vm5, %v296_v55  ;;  %v1219_v61 = vsub.f32 %v6700_v56, %v1212_v58  ;;  %7713 = vmatmul.mubr.msk.f32.vlgmr.msra.gmra.mrb[22].mxu0 %vm11605_vm5, %v284_v57 }
 0x457   :  { %7733 = vmatprep.mubr.msk.f32.mxu1 %vm11605_vm5, %v297_v59  ;;  %7715 = vmatprep.mubr.msk.f32.mxu0 %vm11605_vm5, %v285_v60 }
 0x458   :  { %7736 = vmatprep.subr.msk.mxu1 %vm11604_vm6, %v1219_v61  ;;  %7762 = vmatprep.subr.mxu0 %v1738_v9 }
 0x459   :  { %7737 = vmatpush3.msk.msra.mxu1 %vm11604_vm6, %v1219_v61  ;;  %7763 = vmatpush3.msra.mxu0 %v1738_v9 }
 0x45a   :  { %7734 = vmatmul.mubr.msk.f32.gmra.mrb[8].mxu1 %vm11605_vm5, %v298_v62  ;;  %7716 = vmatmul.mubr.msk.f32.gmra.mrb[24].mxu0 %vm11605_vm5, %v286_v63 }
 0x45b   :  { %7738 = vmatprep.mubr.msk.f32.mxu1 %vm11605_vm5, %v283_v34  ;;  %7718 = vmatprep.mubr.msk.f32.mxu0 %vm11605_vm5, %v287_v1 }
 0x45c   :  { %7918 = vmatprep.subr.mxu1 %v3004_v10  ;;  %7788 = vmatprep.subr.mxu0 %v10045_v11 }
 0x45e   :  { %7739 = vmatmul.mubr.msk.f32.vlgmr.msra.gmra.mrb[10].mxu1 %vm11605_vm5, %v284_v57  ;;  %7719 = vmatmul.mubr.msk.f32.gmra.mrb[26].mxu0 %vm11605_vm5, %v288_v2 }
 0x45f   :  { %7741 = vmatprep.mubr.msk.f32.mxu1 %vm11605_vm5, %v285_v60  ;;  %7721 = vmatprep.mubr.msk.f32.mxu0 %vm11605_vm5, %v289_v3 }
 0x460   :  { %7919 = vmatpush3.msra.mxu1 %v3004_v10 }
 0x461   :  { %7944 = vmatprep.subr.mxu1 %v10048_v12 }
 0x462   :  { %7742 = vmatmul.mubr.msk.f32.gmra.mrb[12].mxu1 %vm11605_vm5, %v286_v63  ;;  %7722 = vmatmul.mubr.msk.f32.gmra.mrb[28].mxu0 %vm11605_vm5, %v290_v4 }
 0x463   :  { %7744 = vmatprep.mubr.msk.f32.mxu1 %vm11605_vm5, %v287_v1  ;;  %7724 = vmatprep.mubr.msk.f32.mxu0 %vm11605_vm5, %v291_v5 }
 0x466   :  { %7745 = vmatmul.mubr.msk.f32.gmra.mrb[14].mxu1 %vm11605_vm5, %v288_v2  ;;  %7725 = vmatmul.mubr.msk.f32.gmra.mrb[30].mxu0 %vm11605_vm5, %v292_v6 }
 0x467   :  { %7747 = vmatprep.mubr.msk.f32.mxu1 %vm11605_vm5, %v289_v3  ;;  %7727 = vmatprep.mubr.msk.f32.mxu0 %vm11605_vm5, %v293_v7 }
 0x46a   :  { %7748 = vmatmul.mubr.msk.f32.gmra.mrb[16].mxu1 %vm11605_vm5, %v290_v4  ;;  %7728 = vmatmul.mubr.msk.f32.gmra.mrb[32].mxu0 %vm11605_vm5, %v294_v8 }
 0x46b   :  { %7750 = vmatprep.mubr.msk.f32.mxu1 %vm11605_vm5, %v291_v5 }
 0x46e   :  { %7751 = vmatmul.mubr.msk.f32.gmra.mrb[18].mxu1 %vm11605_vm5, %v292_v6 }
 0x46f   :  { %7753 = vmatprep.mubr.msk.f32.mxu1 %vm11605_vm5, %v293_v7 }
 0x472   :  { %7754 = vmatmul.mubr.msk.f32.gmra.mrb[20].mxu1 %vm11605_vm5, %v294_v8 }
 0x473   :  { %7756 = vmatprep.mubr.msk.f32.mxu1 %vm11605_vm5, %v10003_v33 }
 0x476   :  { %7757 = vmatmul.mubr.msk.f32.gmra.mrb[22].mxu1 %vm11605_vm5, %v296_v55 }
 0x477   :  { %7759 = vmatprep.mubr.msk.f32.mxu1 %vm11605_vm5, %v297_v59 }
 0x47a   :  { %7760 = vmatmul.mubr.msk.f32.gmra.mrb[24].mxu1 %vm11605_vm5, %v298_v62 }
 0x529   :  { %v10051_v14 = vpop.f32.mrb[6].mxu1  ;;  %v7714_v15 = vpop.f32.mrb[22].mxu0 }
 0x52a   :  { %v10053_v16 = vpop.f32.mrb[7].mxu1  ;;  %v1339_v17 = vpop.f32.mrb[23].mxu0  ;;  %v1567_v21 = vmul.f32 %v7714_v15, %v9859_v23 }
 0x52b   :  { %v1566_v26 = vmul.f32 %v1339_v17, %v9857_v22 }
 0x52d   :  { %v10055_v18 = vpop.f32.mrb[8].mxu1  ;;  %v7717_v20 = vpop.f32.mrb[24].mxu0 }
 0x52e   :  { %v10058_v24 = vpop.f32.mrb[9].mxu1  ;;  %v1349_v25 = vpop.f32.mrb[25].mxu0  ;;  %v1569_v34 = vmul.f32 %v7717_v20, %v9865_v28 }
 0x52f   :  { %v1568_v44 = vmul.f32 %v1349_v25, %v9863_v27 }
 0x531   :  { %v7740_v29 = vpop.f32.mrb[10].mxu1  ;;  %v7720_v30 = vpop.f32.mrb[26].mxu0 }
 0x532   :  { %v10061_v33 = vadd.f32 %v7740_v29, %v1567_v21  ;;  %v1487_v37 = vpop.f32.mrb[11].mxu1  ;;  %v1359_v38 = vpop.f32.mrb[27].mxu0  ;;  %v1571_v53 = vmul.f32 %v7720_v30, %v9875_v32 }
 0x533   :  { %v10064_v41 = vadd.f32 %v1566_v26, %v1487_v37  ;;  %v1570_v57 = vmul.f32 %v1359_v38, %v9873_v31 }
 0x534   :  { %v1599_v47 = vsub.f32 0.0, %v10061_v33 }
 0x535   :  { %v1598_v23 = vsub.f32 0.0, %v10064_v41  ;;  %v7743_v50 = vpop.f32.mrb[12].mxu1  ;;  %v7723_v51 = vpop.f32.mrb[28].mxu0 }
 0x536   :  { %v1616_v52 = vmul.f32 1.442695, %v1599_v47  ;;  %v10069_v22 = vadd.f32 %v7743_v50, %v1569_v34  ;;  %v1497_v54 = vpop.f32.mrb[13].mxu1  ;;  %v1369_v55 = vpop.f32.mrb[29].mxu0  ;;  %v1573_v32 = vmul.f32 %v7723_v51, %v9884_v36 }
 0x537   :  { %v1614_v28 = vmul.f32 1.442695, %v1598_v23  ;;  %v10072_v56 = vadd.f32 %v1568_v44, %v1497_v54  ;;  %v1572_v31 = vmul.f32 %v1369_v55, %v9882_v35 }
 0x538   :  { %8892 = vpow2.f32 %v1616_v52  ;;  %v1601_v27 = vsub.f32 0.0, %v10069_v22 }
 0x539   :  { %8894 = vpow2.f32 %v1614_v28  ;;  %v1600_v58 = vsub.f32 0.0, %v10072_v56  ;;  %v7746_v59 = vpop.f32.mrb[14].mxu1  ;;  %v7726_v60 = vpop.f32.mrb[30].mxu0 }
 0x53a   :  { %v1620_v61 = vmul.f32 1.442695, %v1601_v27  ;;  %v10077_v62 = vadd.f32 %v7746_v59, %v1571_v53  ;;  %v1507_v63 = vpop.f32.mrb[15].mxu1  ;;  %v1379_v1 = vpop.f32.mrb[31].mxu0  ;;  %v1575_v36 = vmul.f32 %v7726_v60, %v9893_v40 }
 0x53b   :  { %v1618_v2 = vmul.f32 1.442695, %v1600_v58  ;;  %v10080_v3 = vadd.f32 %v1570_v57, %v1507_v63  ;;  %v1574_v35 = vmul.f32 %v1379_v1, %v9891_v39 }
 0x53c   :  { %8896 = vpow2.f32 %v1620_v61  ;;  %v1603_v4 = vsub.f32 0.0, %v10077_v62 }
 0x53d   :  { %8898 = vpow2.f32 %v1618_v2  ;;  %v1602_v5 = vsub.f32 0.0, %v10080_v3  ;;  %v7749_v6 = vpop.f32.mrb[16].mxu1  ;;  %v7729_v7 = vpop.f32.mrb[32].mxu0 }
 0x53e   :  { %v1624_v8 = vmul.f32 1.442695, %v1603_v4  ;;  %v10085_v9 = vadd.f32 %v7749_v6, %v1573_v32  ;;  %v1517_v10 = vpop.f32.mrb[17].mxu1  ;;  %v1389_v15 = vpop.f32.mrb[33].mxu0  ;;  %v1577_v40 = vmul.f32 %v7729_v7, %v9902_v43  ;;  %v1578_v32 = vmul.f32 %v10053_v16, %v9909_v45 }
 0x53f   :  { %v1622_v17 = vmul.f32 1.442695, %v1602_v5  ;;  %v10088_v20 = vadd.f32 %v1572_v31, %v1517_v10  ;;  %v1576_v39 = vmul.f32 %v1389_v15, %v9900_v42  ;;  %v1579_v42 = vmul.f32 %v10051_v14, %v9911_v46 }
 0x540   :  { %8900 = vpow2.f32 %v1624_v8  ;;  %v1605_v21 = vsub.f32 0.0, %v10085_v9  ;;  %v1581_v8 = vmul.f32 %v10055_v18, %v9920_v49 }
 0x541   :  { %8902 = vpow2.f32 %v1622_v17  ;;  %v1604_v25 = vsub.f32 0.0, %v10088_v20  ;;  %v7752_v26 = vpop.f32.mrb[18].mxu1 }
 0x542   :  { %v8893_v29 = vpop.eup %8892  ;;  %v1628_v30 = vmul.f32 1.442695, %v1605_v21  ;;  %v10093_v34 = vadd.f32 %v7752_v26, %v1575_v36  ;;  %v1527_v37 = vpop.f32.mrb[19].mxu1  ;;  %v1580_v36 = vmul.f32 %v10058_v24, %v9918_v48 }
 0x543   :  { %v8895_v38 = vpop.eup %8894  ;;  %v1647_v44 = vadd.f32 1.0, %v8893_v29  ;;  %v1626_v47 = vmul.f32 1.442695, %v1604_v25  ;;  %v10096_v23 = vadd.f32 %v1574_v35, %v1527_v37 }
 0x544   :  { %v1646_v50 = vadd.f32 1.0, %v8895_v38  ;;  %8904 = vpow2.f32 %v1628_v30  ;;  %v1607_v51 = vsub.f32 0.0, %v10093_v34 }
 0x545   :  { %8906 = vrcp.f32 %v1647_v44  ;;  %v1606_v52 = vsub.f32 0.0, %v10096_v23  ;;  %v7755_v53 = vpop.f32.mrb[20].mxu1 }
 0x546   :  { %v8897_v54 = vpop.eup %8896  ;;  %8908 = vrcp.f32 %v1646_v50  ;;  %v1632_v55 = vmul.f32 1.442695, %v1607_v51  ;;  %v10101_v43 = vadd.f32 %v7755_v53, %v1577_v40  ;;  %v1537_v28 = vpop.f32.mrb[21].mxu1 }
 0x547   :  { %v8899_v57 = vpop.eup %8898  ;;  %v1649_v27 = vadd.f32 1.0, %v8897_v54  ;;  %8910 = vpow2.f32 %v1626_v47  ;;  %v1630_v58 = vmul.f32 1.442695, %v1606_v52  ;;  %v10103_v59 = vadd.f32 %v1576_v39, %v1537_v28 }
 0x548   :  { %v1648_v60 = vadd.f32 1.0, %v8899_v57  ;;  %8912 = vpow2.f32 %v1632_v55  ;;  %v1609_v61 = vsub.f32 0.0, %v10101_v43 }
 0x549   :  { %8914 = vrcp.f32 %v1649_v27  ;;  %v1608_v63 = vsub.f32 0.0, %v10103_v59  ;;  %v7758_v1 = vpop.f32.mrb[22].mxu1 }
 0x54a   :  { %v8901_v2 = vpop.eup %8900  ;;  %8916 = vrcp.f32 %v1648_v60  ;;  %v1636_v31 = vmul.f32 1.442695, %v1609_v61  ;;  %v10111_v4 = vadd.f32 %v7758_v1, %v1579_v42  ;;  %v1547_v5 = vpop.f32.mrb[23].mxu1 }
 0x54b   :  { %v8903_v6 = vpop.eup %8902  ;;  %v1651_v7 = vadd.f32 1.0, %v8901_v2  ;;  %8918 = vpow2.f32 %v1630_v58  ;;  %v1634_v46 = vmul.f32 1.442695, %v1608_v63  ;;  %v10113_v14 = vadd.f32 %v1578_v32, %v1547_v5 }
 0x54c   :  { %v1650_v45 = vadd.f32 1.0, %v8903_v6  ;;  %8920 = vpow2.f32 %v1636_v31  ;;  %v1611_v16 = vsub.f32 0.0, %v10111_v4 }
 0x54d   :  { %8922 = vrcp.f32 %v1651_v7  ;;  %v1610_v10 = vsub.f32 0.0, %v10113_v14  ;;  %v7761_v15 = vpop.f32.mrb[24].mxu1 }
 0x54e   :  { %v8905_v17 = vpop.eup %8904  ;;  %8924 = vrcp.f32 %v1650_v45  ;;  %v1640_v35 = vmul.f32 1.442695, %v1611_v16  ;;  %v10121_v21 = vadd.f32 %v7761_v15, %v1581_v8  ;;  %v1557_v25 = vpop.f32.mrb[25].mxu1 }
 0x54f   :  { %v8907_v26 = vpop.eup %8906  ;;  %v1653_v29 = vadd.f32 1.0, %v8905_v17  ;;  %8926 = vpow2.f32 %v1634_v46  ;;  %v1638_v49 = vmul.f32 1.442695, %v1610_v10  ;;  %v10123_v18 = vadd.f32 %v1580_v36, %v1557_v25  ;;  %v10170_v36 = vld [vmem:[#allocation24 + $0x40] sm:$0xff] }
 0x550   :  { %v8909_v30 = vpop.eup %8908  ;;  %v1679_v40 = vmul.f32 %v8907_v26, %v10061_v33  ;;  %8928 = vpow2.f32 %v1640_v35  ;;  %v1613_v48 = vsub.f32 0.0, %v10121_v21 }
 0x551   :  { %v8911_v24 = vpop.eup %8910  ;;  %v1678_v37 = vmul.f32 %v8909_v30, %v10064_v41  ;;  %8930 = vrcp.f32 %v1653_v29  ;;  %v1612_v38 = vsub.f32 0.0, %v10123_v18 }
 0x552   :  { %v8913_v44 = vpop.eup %8912  ;;  %1703 = vst.msk [vmem:[#allocation2 + $0x18] sm:$0xff] %vm11614_vm2, %v1679_v40  ;;  %v1652_v47 = vadd.f32 1.0, %v8911_v24  ;;  %8932 = vpow2.f32 %v1638_v49  ;;  %v1644_v39 = vmul.f32 1.442695, %v1613_v48 }
 0x553   :  { %v8915_v50 = vpop.eup %8914  ;;  %1702 = vst.msk [vmem:[#allocation2 + $0x10] sm:$0xff] %vm11614_vm2, %v1678_v37  ;;  %v1655_v51 = vadd.f32 1.0, %v8913_v44  ;;  %v1642_v33 = vmul.f32 1.442695, %v1612_v38 }
 0x554   :  { %v8917_v52 = vpop.eup %8916  ;;  %v1681_v53 = vmul.f32 %v8915_v50, %v10069_v22  ;;  %8934 = vrcp.f32 %v1652_v47 }
 0x555   :  { %v8919_v54 = vpop.eup %8918  ;;  %v1680_v41 = vmul.f32 %v8917_v52, %v10072_v56  ;;  %8936 = vrcp.f32 %v1655_v51 }
 0x556   :  { %v8921_v55 = vpop.eup %8920  ;;  %1705 = vst.msk [vmem:[#allocation2 + $0x28] sm:$0xff] %vm11614_vm2, %v1681_v53  ;;  %v1654_v28 = vadd.f32 1.0, %v8919_v54  ;;  %8938 = vpow2.f32 %v1644_v39 }
 0x557   :  { %v8923_v57 = vpop.eup %8922  ;;  %1704 = vst.msk [vmem:[#allocation2 + $0x20] sm:$0xff] %vm11614_vm2, %v1680_v41  ;;  %v1657_v27 = vadd.f32 1.0, %v8921_v55  ;;  %8940 = vpow2.f32 %v1642_v33 }
 0x558   :  { %v8925_v58 = vpop.eup %8924  ;;  %v1683_v42 = vmul.f32 %v8923_v57, %v10077_v62  ;;  %8942 = vrcp.f32 %v1654_v28  ;;  %v10149_v62 = vld [vmem:[#allocation24 + $0x30] sm:$0xff] }
 0x559   :  { %v8927_v22 = vpop.eup %8926  ;;  %v1682_v60 = vmul.f32 %v8925_v58, %v10080_v3  ;;  %8944 = vrcp.f32 %v1657_v27 }
 0x55a   :  { %v8929_v56 = vpop.eup %8928  ;;  %1707 = vst.msk [vmem:[#allocation2 + $0x38] sm:$0xff] %vm11614_vm2, %v1683_v42  ;;  %v1656_v61 = vadd.f32 1.0, %v8927_v22  ;;  %v10138_v32 = vld [vmem:[#allocation2 + $0xf] sm:$0xff]  ;;  %v10142_v1 = vld [vmem:[#allocation2 + $0x17] sm:$0xff]  ;;  %v1718_v42 = vld [vmem:[#allocation2 + $0x7] sm:$0xff] }
 0x55b   :  { %v10140_v63 = vld [vmem:[#allocation2 + $0x11] sm:$0xff]  ;;  %v8931_v2 = vpop.eup %8930  ;;  %1706 = vst.msk [vmem:[#allocation2 + $0x30] sm:$0xff] %vm11614_vm2, %v1682_v60  ;;  %v1659_v31 = vadd.f32 1.0, %v8929_v56  ;;  %7764 = vmatprep.mubr.msk.f32.mxu0 %vm11614_vm2, %v10138_v32 }
 0x55c   :  { %7920 = vmatprep.mubr.msk.f32.mxu1 %vm11614_vm2, %v10140_v63  ;;  %v8933_v3 = vpop.eup %8932  ;;  %v1685_v5 = vmul.f32 %v8931_v2, %v10085_v9  ;;  %8946 = vrcp.f32 %v1656_v61  ;;  %7765 = vmatmul.mubr.msk.f32.vlgmr.msra.gmra.mrb[34].mxu0 %vm11614_vm2, %v10142_v1 }
 0x55d   :  { %8948 = vrcp.f32 %v1659_v31  ;;  %v1658_v6 = vadd.f32 1.0, %v8933_v3  ;;  %7789 = vmatpush3.msra.mxu0 %v10045_v11  ;;  %v2983_v31 = vld [vmem:[#allocation2 + $0x9] sm:$0xff]  ;;  %v2395_v3 = vld [vmem:[#allocation24 + $0x20] sm:$0xff] }
 0x55e   :  { %v8935_v7 = vpop.eup %8934  ;;  %1709 = vst.msk [vmem:[#allocation2 + $0x48] sm:$0xff] %vm11614_vm2, %v1685_v5  ;;  %v10156_v46 = vld [vmem:[#allocation2 + $0x1f] sm:$0xff]  ;;  %v10160_v45 = vld [vmem:[#allocation2 + $0x27] sm:$0xff]  ;;  %7814 = vmatprep.subr.mxu0 %v10149_v62  ;;  %v3356_v5 = vld [vmem:[#allocation2 + $0x51] sm:$0xff] }
 0x55f   :  { %v10158_v8 = vld [vmem:[#allocation2 + $0x19] sm:$0xff]  ;;  %v8937_v9 = vpop.eup %8936  ;;  %v1684_v16 = vmul.f32 %v8935_v7, %v10088_v20  ;;  %8950 = vrcp.f32 %v1658_v6  ;;  %7767 = vmatprep.mubr.msk.f32.mxu0 %vm11614_vm2, %v10156_v46  ;;  %v10168_v11 = vld [vmem:[#allocation2 + $0x21] sm:$0xff]  ;;  %v2375_v7 = vld [vmem:[#allocation2 + $0x10] sm:$0xff] }
 0x560   :  { %7921 = vmatmul.mubr.msk.f32.vlgmr.msra.gmra.mrb[26].mxu1 %vm11614_vm2, %v10158_v8  ;;  %v8939_v10 = vpop.eup %8938  ;;  %v1687_v15 = vmul.f32 %v8937_v9, %v10093_v34  ;;  %7768 = vmatmul.mubr.msk.f32.gmra.mrb[36].mxu0 %vm11614_vm2, %v10160_v45  ;;  %v2377_v9 = vld [vmem:[#allocation2 + $0x20] sm:$0xff] }
 0x561   :  { %7923 = vmatprep.mubr.msk.f32.mxu1 %vm11614_vm2, %v10168_v11  ;;  %v8941_v20 = vpop.eup %8940  ;;  %1708 = vst.msk [vmem:[#allocation2 + $0x40] sm:$0xff] %vm11614_vm2, %v1684_v16  ;;  %v1661_v17 = vadd.f32 1.0, %v8939_v10  ;;  %7945 = vmatpush3.msra.mxu1 %v10048_v12  ;;  %v2378_v16 = vld [vmem:[#allocation2 + $0x28] sm:$0xff] }
 0x562   :  { %v8943_v35 = vpop.eup %8942  ;;  %1711 = vst.msk [vmem:[#allocation2 + $0x78] sm:$0xff] %vm11614_vm2, %v1687_v15  ;;  %v1660_v25 = vadd.f32 1.0, %v8941_v20  ;;  %v10180_v26 = vld [vmem:[#allocation2 + $0x2f] sm:$0xff]  ;;  %v10184_v34 = vld [vmem:[#allocation2 + $0x37] sm:$0xff]  ;;  %7970 = vmatprep.subr.mxu1 %v10170_v36 }
 0x563   :  { %v10182_v29 = vld [vmem:[#allocation2 + $0x29] sm:$0xff]  ;;  %v8945_v49 = vpop.eup %8944  ;;  %v1686_v30 = vmul.f32 %v8943_v35, %v10096_v23  ;;  %8952 = vrcp.f32 %v1661_v17  ;;  %7770 = vmatprep.mubr.msk.f32.mxu0 %vm11614_vm2, %v10180_v26  ;;  %v10192_v12 = vld [vmem:[#allocation2 + $0x31] sm:$0xff] }
 0x564   :  { %7924 = vmatmul.mubr.msk.f32.gmra.mrb[28].mxu1 %vm11614_vm2, %v10182_v29  ;;  %v1689_v40 = vmul.f32 %v8945_v49, %v10101_v43  ;;  %8954 = vrcp.f32 %v1660_v25  ;;  %7771 = vmatmul.mubr.msk.f32.gmra.mrb[38].mxu0 %vm11614_vm2, %v10184_v34  ;;  %v2374_v49 = vld [vmem:[#allocation2 + $0x8] sm:$0xff] }
 0x565   :  { %7926 = vmatprep.mubr.msk.f32.mxu1 %vm11614_vm2, %v10192_v12  ;;  %1710 = vst.msk [vmem:[#allocation2 + $0x70] sm:$0xff] %vm11614_vm2, %v1686_v30  ;;  %v2392_v15 = vld [vmem:[#allocation2 + $0x48] sm:$0xff] }
 0x566   :  { %v8947_v23 = vpop.eup %8946  ;;  %1713 = vst.msk [vmem:[#allocation2 + $0x88] sm:$0xff] %vm11614_vm2, %v1689_v40  ;;  %v2747_v40 = vld [vmem:[#allocation2 + $0x50] sm:$0xff] }
 0x567   :  { %v8949_v48 = vpop.eup %8948  ;;  %v1688_v24 = vmul.f32 %v8947_v23, %v10103_v59  ;;  %v2755_v23 = vld [vmem:[#allocation2 + $0xb0] sm:$0xff] }
 0x568   :  { %v1691_v37 = vmul.f32 %v8949_v48, %v10111_v4  ;;  %v10203_v38 = vld [vmem:[#allocation2 + $0x3f] sm:$0xff]  ;;  %v10207_v44 = vld [vmem:[#allocation2 + $0x47] sm:$0xff] }
 0x569   :  { %v10205_v43 = vld [vmem:[#allocation2 + $0x39] sm:$0xff]  ;;  %v8951_v47 = vpop.eup %8950  ;;  %1712 = vst.msk [vmem:[#allocation2 + $0x80] sm:$0xff] %vm11614_vm2, %v1688_v24  ;;  %7773 = vmatprep.mubr.msk.f32.mxu0 %vm11614_vm2, %v10203_v38  ;;  %v10214_v39 = vld [vmem:[#allocation2 + $0x41] sm:$0xff]  ;;  %v10222_v4 = vld [vmem:[#allocation2 + $0x49] sm:$0xff] }
 0x56a   :  { %7927 = vmatmul.mubr.msk.f32.gmra.mrb[30].mxu1 %vm11614_vm2, %v10205_v43  ;;  %1715 = vst.msk [vmem:[#allocation2 + $0x98] sm:$0xff] %vm11614_vm2, %v1691_v37  ;;  %v1690_v59 = vmul.f32 %v8951_v47, %v10113_v14  ;;  %7774 = vmatmul.mubr.msk.f32.gmra.mrb[40].mxu0 %vm11614_vm2, %v10207_v44  ;;  %v2381_v10 = vld [vmem:[#allocation2 + $0x40] sm:$0xff]  ;;  %v2384_v17 = vld [vmem:[#allocation2 + $0x78] sm:$0xff] }
 0x56b   :  { %7929 = vmatprep.mubr.msk.f32.mxu1 %vm11614_vm2, %v10214_v39 }
 0x56c   :  { %1714 = vst.msk [vmem:[#allocation2 + $0x90] sm:$0xff] %vm11614_vm2, %v1690_v59  ;;  %v10225_v50 = vld [vmem:[#allocation2 + $0x6f] sm:$0xff]  ;;  %v10227_v51 = vld [vmem:[#allocation2 + $0x77] sm:$0xff] }
 0x56d   :  { %v10229_v33 = vld [vmem:[#allocation2 + $0x71] sm:$0xff]  ;;  %v8953_v52 = vpop.eup %8952  ;;  %7776 = vmatprep.mubr.msk.f32.mxu0 %vm11614_vm2, %v10225_v50  ;;  %v2386_v25 = vld [vmem:[#allocation2 + $0x88] sm:$0xff] }
 0x56e   :  { %7930 = vmatmul.mubr.msk.f32.gmra.mrb[32].mxu1 %vm11614_vm2, %v10222_v4  ;;  %v8955_v14 = vpop.eup %8954  ;;  %v1693_v53 = vmul.f32 %v8953_v52, %v10121_v21  ;;  %7777 = vmatmul.mubr.msk.f32.gmra.mrb[42].mxu0 %vm11614_vm2, %v10227_v51  ;;  %v2383_v20 = vld [vmem:[#allocation2 + $0x70] sm:$0xff] }
 0x56f   :  { %7932 = vmatprep.mubr.msk.f32.mxu1 %vm11614_vm2, %v10229_v33  ;;  %v1692_v54 = vmul.f32 %v8955_v14, %v10123_v18 }
 0x570   :  { %1717 = vst.msk [vmem:[#allocation2 + $0xa8] sm:$0xff] %vm11614_vm2, %v1693_v53  ;;  %v10242_v41 = vld [vmem:[#allocation2 + $0x7f] sm:$0xff]  ;;  %v10246_v28 = vld [vmem:[#allocation2 + $0x87] sm:$0xff] }
 0x571   :  { %v10244_v55 = vld [vmem:[#allocation2 + $0x79] sm:$0xff]  ;;  %1716 = vst.msk [vmem:[#allocation2 + $0xa0] sm:$0xff] %vm11614_vm2, %v1692_v54  ;;  %7779 = vmatprep.mubr.msk.f32.mxu0 %vm11614_vm2, %v10242_v41  ;;  %v10253_v21 = vld [vmem:[#allocation2 + $0x81] sm:$0xff] }
 0x572   :  { %7933 = vmatmul.mubr.msk.f32.gmra.mrb[34].mxu1 %vm11614_vm2, %v10244_v55  ;;  %7780 = vmatmul.mubr.msk.f32.gmra.mrb[44].mxu0 %vm11614_vm2, %v10246_v28  ;;  %v2385_v35 = vld [vmem:[#allocation2 + $0x80] sm:$0xff] }
 0x573   :  { %7935 = vmatprep.mubr.msk.f32.mxu1 %vm11614_vm2, %v10253_v21  ;;  %v10259_v18 = vld [vmem:[#allocation2 + $0x8f] sm:$0xff]  ;;  %v10263_v27 = vld [vmem:[#allocation2 + $0x97] sm:$0xff] }
 0x574   :  { %v10261_v57 = vld [vmem:[#allocation2 + $0x89] sm:$0xff]  ;;  %7782 = vmatprep.mubr.msk.f32.mxu0 %vm11614_vm2, %v10259_v18  ;;  %v10267_v58 = vld [vmem:[#allocation2 + $0x91] sm:$0xff] }
 0x576   :  { %7936 = vmatmul.mubr.msk.f32.gmra.mrb[36].mxu1 %vm11614_vm2, %v10261_v57  ;;  %7783 = vmatmul.mubr.msk.f32.gmra.mrb[46].mxu0 %vm11614_vm2, %v10263_v27 }
 0x577   :  { %7938 = vmatprep.mubr.msk.f32.mxu1 %vm11614_vm2, %v10267_v58  ;;  %v10292_v2 = vld [vmem:[#allocation2 + $0xa9] sm:$0xff] }
 0x578   :  { %v10275_v22 = vld [vmem:[#allocation2 + $0x9f] sm:$0xff]  ;;  %v10279_v56 = vld [vmem:[#allocation2 + $0xa7] sm:$0xff]  ;;  %v2098_v6 = vld [vmem:[#allocation2 + $0xaf] sm:$0xff] }
 0x579   :  { %v10277_v60 = vld [vmem:[#allocation2 + $0x99] sm:$0xff]  ;;  %7785 = vmatprep.mubr.msk.f32.mxu0 %vm11614_vm2, %v10275_v22  ;;  %v10285_v61 = vld [vmem:[#allocation2 + $0xa1] sm:$0xff] }
 0x57a   :  { %7939 = vmatmul.mubr.msk.f32.gmra.mrb[38].mxu1 %vm11614_vm2, %v10277_v60  ;;  %7786 = vmatmul.mubr.msk.f32.gmra.mrb[48].mxu0 %vm11614_vm2, %v10279_v56  ;;  %v2393_v30 = vld [vmem:[#allocation2 + $0xa8] sm:$0xff] }
 0x57b   :  { %7941 = vmatprep.mubr.msk.f32.mxu1 %vm11614_vm2, %v10285_v61  ;;  %7790 = vmatprep.mubr.msk.f32.mxu0 %vm11614_vm2, %v1718_v42 }
 0x57e   :  { %7942 = vmatmul.mubr.msk.f32.gmra.mrb[40].mxu1 %vm11614_vm2, %v10292_v2  ;;  %7791 = vmatmul.mubr.msk.f32.vlgmr.msra.gmra.mrb[34].mxu0 %vm11614_vm2, %v10138_v32  ;;  %v1726_v32 = vld [vmem:[#allocation2 + $0x67] sm:$0xff] }
 0x57f   :  { %7946 = vmatprep.mubr.msk.f32.mxu1 %vm11614_vm2, %v2983_v31  ;;  %7793 = vmatprep.mubr.msk.f32.mxu0 %vm11614_vm2, %v10142_v1 }
 0x580   :  { %7815 = vmatpush3.msra.mxu0 %v10149_v62  ;;  %v2391_v62 = vld [vmem:[#allocation24 + $0x8] sm:$0xff] }
 0x581   :  { %7840 = vmatprep.subr.mxu0 %v2395_v3 }
 0x582   :  { %7947 = vmatmul.mubr.msk.f32.vlgmr.msra.gmra.mrb[26].mxu1 %vm11614_vm2, %v10140_v63  ;;  %7794 = vmatmul.mubr.msk.f32.gmra.mrb[36].mxu0 %vm11614_vm2, %v10156_v46  ;;  %v2991_v63 = vld [vmem:[#allocation2 + $0x69] sm:$0xff] }
 0x583   :  { %7949 = vmatprep.mubr.msk.f32.mxu1 %vm11614_vm2, %v10158_v8  ;;  %7796 = vmatprep.mubr.msk.f32.mxu0 %vm11614_vm2, %v10160_v45 }
 0x584   :  { %7971 = vmatpush3.msra.mxu1 %v10170_v36  ;;  %v2380_v36 = vld [vmem:[#allocation2 + $0x38] sm:$0xff] }
 0x585   :  { %8500 = vmatprep.subr.bf16.mxu1 %v11612_v13 }
 0x586   :  { %7950 = vmatmul.mubr.msk.f32.gmra.mrb[28].mxu1 %vm11614_vm2, %v10168_v11  ;;  %7797 = vmatmul.mubr.msk.f32.gmra.mrb[38].mxu0 %vm11614_vm2, %v10180_v26 }
 0x587   :  { %7952 = vmatprep.mubr.msk.f32.mxu1 %vm11614_vm2, %v10182_v29  ;;  %7799 = vmatprep.mubr.msk.f32.mxu0 %vm11614_vm2, %v10184_v34 }
 0x58a   :  { %7953 = vmatmul.mubr.msk.f32.gmra.mrb[30].mxu1 %vm11614_vm2, %v10192_v12  ;;  %7800 = vmatmul.mubr.msk.f32.gmra.mrb[40].mxu0 %vm11614_vm2, %v10203_v38 }
 0x58b   :  { %7955 = vmatprep.mubr.msk.f32.mxu1 %vm11614_vm2, %v10205_v43  ;;  %7802 = vmatprep.mubr.msk.f32.mxu0 %vm11614_vm2, %v1726_v32  ;;  %v303_v32 = vadd.s32 24, %v9854_v19 }
 0x58e   :  { %7956 = vmatmul.mubr.msk.f32.gmra.mrb[32].mxu1 %vm11614_vm2, %v10214_v39  ;;  %7803 = vmatmul.mubr.msk.f32.gmra.mrb[42].mxu0 %vm11614_vm2, %v10225_v50 }
 0x58f   :  { %7958 = vmatprep.mubr.msk.f32.mxu1 %vm11614_vm2, %v2991_v63  ;;  %7805 = vmatprep.mubr.msk.f32.mxu0 %vm11614_vm2, %v10227_v51 }
 0x592   :  { %7959 = vmatmul.mubr.msk.f32.gmra.mrb[34].mxu1 %vm11614_vm2, %v10229_v33  ;;  %7806 = vmatmul.mubr.msk.f32.gmra.mrb[44].mxu0 %vm11614_vm2, %v10242_v41 }
 0x593   :  { %7961 = vmatprep.mubr.msk.f32.mxu1 %vm11614_vm2, %v10244_v55  ;;  %7808 = vmatprep.mubr.msk.f32.mxu0 %vm11614_vm2, %v10246_v28 }
 0x596   :  { %7962 = vmatmul.mubr.msk.f32.gmra.mrb[36].mxu1 %vm11614_vm2, %v10253_v21  ;;  %7809 = vmatmul.mubr.msk.f32.gmra.mrb[46].mxu0 %vm11614_vm2, %v10259_v18 }
 0x597   :  { %7964 = vmatprep.mubr.msk.f32.mxu1 %vm11614_vm2, %v10261_v57  ;;  %7811 = vmatprep.mubr.msk.f32.mxu0 %vm11614_vm2, %v10263_v27 }
 0x59a   :  { %7965 = vmatmul.mubr.msk.f32.gmra.mrb[38].mxu1 %vm11614_vm2, %v10267_v58  ;;  %7812 = vmatmul.mubr.msk.f32.gmra.mrb[48].mxu0 %vm11614_vm2, %v10275_v22 }
 0x59b   :  { %7967 = vmatprep.mubr.msk.f32.mxu1 %vm11614_vm2, %v10277_v60  ;;  %7816 = vmatprep.mubr.msk.f32.mxu0 %vm11614_vm2, %v10142_v1  ;;  %v2090_v1 = vld [vmem:[#allocation2 + $0x4f] sm:$0xff] }
 0x59e   :  { %7968 = vmatmul.mubr.msk.f32.gmra.mrb[40].mxu1 %vm11614_vm2, %v10285_v61  ;;  %7817 = vmatmul.mubr.msk.f32.vlgmr.msra.gmra.mrb[34].mxu0 %vm11614_vm2, %v10156_v46  ;;  %v3364_v46 = vld [vmem:[#allocation2 + $0xb1] sm:$0xff] }
 0x59f   :  { %7972 = vmatprep.mubr.msk.f32.mxu1 %vm11614_vm2, %v10158_v8  ;;  %7819 = vmatprep.mubr.msk.f32.mxu0 %vm11614_vm2, %v10160_v45  ;;  %v2376_v8 = vld [vmem:[#allocation2 + $0x18] sm:$0xff]  ;;  %v2757_v45 = vld [vmem:[#allocation24 + $0x38] sm:$0xff] }
 0x5a0   :  { %7841 = vmatpush3.msra.mxu0 %v2395_v3  ;;  %v301_v3 = vadd.s32 8, %v9854_v19 }
 0x5a1   :  { %7866 = vmatprep.subr.mxu0 %v2391_v62 }
 0x5a2   :  { %7973 = vmatmul.mubr.msk.f32.vlgmr.msra.gmra.mrb[26].mxu1 %vm11614_vm2, %v10168_v11  ;;  %7820 = vmatmul.mubr.msk.f32.gmra.mrb[36].mxu0 %vm11614_vm2, %v10180_v26  ;;  %v2379_v11 = vld [vmem:[#allocation2 + $0x30] sm:$0xff]  ;;  %v327_v63 = vand.u32 7, %v301_v3  ;;  %v10593_v3 = vadd.s32 80, %v9854_v19 }
 0x5a3   :  { %7975 = vmatprep.mubr.msk.f32.mxu1 %vm11614_vm2, %v10182_v29  ;;  %7822 = vmatprep.mubr.msk.f32.mxu0 %vm11614_vm2, %v10184_v34  ;;  %v2387_v26 = vld [vmem:[#allocation2 + $0x90] sm:$0xff]  ;;  %v2388_v29 = vld [vmem:[#allocation2 + $0x98] sm:$0xff]  ;;  %v2389_v34 = vld [vmem:[#allocation2 + $0xa0] sm:$0xff] }
 0x5a4   :  { %vm10543_vm7 = vcmp.gt.s32.totalorder %v327_v63, 0  ;;  %vm10552_vm9 = vcmp.lt.s32.totalorder %v327_v63, 7  ;;  %v11690_v63 = vmov 0 }
 0x5a6   :  { %7976 = vmatmul.mubr.msk.f32.gmra.mrb[28].mxu1 %vm11614_vm2, %v10192_v12  ;;  %7823 = vmatmul.mubr.msk.f32.gmra.mrb[38].mxu0 %vm11614_vm2, %v10203_v38  ;;  %v2382_v12 = vld [vmem:[#allocation2 + $0x68] sm:$0xff] }
 0x5a7   :  { %7978 = vmatprep.mubr.msk.f32.mxu1 %vm11614_vm2, %v10205_v43  ;;  %7825 = vmatprep.mubr.msk.f32.mxu0 %vm11614_vm2, %v10207_v44 }
 0x5aa   :  { %7979 = vmatmul.mubr.msk.f32.gmra.mrb[30].mxu1 %vm11614_vm2, %v10214_v39  ;;  %7826 = vmatmul.mubr.msk.f32.gmra.mrb[40].mxu0 %vm11614_vm2, %v2090_v1  ;;  %v320_v1 = vand.u32 7, %v9854_v19 }
 0x5ab   :  { %7981 = vmatprep.mubr.msk.f32.mxu1 %vm11614_vm2, %v10222_v4  ;;  %7828 = vmatprep.mubr.msk.f32.mxu0 %vm11614_vm2, %v10227_v51 }
 0x5ac   :  { %vm10547_vm8 = vcmp.gt.s32.totalorder %v320_v1, 0  ;;  %vm10565_vm11 = vcmp.lt.s32.totalorder %v320_v1, 7 }
 0x5ae   :  { %7982 = vmatmul.mubr.msk.f32.gmra.mrb[32].mxu1 %vm11614_vm2, %v3356_v5  ;;  %7829 = vmatmul.mubr.msk.f32.gmra.mrb[42].mxu0 %vm11614_vm2, %v10242_v41  ;;  %v305_v5 = vadd.s32 40, %v9854_v19 }
 0x5af   :  { %7984 = vmatprep.mubr.msk.f32.mxu1 %vm11614_vm2, %v10244_v55  ;;  %7831 = vmatprep.mubr.msk.f32.mxu0 %vm11614_vm2, %v10246_v28 }
 0x5b2   :  { %7985 = vmatmul.mubr.msk.f32.gmra.mrb[34].mxu1 %vm11614_vm2, %v10253_v21  ;;  %7832 = vmatmul.mubr.msk.f32.gmra.mrb[44].mxu0 %vm11614_vm2, %v10259_v18 }
 0x5b3   :  { %7987 = vmatprep.mubr.msk.f32.mxu1 %vm11614_vm2, %v10261_v57  ;;  %7834 = vmatprep.mubr.msk.f32.mxu0 %vm11614_vm2, %v10263_v27 }
 0x5b6   :  { %7988 = vmatmul.mubr.msk.f32.gmra.mrb[36].mxu1 %vm11614_vm2, %v10267_v58  ;;  %7835 = vmatmul.mubr.msk.f32.gmra.mrb[46].mxu0 %vm11614_vm2, %v10275_v22 }
 0x5b7   :  { %7990 = vmatprep.mubr.msk.f32.mxu1 %vm11614_vm2, %v10277_v60  ;;  %7837 = vmatprep.mubr.msk.f32.mxu0 %vm11614_vm2, %v10279_v56 }
 0x5ba   :  { %7991 = vmatmul.mubr.msk.f32.gmra.mrb[38].mxu1 %vm11614_vm2, %v10285_v61  ;;  %7838 = vmatmul.mubr.msk.f32.gmra.mrb[48].mxu0 %vm11614_vm2, %v2098_v6  ;;  %v341_v6 = vand.u32 7, %v303_v32 }
 0x5bb   :  { %7993 = vmatprep.mubr.msk.f32.mxu1 %vm11614_vm2, %v10292_v2  ;;  %7842 = vmatprep.mubr.msk.f32.mxu0 %vm11614_vm2, %v2375_v7 }
 0x5bc   :  { %vm10556_vm10 = vcmp.gt.s32.totalorder %v341_v6, 0  ;;  %vm10577_vm13 = vcmp.lt.s32.totalorder %v341_v6, 7 }
 0x5be   :  { %7994 = vmatmul.mubr.msk.f32.gmra.mrb[40].mxu1 %vm11614_vm2, %v3364_v46  ;;  %7843 = vmatmul.mubr.msk.f32.vlgmr.msra.gmra.mrb[0].mxu0 %vm11614_vm2, %v2376_v8  ;;  %v307_v46 = vadd.s32 56, %v9854_v19 }
 0x5bf   :  { %8063 = vmatprep.mubr.msk.f32.mxu1 %vm11608_vm0, %v11610_v0  ;;  %7845 = vmatprep.mubr.msk.f32.mxu0 %vm11614_vm2, %v2377_v9 }
 0x5c0   :  { %7867 = vmatpush3.msra.mxu0 %v2391_v62  ;;  %v302_v62 = vadd.s32 16, %v9854_v19 }
 0x5c1   :  { %7892 = vmatprep.subr.mxu0 %v2757_v45 }
 0x5c2   :  { %7846 = vmatmul.mubr.msk.f32.gmra.mrb[2].mxu0 %vm11614_vm2, %v2378_v16 }
 0x5c3   :  { %7848 = vmatprep.mubr.msk.f32.mxu0 %vm11614_vm2, %v2379_v11 }
 0x5c6   :  { %7849 = vmatmul.mubr.msk.f32.gmra.mrb[4].mxu0 %vm11614_vm2, %v2380_v36 }
 0x5c7   :  { %7851 = vmatprep.mubr.msk.f32.mxu0 %vm11614_vm2, %v2381_v10 }
 0x5ca   :  { %7852 = vmatmul.mubr.msk.f32.gmra.mrb[6].mxu0 %vm11614_vm2, %v2392_v15 }
 0x5cb   :  { %7854 = vmatprep.mubr.msk.f32.mxu0 %vm11614_vm2, %v2383_v20 }
 0x5ce   :  { %7855 = vmatmul.mubr.msk.f32.gmra.mrb[8].mxu0 %vm11614_vm2, %v2384_v17 }
 0x5cf   :  { %7857 = vmatprep.mubr.msk.f32.mxu0 %vm11614_vm2, %v2385_v35 }
 0x5d2   :  { %7858 = vmatmul.mubr.msk.f32.gmra.mrb[10].mxu0 %vm11614_vm2, %v2386_v25 }
 0x5d3   :  { %7860 = vmatprep.mubr.msk.f32.mxu0 %vm11614_vm2, %v2387_v26 }
 0x5d6   :  { %7861 = vmatmul.mubr.msk.f32.gmra.mrb[12].mxu0 %vm11614_vm2, %v2388_v29 }
 0x5d7   :  { %7863 = vmatprep.mubr.msk.f32.mxu0 %vm11614_vm2, %v2389_v34 }
 0x5da   :  { %7864 = vmatmul.mubr.msk.f32.gmra.mrb[14].mxu0 %vm11614_vm2, %v2393_v30 }
 0x5db   :  { %7868 = vmatprep.mubr.msk.f32.mxu0 %vm11614_vm2, %v2374_v49 }
 0x5de   :  { %7869 = vmatmul.mubr.msk.f32.vlgmr.msra.gmra.mrb[0].mxu0 %vm11614_vm2, %v2375_v7  ;;  %v304_v7 = vadd.s32 32, %v9854_v19 }
 0x5df   :  { %7871 = vmatprep.mubr.msk.f32.mxu0 %vm11614_vm2, %v2376_v8  ;;  %7893 = vmatpush3.msra.mxu0 %v2757_v45 }
 0x5e0   :  { %8476 = vmatprep.subr.bf16.mxu0 %v11612_v13 }
 0x5e2   :  { %7872 = vmatmul.mubr.msk.f32.gmra.mrb[2].mxu0 %vm11614_vm2, %v2377_v9 }
 0x5e3   :  { %7874 = vmatprep.mubr.msk.f32.mxu0 %vm11614_vm2, %v2378_v16 }
 0x5e6   :  { %7875 = vmatmul.mubr.msk.f32.gmra.mrb[4].mxu0 %vm11614_vm2, %v2379_v11 }
 0x5e7   :  { %7877 = vmatprep.mubr.msk.f32.mxu0 %vm11614_vm2, %v2380_v36 }
 0x5ea   :  { %7878 = vmatmul.mubr.msk.f32.gmra.mrb[6].mxu0 %vm11614_vm2, %v2381_v10 }
 0x5eb   :  { %7880 = vmatprep.mubr.msk.f32.mxu0 %vm11614_vm2, %v2382_v12  ;;  %v11681_v12 = vmov 0 }
 0x5ec   :  { %v11682_v12 = vsel %vm10577_vm13, 4294967295, %v11681_v12 }
 0x5ed   :  { %11683 = vst [vmem:[#allocation47_spill] sm:$0xff] %v11682_v12 }
 0x5ee   :  { %7881 = vmatmul.mubr.msk.f32.gmra.mrb[8].mxu0 %vm11614_vm2, %v2383_v20  ;;  %v348_v20 = vand.u32 7, %v304_v7  ;;  %v11698_v7 = vmov 0 }
 0x5ef   :  { %7883 = vmatprep.mubr.msk.f32.mxu0 %vm11614_vm2, %v2384_v17 }
 0x5f0   :  { %vm10596_vm1 = vcmp.gt.s32.totalorder %v348_v20, 0  ;;  %vm10612_vm4 = vcmp.lt.s32.totalorder %v348_v20, 7 }
 0x5f1   :  { %v11691_v63 = vsel %vm10596_vm1, 4294967295, %v11690_v63  ;;  %v11699_v7 = vsel %vm10612_vm4, 4294967295, %v11698_v7 }
 0x5f2   :  { %7884 = vmatmul.mubr.msk.f32.gmra.mrb[10].mxu0 %vm11614_vm2, %v2385_v35  ;;  %11692 = vst [vmem:[#allocation50_spill] sm:$0xff] %v11691_v63 }
 0x5f3   :  { %7886 = vmatprep.mubr.msk.f32.mxu0 %vm11614_vm2, %v2386_v25 }
 0x5f6   :  { %7887 = vmatmul.mubr.msk.f32.gmra.mrb[12].mxu0 %vm11614_vm2, %v2387_v26 }
 0x5f7   :  { %7889 = vmatprep.mubr.msk.f32.mxu0 %vm11614_vm2, %v2388_v29 }
 0x5fa   :  { %7890 = vmatmul.mubr.msk.f32.gmra.mrb[14].mxu0 %vm11614_vm2, %v2389_v34 }
 0x5fb   :  { %7894 = vmatprep.mubr.msk.f32.mxu0 %vm11614_vm2, %v2376_v8  ;;  %v306_v8 = vadd.s32 48, %v9854_v19 }
 0x5fe   :  { %7895 = vmatmul.mubr.msk.f32.vlgmr.msra.gmra.mrb[0].mxu0 %vm11614_vm2, %v2377_v9  ;;  %v334_v9 = vand.u32 7, %v302_v62  ;;  %v11693_v62 = vmov 0 }
 0x5ff   :  { %7897 = vmatprep.mubr.msk.f32.mxu0 %vm11614_vm2, %v2378_v16 }
 0x600   :  { %vm10573_vm12 = vcmp.gt.s32.totalorder %v334_v9, 0  ;;  %vm10588_vm15 = vcmp.lt.s32.totalorder %v334_v9, 7 }
 0x602   :  { %7898 = vmatmul.mubr.msk.f32.gmra.mrb[2].mxu0 %vm11614_vm2, %v2379_v11  ;;  %v355_v11 = vand.u32 7, %v305_v5 }
 0x603   :  { %7900 = vmatprep.mubr.msk.f32.mxu0 %vm11614_vm2, %v2380_v36  ;;  %v309_v36 = vadd.s32 72, %v9854_v19 }
 0x604   :  { %vm10584_vm14 = vcmp.gt.s32.totalorder %v355_v11, 0  ;;  %vm10600_vm6 = vcmp.lt.s32.totalorder %v355_v11, 7 }
 0x605   :  { %v11694_v62 = vsel %vm10600_vm6, 4294967295, %v11693_v62 }
 0x606   :  { %7901 = vmatmul.mubr.msk.f32.gmra.mrb[4].mxu0 %vm11614_vm2, %v2381_v10  ;;  %v11671_v10 = vmov 0  ;;  %11695 = vst [vmem:[#allocation51_spill] sm:$0xff] %v11694_v62  ;;  %v11727_v62 = vmov 0 }
 0x607   :  { %7903 = vmatprep.mubr.msk.f32.mxu0 %vm11614_vm2, %v2392_v15  ;;  %v11672_v10 = vsel %vm10552_vm9, 4294967295, %v11671_v10 }
 0x608   :  { %11673 = vst [vmem:[#allocation45_spill] sm:$0xff] %v11672_v10 }
 0x60a   :  { %7904 = vmatmul.mubr.msk.f32.gmra.mrb[6].mxu0 %vm11614_vm2, %v2747_v40  ;;  %v10582_v40 = vadd.s32 88, %v9854_v19 }
 0x60b   :  { %7906 = vmatprep.mubr.msk.f32.mxu0 %vm11614_vm2, %v2384_v17  ;;  %v369_v17 = vand.u32 7, %v307_v46  ;;  %v11700_v46 = vmov 0 }
 0x60d   :  { %vm10604_vm5 = vcmp.gt.s32.totalorder %v369_v17, 0 }
 0x60e   :  { %7907 = vmatmul.mubr.msk.f32.gmra.mrb[8].mxu0 %vm11614_vm2, %v2385_v35  ;;  %v10560_v35 = vld [vmem:[#allocation16] ss:$0 sm:$0xff] }
 0x60f   :  { %7909 = vmatprep.mubr.msk.f32.mxu0 %vm11614_vm2, %v2386_v25 }
 0x612   :  { %7910 = vmatmul.mubr.msk.f32.gmra.mrb[10].mxu0 %vm11614_vm2, %v2387_v26  ;;  %v11676_v26 = vmov 0 }
 0x613   :  { %7912 = vmatprep.mubr.msk.f32.mxu0 %vm11614_vm2, %v2388_v29  ;;  %v11677_v26 = vsel %vm10565_vm11, 4294967295, %v11676_v26  ;;  %v362_v29 = vand.u32 7, %v306_v8 }
 0x614   :  { %11678 = vst [vmem:[#allocation46_spill] sm:$0xff] %v11677_v26 }
 0x615   :  { %vm10616_vm3 = vcmp.gt.s32.totalorder %v362_v29, 0 }
 0x616   :  { %7913 = vmatmul.mubr.msk.f32.gmra.mrb[12].mxu0 %vm11614_vm2, %v2389_v34  ;;  %v308_v34 = vadd.s32 64, %v9854_v19  ;;  %v11701_v46 = vsel %vm10616_vm3, 4294967295, %v11700_v46 }
 0x617   :  { %7915 = vmatprep.mubr.msk.f32.mxu0 %vm11614_vm2, %v2393_v30  ;;  %v11679_v30 = vmov 0 }
 0x618   :  { %v11680_v30 = vsel %vm10573_vm12, 4294967295, %v11679_v30  ;;  %v376_v8 = vand.u32 7, %v308_v34  ;;  %v390_v34 = vand.u32 7, %v10593_v3 }
 0x61a   :  { %7916 = vmatmul.mubr.msk.f32.gmra.mrb[14].mxu0 %vm11614_vm2, %v2755_v23  ;;  %v11684_v23 = vmov 0  ;;  %vm10639_vm2 = vcmp.lt.s32.totalorder %v369_v17, 7 }
 0x61b   :  { %8028 = vmatprep.mubr.msk.f32.mxu0 %vm11608_vm0, %v11610_v0  ;;  %v11685_v23 = vsel %vm10584_vm14, 4294967295, %v11684_v23 }
 0x61c   :  { %11686 = vst [vmem:[#allocation48_spill] sm:$0xff] %v11685_v23 }
 0x671   :  { %v10471_v48 = vpop.f32.mrb[34].mxu0 }
 0x672   :  { %v10473_v24 = vpop.f32.mrb[35].mxu0  ;;  %v2343_v25 = vsel %vm10543_vm7, %v10471_v48, 0.0  ;;  %v11687_v48 = vmov 0 }
 0x673   :  { %v2342_v49 = vsel %vm10547_vm8, %v10473_v24, 0.0  ;;  %v11688_v48 = vsel %vm10588_vm15, 4294967295, %v11687_v48  ;;  %v383_v24 = vand.u32 7, %v309_v36  ;;  %v8568_v32 = vadd.f32 %v10560_v35, %v2343_v25 }
 0x674   :  { %11689 = vst [vmem:[#allocation49_spill] sm:$0xff] %v11688_v48  ;;  %v8570_v5 = vadd.f32 %v10560_v35, %v2342_v49  ;;  %v397_v36 = vand.u32 7, %v10582_v40  ;;  %v10625_v25 = vadd.s32 104, %v9854_v19 }
 0x675   :  { %v10475_v37 = vpop.f32.mrb[26].mxu1  ;;  %v10477_v38 = vpop.f32.mrb[36].mxu0  ;;  %vm10630_vm0 = vcmp.gt.s32.totalorder %v383_v24, 0 }
 0x676   :  { %v10479_v43 = vpop.f32.mrb[27].mxu1  ;;  %v10481_v44 = vpop.f32.mrb[37].mxu0  ;;  %v2345_v6 = vsel %vm10556_vm10, %v10477_v38, 0.0  ;;  %v3609_v49 = vsel %vm10552_vm9, %v10475_v37, 0.0  ;;  %vm10652_vm9 = vcmp.lt.s32.totalorder %v362_v29, 7 }
 0x677   :  { %v2344_v11 = vsel %vm10573_vm12, %v10481_v44, 0.0  ;;  %v8572_v44 = vadd.f32 %v10560_v35, %v2345_v6  ;;  %v3608_v40 = vsel %vm10565_vm11, %v10479_v43, 0.0  ;;  %vm10656_vm11 = vcmp.gt.s32.totalorder %v376_v8, 0 }
 0x678   :  { %v8574_v10 = vadd.f32 %v10560_v35, %v2344_v11  ;;  %v11708_v43 = vmov 0  ;;  %vm10665_vm12 = vcmp.gt.s32.totalorder %v397_v36, 0  ;;  %v11710_v11 = vmov 0 }
 0x679   :  { %v10483_v47 = vpop.f32.mrb[28].mxu1  ;;  %v10485_v39 = vpop.f32.mrb[38].mxu0  ;;  %v11709_v43 = vsel %vm10656_vm11, 4294967295, %v11708_v43  ;;  %v11711_v11 = vsel %vm10665_vm12, 4294967295, %v11710_v11 }
 0x67a   :  { %v10487_v59 = vpop.f32.mrb[29].mxu1  ;;  %v10489_v4 = vpop.f32.mrb[39].mxu0  ;;  %v2347_v3 = vsel %vm10584_vm14, %v10485_v39, 0.0  ;;  %v411_v39 = vand.u32 7, %v10625_v25  ;;  %vm10675_vm14 = vcmp.gt.s32.totalorder %v390_v34, 0 }
 0x67b   :  { %v8576_v63 = vadd.f32 %v10560_v35, %v2347_v3  ;;  %v11717_v3 = vmov 0 }
 0x67d   :  { %v10491_v50 = vpop.f32.mrb[30].mxu1  ;;  %v10493_v51 = vpop.f32.mrb[40].mxu0 }
 0x67e   :  { %v10495_v33 = vpop.f32.mrb[31].mxu1  ;;  %v10497_v52 = vpop.f32.mrb[41].mxu0 }
 0x681   :  { %v10499_v14 = vpop.f32.mrb[32].mxu1  ;;  %v10501_v53 = vpop.f32.mrb[42].mxu0 }
 0x682   :  { %v10503_v54 = vpop.f32.mrb[33].mxu1  ;;  %v10505_v41 = vpop.f32.mrb[43].mxu0 }
 0x685   :  { %v10507_v55 = vpop.f32.mrb[34].mxu1  ;;  %v10509_v28 = vpop.f32.mrb[44].mxu0 }
 0x686   :  { %v10511_v21 = vpop.f32.mrb[35].mxu1  ;;  %v10513_v18 = vpop.f32.mrb[45].mxu0 }
 0x689   :  { %v10515_v57 = vpop.f32.mrb[36].mxu1  ;;  %v10517_v27 = vpop.f32.mrb[46].mxu0 }
 0x68a   :  { %v10519_v58 = vpop.f32.mrb[37].mxu1  ;;  %v10521_v42 = vpop.f32.mrb[47].mxu0 }
 0x68d   :  { %v10523_v22 = vpop.f32.mrb[38].mxu1  ;;  %v10525_v60 = vpop.f32.mrb[48].mxu0 }
 0x68e   :  { %v10527_v56 = vpop.f32.mrb[39].mxu1  ;;  %v10529_v61 = vpop.f32.mrb[49].mxu0 }
 0x691   :  { %v10531_v2 = vpop.f32.mrb[40].mxu1 }
 0x692   :  { %v10533_v31 = vpop.f32.mrb[41].mxu1 }
 0x6d1   :  { %v7896_v9 = vpop.f32.mrb[0].mxu0 }
 0x6d2   :  { %v8569_v38 = vadd.f32 %v8568_v32, %v7896_v9  ;;  %v2872_v20 = vpop.f32.mrb[1].mxu0  ;;  %v11704_v32 = vmov 0  ;;  %v10644_v9 = vadd.s32 96, %v9854_v19 }
 0x6d3   :  { %v8571_v13 = vadd.f32 %v8570_v5, %v2872_v20  ;;  %v11705_v32 = vsel %vm10639_vm2, 4294967295, %v11704_v32  ;;  %v11706_v5 = vmov 0 }
 0x6d4   :  { %v10646_v37 = vadd.f32 %v8569_v38, %v3609_v49  ;;  %v11707_v5 = vsel %vm10652_vm9, 4294967295, %v11706_v5  ;;  %v2346_v38 = vsel %vm10596_vm1, %v10489_v4, 0.0  ;;  %vm10687_vm1 = vcmp.lt.s32.totalorder %v383_v24, 7 }
 0x6d5   :  { %v10660_v17 = vadd.f32 %v8571_v13, %v3608_v40  ;;  %v7899_v6 = vpop.f32.mrb[2].mxu0  ;;  %v3611_v13 = vsel %vm10577_vm13, %v10483_v47, 0.0  ;;  %v11712_v40 = vmov 0  ;;  %v8578_v23 = vadd.f32 %v10560_v35, %v2346_v38 }
 0x6d6   :  { %v3716_v29 = vmul.f32 %v10646_v37, %v10646_v37  ;;  %v8573_v20 = vadd.f32 %v8572_v44, %v7899_v6  ;;  %v2882_v49 = vpop.f32.mrb[3].mxu0  ;;  %v11713_v40 = vsel %vm10675_vm14, 4294967295, %v11712_v40  ;;  %v3610_v44 = vsel %vm10588_vm15, %v10487_v59, 0.0 }
 0x6d7   :  { %v8477_v4 = vpack.c.bf16 %v10646_v37, %v10660_v17  ;;  %v3715_v26 = vmul.f32 %v10660_v17, %v10660_v17  ;;  %v8575_v25 = vadd.f32 %v8574_v10, %v2882_v49  ;;  %v11714_v6 = vmov 0 }
 0x6d8   :  { %v11715_v6 = vsel %vm10687_vm1, 4294967295, %v11714_v6  ;;  %v10692_v12 = vadd.f32 %v8573_v20, %v3611_v13  ;;  %v2349_v10 = vsel %vm10604_vm5, %v10493_v51, 0.0  ;;  %vm10698_vm13 = vcmp.lt.s32.totalorder %v376_v8, 7 }
 0x6d9   :  { %11716 = vst [vmem:[#allocation52_spill] sm:$0xff] %v11715_v6  ;;  %v11718_v3 = vsel %vm10698_vm13, 4294967295, %v11717_v3  ;;  %v10702_v49 = vadd.f32 %v8575_v25, %v3610_v44  ;;  %v7902_v59 = vpop.f32.mrb[4].mxu0  ;;  %8478 = vmatpush3.bf16.msra.mxu0 %v8477_v4  ;;  %v8501_v24 = vpack.c.bf16 %v3716_v29, %v3715_v26  ;;  %v2348_v20 = vsel %vm10616_vm3, %v10497_v52, 0.0 }
 0x6da   :  { %11719 = vst [vmem:[#allocation53_spill] sm:$0xff] %v11718_v3  ;;  %vm10707_vm15 = vcmp.gt.s32.totalorder %v411_v39, 0  ;;  %v11720_v13 = vmov 0  ;;  %v10712_v38 = vadd.s32 120, %v9854_v19  ;;  %v3718_v51 = vmul.f32 %v10692_v12, %v10692_v12  ;;  %v2892_v25 = vpop.f32.mrb[5].mxu0 }
 0x6db   :  { %v11721_v13 = vsel %vm10707_vm15, 4294967295, %v11720_v13  ;;  %v8577_v8 = vadd.f32 %v8576_v63, %v7902_v59  ;;  %v11722_v44 = vmov 0.0|0.0   ;;  %v3613_v26 = vsel %vm10600_vm6, %v10491_v50, 0.0  ;;  %8502 = vmatpush3.bf16.msra.mxu1 %v8501_v24 }
 0x6dc   :  { %8479 = vmatprep.subr.bf16.mxu0 %v11722_v44  ;;  %v8480_v52 = vpack.c.bf16 %v10692_v12, %v10702_v49  ;;  %v3717_v29 = vmul.f32 %v10702_v49, %v10702_v49  ;;  %v8579_v4 = vadd.f32 %v8578_v23, %v2892_v25  ;;  %v8580_v47 = vadd.f32 %v10560_v35, %v2349_v10 }
 0x6dd   :  { %v3612_v63 = vsel %vm10612_vm4, %v10495_v33, 0.0  ;;  %vm10728_vm3 = vcmp.lt.s32.totalorder %v397_v36, 7  ;;  %v11723_v59 = vmov 0  ;;  %v11726_v50 = vand.u32 7, %v10644_v9  ;;  %8503 = vmatprep.subr.bf16.mxu1 %v11722_v44  ;;  %v7905_v24 = vpop.f32.mrb[6].mxu0 }
 0x6de   :  { %v11724_v59 = vsel %vm10728_vm3, 4294967295, %v11723_v59  ;;  %v10738_v48 = vadd.f32 %v8577_v8, %v3613_v26  ;;  %v8582_v23 = vadd.f32 %v10560_v35, %v2348_v20  ;;  %v2351_v33 = vsel %vm10630_vm0, %v10501_v53, 0.0  ;;  %8481 = vmatpush3.bf16.msra.mxu0 %v8480_v52 }
 0x6df   :  { %11725 = vst [vmem:[#allocation54_spill] sm:$0xff] %v11724_v59  ;;  %vm10734_vm6 = vcmp.gt.s32.totalorder %v11726_v50, 0  ;;  %vm10745_vm4 = vcmp.lt.s32.totalorder %v390_v34, 7  ;;  %v11729_v36 = vmov 0  ;;  %v10749_v10 = vadd.f32 %v8579_v4, %v3612_v63  ;;  %v2902_v34 = vpop.f32.mrb[7].mxu0  ;;  %8482 = vmatprep.subr.bf16.mxu0 %v11722_v44 }
 0x6e0   :  { %v11728_v62 = vsel %vm10734_vm6, 4294967295, %v11727_v62  ;;  %v11730_v36 = vsel %vm10745_vm4, 4294967295, %v11729_v36  ;;  %v8504_v25 = vpack.c.bf16 %v3718_v51, %v3717_v29  ;;  %v2350_v8 = vsel %vm10656_vm11, %v10505_v41, 0.0 }
 0x6e1   :  { %11731 = vst [vmem:[#allocation55_spill] sm:$0xff] %v11730_v36  ;;  %v10755_v26 = vadd.s32 112, %v9854_v19  ;;  %v3720_v20 = vmul.f32 %v10738_v48, %v10738_v48  ;;  %v8581_v53 = vadd.f32 %v8580_v47, %v7905_v24  ;;  %v3615_v4 = vsel %vm10639_vm2, %v10499_v14, 0.0  ;;  %v7908_v24 = vpop.f32.mrb[8].mxu0 }
 0x6e2   :  { %v8483_v51 = vpack.c.bf16 %v10738_v48, %v10749_v10  ;;  %v3719_v41 = vmul.f32 %v10749_v10, %v10749_v10  ;;  %v8583_v52 = vadd.f32 %v8582_v23, %v2902_v34  ;;  %8505 = vmatpush3.bf16.msra.mxu1 %v8504_v25  ;;  %v8584_v19 = vadd.f32 %v10560_v35, %v2351_v33 }
 0x6e3   :  { %v3614_v47 = vsel %vm10652_vm9, %v10503_v54, 0.0  ;;  %vm10771_vm11 = vcmp.lt.s32.totalorder %v411_v39, 7  ;;  %v11732_v29 = vmov 0  ;;  %v425_v14 = vand.u32 7, %v10712_v38  ;;  %8506 = vmatprep.subr.bf16.mxu1 %v11722_v44 }
 0x6e4   :  { %v11733_v29 = vsel %vm10771_vm11, 4294967295, %v11732_v29  ;;  %v10776_v63 = vadd.f32 %v8581_v53, %v3615_v4  ;;  %v8586_v50 = vadd.f32 %v10560_v35, %v2350_v8  ;;  %v2353_v23 = vsel %vm10665_vm12, %v10509_v28, 0.0  ;;  %8484 = vmatpush3.bf16.msra.mxu0 %v8483_v51  ;;  %v2912_v8 = vpop.f32.mrb[9].mxu0 }
 0x6e5   :  { %11734 = vst [vmem:[#allocation56_spill] sm:$0xff] %v11733_v29  ;;  %v10783_v33 = vadd.f32 %v8583_v52, %v3614_v47  ;;  %v8507_v54 = vpack.c.bf16 %v3720_v20, %v3719_v41  ;;  %v2352_v39 = vsel %vm10675_vm14, %v10513_v18, 0.0  ;;  %v418_v25 = vand.u32 7, %v10755_v26  ;;  %8485 = vmatprep.subr.bf16.mxu0 %v11722_v44 }
 0x6e6   :  { %v3722_v53 = vmul.f32 %v10776_v63, %v10776_v63  ;;  %v8585_v34 = vadd.f32 %v8584_v19, %v7908_v24  ;;  %v3617_v28 = vsel %vm10687_vm1, %v10507_v55, 0.0  ;;  %v8587_v18 = vadd.f32 %v8586_v50, %v2912_v8  ;;  %v7911_v50 = vpop.f32.mrb[10].mxu0 }
 0x6e7   :  { %v8486_v20 = vpack.c.bf16 %v10776_v63, %v10783_v33  ;;  %v3721_v4 = vmul.f32 %v10783_v33, %v10783_v33  ;;  %8508 = vmatpush3.bf16.msra.mxu1 %v8507_v54  ;;  %v8588_v26 = vadd.f32 %v10560_v35, %v2353_v23  ;;  %v3616_v51 = vsel %vm10698_vm13, %v10511_v21, 0.0 }
 0x6e8   :  { %vm10805_vm9 = vcmp.gt.s32.totalorder %v425_v14, 0  ;;  %v11735_v41 = vmov 0  ;;  %v10809_v55 = vadd.f32 %v8585_v34, %v3617_v28  ;;  %8509 = vmatprep.subr.bf16.mxu1 %v11722_v44  ;;  %v8590_v52 = vadd.f32 %v10560_v35, %v2352_v39  ;;  %v2922_v34 = vpop.f32.mrb[11].mxu0 }
 0x6e9   :  { %v11736_v41 = vsel %vm10805_vm9, 4294967295, %v11735_v41  ;;  %v2355_v19 = vsel %vm10707_vm15, %v10517_v27, 0.0  ;;  %v10816_v47 = vadd.f32 %v8587_v18, %v3616_v51  ;;  %8487 = vmatpush3.bf16.msra.mxu0 %v8486_v20  ;;  %v8510_v21 = vpack.c.bf16 %v3722_v53, %v3721_v4 }
 0x6ea   :  { %v2354_v23 = vsel %vm10734_vm6, %v10521_v42, 0.0  ;;  %vm10821_vm13 = vcmp.gt.s32.totalorder %v418_v25, 0  ;;  %v11737_v24 = vmov 0  ;;  %v3724_v54 = vmul.f32 %v10809_v55, %v10809_v55  ;;  %8488 = vmatprep.subr.bf16.mxu0 %v11722_v44 }
 0x6eb   :  { %v11738_v24 = vsel %vm10821_vm13, 4294967295, %v11737_v24  ;;  %v8589_v39 = vadd.f32 %v8588_v26, %v7911_v50  ;;  %v3619_v27 = vsel %vm10728_vm3, %v10515_v57, 0.0  ;;  %v8489_v53 = vpack.c.bf16 %v10809_v55, %v10816_v47  ;;  %8511 = vmatpush3.bf16.msra.mxu1 %v8510_v21 }
 0x6ec   :  { %v3723_v42 = vmul.f32 %v10816_v47, %v10816_v47  ;;  %v8591_v8 = vadd.f32 %v8590_v52, %v2922_v34  ;;  %v8592_v28 = vadd.f32 %v10560_v35, %v2355_v19  ;;  %v3618_v20 = vsel %vm10745_vm4, %v10519_v58, 0.0  ;;  %8512 = vmatprep.subr.bf16.mxu1 %v11722_v44  ;;  %v7914_v19 = vpop.f32.mrb[12].mxu0 }
 0x6ed   :  { %v11739_v4 = vand.u32 7, %v10644_v9  ;;  %v11740_v18 = vmov 0  ;;  %v10845_v57 = vadd.f32 %v8589_v39, %v3619_v27  ;;  %v8594_v26 = vadd.f32 %v10560_v35, %v2354_v23  ;;  %8490 = vmatpush3.bf16.msra.mxu0 %v8489_v53  ;;  %v2932_v39 = vpop.f32.mrb[13].mxu0 }
 0x6ee   :  { %v2357_v51 = vsel %vm10805_vm9, %v10525_v60, 0.0  ;;  %v10852_v52 = vadd.f32 %v8591_v8, %v3618_v20  ;;  %v8513_v58 = vpack.c.bf16 %v3724_v54, %v3723_v42  ;;  %v2356_v9 = vsel %vm10821_vm13, %v10529_v61, 0.0  ;;  %8491 = vmatprep.subr.bf16.mxu0 %v11722_v44  ;;  %v7917_v20 = vpop.f32.mrb[14].mxu0 }
 0x6ef   :  { %vm10841_vm1 = vcmp.lt.s32.totalorder %v11739_v4, 7  ;;  %v3726_v50 = vmul.f32 %v10845_v57, %v10845_v57  ;;  %v8593_v21 = vadd.f32 %v8592_v28, %v7914_v19  ;;  %v3621_v60 = vsel %vm10771_vm11, %v10523_v22, 0.0  ;;  %v2942_v4 = vpop.f32.mrb[15].mxu0 }
 0x6f0   :  { %v11741_v18 = vsel %vm10841_vm1, 4294967295, %v11740_v18  ;;  %v8492_v23 = vpack.c.bf16 %v10845_v57, %v10852_v52  ;;  %v3725_v54 = vmul.f32 %v10852_v52, %v10852_v52  ;;  %v8595_v34 = vadd.f32 %v8594_v26, %v2932_v39  ;;  %8514 = vmatpush3.bf16.msra.mxu1 %v8513_v58 }
 0x6f1   :  { %11742 = vst [vmem:[#allocation57_spill] sm:$0xff] %v11741_v18  ;;  %v8596_v61 = vadd.f32 %v10560_v35, %v2357_v51  ;;  %v3620_v27 = vsel %vm10841_vm1, %v10527_v56, 0.0  ;;  %vm10873_vm4 = vcmp.lt.s32.totalorder %v425_v14, 7  ;;  %v11743_v53 = vmov 0  ;;  %8515 = vmatprep.subr.bf16.mxu1 %v11722_v44 }
 0x6f2   :  { %v11744_v53 = vsel %vm10873_vm4, 4294967295, %v11743_v53  ;;  %v10877_v22 = vadd.f32 %v8593_v21, %v3621_v60  ;;  %v8598_v42 = vadd.f32 %v10560_v35, %v2356_v9  ;;  %vm10881_vm11 = vcmp.lt.s32.totalorder %v418_v25, 7  ;;  %8493 = vmatpush3.bf16.msra.mxu0 %v8492_v23  ;;  %v3643_v60 = vld [vmem:[#allocation30 + $0x8] sm:$0xff] }
 0x6f3   :  { %11745 = vst [vmem:[#allocation58_spill] sm:$0xff] %v11744_v53  ;;  %v11746_v8 = vmov 0  ;;  %v10885_v28 = vadd.f32 %v8595_v34, %v3620_v27  ;;  %v8516_v56 = vpack.c.bf16 %v3726_v50, %v3725_v54  ;;  %v8597_v14 = vadd.f32 %v8596_v61, %v7917_v20  ;;  %8494 = vmatprep.subr.bf16.mxu0 %v11722_v44  ;;  %v9022_v34 = vld [vmem:[#allocation9] sm:$0x3] }
 0x6f4   :  { %v11747_v8 = vsel %vm10881_vm11, 4294967295, %v11746_v8  ;;  %v3728_v38 = vmul.f32 %v10877_v22, %v10877_v22  ;;  %v3623_v35 = vsel %vm10873_vm4, %v10531_v2, 0.0  ;;  %v8599_v51 = vadd.f32 %v8598_v42, %v2942_v4  ;;  %v9023_v61 = vld [vmem:[#allocation4] sm:$0xff] }
 0x6f5   :  { %11748 = vst [vmem:[#allocation59_spill] sm:$0xff] %v11747_v8  ;;  %v8495_v25 = vpack.c.bf16 %v10877_v22, %v10885_v28  ;;  %v3727_v26 = vmul.f32 %v10885_v28, %v10885_v28  ;;  %8517 = vmatpush3.bf16.msra.mxu1 %v8516_v56  ;;  %v3622_v19 = vsel %vm10881_vm11, %v10533_v31, 0.0  ;;  %v10900_v58 = vadd.f32 %v8597_v14, %v3623_v35  ;;  %v3642_v31 = vld [vmem:[#allocation30] sm:$0xff] }
 0x6f6   :  { %8518 = vmatprep.subr.bf16.mxu1 %v11722_v44  ;;  %v10903_v9 = vadd.f32 %v8599_v51, %v3622_v19  ;;  %v8525_v54 = vpack.c.bf16 %v3643_v60, %v3642_v31  ;;  %vm11749_vm11 = vcmask 64512   ;;  %v11750_v27 = vmov 0.0   ;;  %v9024_v19 = vld [vmem:[#allocation10] sm:$0xff] }
 0x6f7   :  { %8496 = vmatpush3.bf16.msra.mxu0 %v8495_v25  ;;  %v8519_v2 = vpack.c.bf16 %v3728_v38, %v3727_v26  ;;  %v3730_v50 = vmul.f32 %v10900_v58, %v10900_v58  ;;  %vm11751_vm4 = vmmov 0   ;;  %vm11643_vm1 = vcmask 130048   ;;  %v3644_v38 = vld [vmem:[#allocation31] sm:$0xf] }
 0x6f8   :  { %8497 = vmatprep.subr.bf16.mxu0 %v11722_v44  ;;  %v8498_v21 = vpack.c.bf16 %v10900_v58, %v10903_v9  ;;  %v3729_v39 = vmul.f32 %v10903_v9, %v10903_v9  ;;  %4743 = vst.msk [vmem:[#allocation3] sm:$0xff] %vm11643_vm1, %v11750_v27  ;;  %4744 = vst.msk [vmem:[#allocation3 + $0x8] sm:$0xff] %vm11643_vm1, %v11750_v27  ;;  %vm11753_vm3 = vcmask 31744   ;;  %vm11756_vm13 = vcmask 15360  }
 0x6f9   :  { %8520 = vmatpush3.bf16.msra.mxu1 %v8519_v2  ;;  %4745 = vst.msk [vmem:[#allocation3 + $0x60] sm:$0xff] %vm11643_vm1, %v11750_v27  ;;  %4746 = vst.msk [vmem:[#allocation3 + $0x68] sm:$0xff] %vm11643_vm1, %v11750_v27 }
 0x6fa   :  { %8521 = vmatprep.subr.bf16.mxu1 %v11722_v44  ;;  %v8522_v23 = vpack.c.bf16 %v3730_v50, %v3729_v39  ;;  %4747 = vst.msk [vmem:[#allocation3 + $0x50] sm:$0xff] %vm11643_vm1, %v11750_v27  ;;  %4748 = vst.msk [vmem:[#allocation3 + $0x58] sm:$0xff] %vm11643_vm1, %v11750_v27 }
 0x6fb   :  { %8499 = vmatpush3.bf16.msra.mxu0 %v8498_v21  ;;  %4749 = vst.msk [vmem:[#allocation3 + $0xb0] sm:$0xff] %vm11643_vm1, %v11750_v27  ;;  %4750 = vst.msk [vmem:[#allocation3 + $0xb8] sm:$0xff] %vm11643_vm1, %v11750_v27 }
 0x6fd   :  { %8523 = vmatpush3.bf16.msra.mxu1 %v8522_v23 }
 0x6fe   :  { %8029 = vmatmul.mubr.f32.vlgmr.msra.gmra.mrb[50].mxu0 %v9022_v34  ;;  %8524 = vmatprep.subr.bf16.mxu1 %v11722_v44 }
 0x6ff   :  { %8144 = vmatprep.mubr.msk.f32.mxu0 %vm11749_vm11, %v9023_v61  ;;  %vm11752_vm11 = vcmask 1043456  }
 0x700   :  { %8064 = vmatmul.mubr.f32.vlgmr.msra.gmra.mrb[42].mxu1 %v9022_v34  ;;  %vm11754_vm2 = vmmov %vm11752_vm11 }
 0x701   :  { %8526 = vmatpush3.bf16.msra.mxu1 %v8525_v54  ;;  %8070 = vmatprep.mubr.msk.f32.mxu1 %vm11751_vm4, %v11750_v27 }
 0x702   :  { %8527 = vmatprep.subr.bf16.mxu1 %v11722_v44 }
 0x7d1   :  { %v3711_v44 = vpop.f32.mrb[50].mxu0 }
 0x7d2   :  { %v8030_v42 = vpop.f32.mrb[51].mxu0  ;;  %8071 = vmatmul.mubr.msk.f32.vlgmr.msra.gmra.mrb[44].mxu1 %vm11643_vm1, %v3711_v44  ;;  %v6886_v44 = vld [vmem:[#allocation22] ss:$0 sm:$0xff] }
 0x7d3   :  { %8529 = vmatpush3.bf16.msra.mxu1 %v8525_v54  ;;  %v3797_v20 = vpop.f32.mrb[42].mxu1  ;;  %8077 = vmatprep.mubr.msk.f32.mxu1 %vm11751_vm4, %v11750_v27  ;;  %v6885_v54 = vld [vmem:[#allocation21] ss:$0 sm:$0xff]  ;;  %v9025_v42 = vld [vmem:[#allocation10 + $0x8] sm:$0xff] }
 0x7d4   :  { %v8065_v56 = vpop.f32.mrb[43].mxu1  ;;  %8080 = vmatprep.subr.mxu1 %v11750_v27 }
 0x7d5   :  { %v9026_v56 = vld [vmem:[#allocation10 + $0x10] sm:$0xff] }
 0x7d6   :  { %8078 = vmatmul.mubr.msk.f32.vlgmr.msra.gmra.mrb[46].mxu1 %vm11643_vm1, %v3797_v20  ;;  %vm11755_vm1 = vmmov %vm11753_vm3 }
 0x7d7   :  { %8082 = vmatprep.mubr.msk.f32.mxu1 %vm11751_vm4, %v11750_v27  ;;  %8081 = vmatpush3.msk.msra.mxu1 %vm11752_vm11, %v3644_v38 }
 0x7d8   :  { %8085 = vmatprep.subr.mxu1 %v11750_v27 }
 0x8a5   :  { %v3871_v14 = vpop.f32.mrb[44].mxu1 }
 0x8a6   :  { %v3875_v4 = vmul.f32 0.00390625, %v3871_v14  ;;  %v8072_v35 = vpop.f32.mrb[45].mxu1  ;;  %v9028_v14 = vld [vmem:[#allocation10 + $0x20] sm:$0xff] }
 0x8a7   :  { %v9030_v35 = vld [vmem:[#allocation10 + $0x30] sm:$0xff] }
 0x8a8   :  { %8083 = vmatmul.mubr.msk.f32.vlgmr.msra.gmra.mrb[48].mxu1 %vm11753_vm3, %v3875_v4  ;;  %v9029_v4 = vld [vmem:[#allocation10 + $0x28] sm:$0xff] }
 0x8a9   :  { %v3945_v25 = vpop.f32.mrb[46].mxu1  ;;  %8086 = vmatpush3.msk.msra.mxu1 %vm11754_vm2, %v3644_v38  ;;  %8087 = vmatprep.mubr.msk.f32.mxu1 %vm11751_vm4, %v11750_v27  ;;  %vm11757_vm2 = vcmask 1041408   ;;  %vm11759_vm4 = vmmov %vm11756_vm13  ;;  %v9027_v38 = vld [vmem:[#allocation10 + $0x18] sm:$0xff] }
 0x8aa   :  { %v3949_v26 = vmul.f32 0.00390625, %v3945_v25  ;;  %v8079_v51 = vpop.f32.mrb[47].mxu1  ;;  %vm11758_vm3 = vmmov %vm11757_vm2  ;;  %v9031_v25 = vld [vmem:[#allocation10 + $0x38] sm:$0xff] }
 0x8ab   :  { %vm11763_vm9 = vmmov %vm11759_vm4  ;;  %v9033_v51 = vld [vmem:[#allocation10 + $0x48] sm:$0xff] }
 0x8ac   :  { %8088 = vmatmul.mubr.msk.f32.vlgmr.msra.gmra.mrb[50].mxu1 %vm11755_vm1, %v3949_v26  ;;  %vm11761_vm1 = vmmov %vm11757_vm2  ;;  %v9032_v26 = vld [vmem:[#allocation10 + $0x40] sm:$0xff] }
 0x8ad   :  { %8092 = vmatprep.mubr.msk.f32.mxu1 %vm11756_vm13, %v9024_v19  ;;  %vm11760_vm13 = vmmov %vm11759_vm4 }
 0x8ae   :  { %vm11762_vm11 = vmmov %vm11761_vm1 }
 0x8af   :  { %vm11764_vm6 = vmmov %vm11759_vm4 }
 0x97b   :  { %v4022_v2 = vpop.f32.mrb[48].mxu1 }
 0x97c   :  { %v8084_v50 = vpop.f32.mrb[49].mxu1  ;;  %v4099_v21 = vmul.f32 %v4022_v2, %v4022_v2 }
 0x97d   :  { %v9035_v50 = vld [vmem:[#allocation10 + $0x58] sm:$0xff] }
 0x97f   :  { %v4095_v39 = vpop.f32.mrb[50].mxu1 }
 0x980   :  { %v4100_v31 = vsub.f32 %v4095_v39, %v4099_v21  ;;  %v8089_v60 = vpop.f32.mrb[51].mxu1  ;;  %v9036_v21 = vld [vmem:[#allocation10 + $0x60] sm:$0xff]  ;;  %v9037_v39 = vld [vmem:[#allocation10 + $0x68] sm:$0xff] }
 0x981   :  { %v9039_v60 = vld [vmem:[#allocation10 + $0x78] sm:$0xff] }
 0x982   :  { %v4101_v23 = vadd.f32 1e-05, %v4100_v31  ;;  %v9038_v31 = vld [vmem:[#allocation10 + $0x70] sm:$0xff] }
 0x984   :  { %8956 = vrsqrt.f32 %v4101_v23  ;;  %v9040_v23 = vld [vmem:[#allocation4 + $0x8] sm:$0xff] }
 0x98e   :  { %v8957_v34 = vpop.eup %8956 }
 0x98f   :  { %v4109_v61 = vmul.f32 %v8957_v34, %v6885_v54  ;;  %v9041_v54 = vld [vmem:[#allocation4 + $0x10] sm:$0xff]  ;;  %v9042_v34 = vld [vmem:[#allocation4 + $0x18] sm:$0xff] }
 0x991   :  { %8090 = vmatprep.subr.msk.mxu1 %vm11757_vm2, %v4109_v61  ;;  %v4110_v27 = vmul.f32 %v4109_v61, %v4022_v2  ;;  %vm11765_vm2 = vmmov %vm11759_vm4  ;;  %v9034_v2 = vld [vmem:[#allocation10 + $0x50] sm:$0xff] }
 0x992   :  { %8091 = vmatpush3.msk.msra.mxu1 %vm11758_vm3, %v4109_v61  ;;  %vm11766_vm3 = vmmov %vm11765_vm2  ;;  %v9043_v61 = vld [vmem:[#allocation4 + $0x20] sm:$0xff] }
 0x993   :  { %8093 = vmatmul.mubr.msk.f32.vlgmr.msra.gmra.mrb[52].mxu1 %vm11759_vm4, %v9025_v42  ;;  %v4117_v20 = vsub.f32 %v6886_v44, %v4110_v27  ;;  %vm11767_vm4 = vmmov %vm11765_vm2  ;;  %v9044_v44 = vld [vmem:[#allocation4 + $0x28] sm:$0xff]  ;;  %v9045_v27 = vld [vmem:[#allocation4 + $0x30] sm:$0xff] }
 0x994   :  { %8095 = vmatprep.mubr.msk.f32.mxu1 %vm11760_vm13, %v9026_v56  ;;  %vm11768_vm13 = vmmov %vm11765_vm2 }
 0x995   :  { %8116 = vmatprep.subr.msk.mxu1 %vm11761_vm1, %v4117_v20  ;;  %vm11769_vm1 = vmmov %vm11765_vm2 }
 0x996   :  { %8117 = vmatpush3.msk.msra.mxu1 %vm11762_vm11, %v4117_v20  ;;  %vm11772_vm11 = vmmov %vm11769_vm1  ;;  %v9047_v20 = vld [vmem:[#allocation4 + $0x40] sm:$0xff] }
 0x997   :  { %8096 = vmatmul.mubr.msk.f32.gmra.mrb[54].mxu1 %vm11763_vm9, %v9027_v38  ;;  %vm11770_vm9 = vmmov %vm11769_vm1 }
 0x998   :  { %8098 = vmatprep.mubr.msk.f32.mxu1 %vm11764_vm6, %v9028_v14  ;;  %vm11771_vm6 = vmmov %vm11769_vm1 }
 0x999   :  { %vm11778_vm15 = vmmov %vm11769_vm1 }
 0x99a   :  { %vm11781_vm14 = vmmov %vm11769_vm1 }
 0x99b   :  { %8099 = vmatmul.mubr.msk.f32.gmra.mrb[56].mxu1 %vm11765_vm2, %v9029_v4  ;;  %vm11773_vm2 = vmmov %vm11769_vm1 }
 0x99c   :  { %8101 = vmatprep.mubr.msk.f32.mxu1 %vm11766_vm3, %v9030_v35  ;;  %vm11774_vm3 = vmmov %vm11769_vm1 }
 0x99d   :  { %vm11784_vm12 = vmmov %vm11769_vm1 }
 0x99f   :  { %8102 = vmatmul.mubr.msk.f32.gmra.mrb[58].mxu1 %vm11767_vm4, %v9031_v25  ;;  %vm11775_vm4 = vmmov %vm11769_vm1 }
 0x9a0   :  { %8104 = vmatprep.mubr.msk.f32.mxu1 %vm11768_vm13, %v9032_v26  ;;  %vm11776_vm13 = vmmov %vm11769_vm1 }
 0x9a3   :  { %8105 = vmatmul.mubr.msk.f32.gmra.mrb[60].mxu1 %vm11769_vm1, %v9033_v51 }
 0x9a4   :  { %8107 = vmatprep.mubr.msk.f32.mxu1 %vm11770_vm9, %v9034_v2  ;;  %vm11777_vm9 = vmmov %vm11769_vm1 }
 0x9a7   :  { %8108 = vmatmul.mubr.msk.f32.gmra.mrb[62].mxu1 %vm11771_vm6, %v9035_v50  ;;  %vm11779_vm6 = vmmov %vm11769_vm1 }
 0x9a8   :  { %8110 = vmatprep.mubr.msk.f32.mxu1 %vm11772_vm11, %v9036_v21  ;;  %vm11780_vm11 = vmmov %vm11769_vm1 }
 0x9ab   :  { %8111 = vmatmul.mubr.msk.f32.gmra.mrb[64].mxu1 %vm11773_vm2, %v9037_v39  ;;  %vm11782_vm2 = vmmov %vm11769_vm1 }
 0x9ac   :  { %8113 = vmatprep.mubr.msk.f32.mxu1 %vm11774_vm3, %v9038_v31  ;;  %vm11783_vm3 = vmmov %vm11769_vm1 }
 0x9af   :  { %8114 = vmatmul.mubr.msk.f32.gmra.mrb[66].mxu1 %vm11775_vm4, %v9039_v60  ;;  %vm11785_vm4 = vmmov %vm11769_vm1 }
 0x9b0   :  { %8118 = vmatprep.mubr.msk.f32.mxu1 %vm11776_vm13, %v9024_v19  ;;  %vm11786_vm13 = vmmov %vm11769_vm1  ;;  %v4542_v19 = vld [vmem:[#allocation12] sm:$0xff] }
 0x9b1   :  { %8142 = vmatprep.subr.mxu0 %v4542_v19 }
 0x9b2   :  { %8143 = vmatpush3.msra.mxu0 %v4542_v19  ;;  %v4784_v19 = vld [vmem:[#allocation25 + $0x8] sm:$0xff] }
 0x9b3   :  { %8119 = vmatmul.mubr.msk.f32.vlgmr.msra.gmra.mrb[68].mxu1 %vm11769_vm1, %v9025_v42  ;;  %v9046_v42 = vld [vmem:[#allocation4 + $0x38] sm:$0xff] }
 0x9b4   :  { %8121 = vmatprep.mubr.msk.f32.mxu1 %vm11777_vm9, %v9026_v56  ;;  %vm11787_vm9 = vmmov %vm11769_vm1  ;;  %v9048_v56 = vld [vmem:[#allocation4 + $0x48] sm:$0xff] }
 0x9b7   :  { %8122 = vmatmul.mubr.msk.f32.gmra.mrb[70].mxu1 %vm11778_vm15, %v9027_v38  ;;  %vm11788_vm15 = vmmov %vm11769_vm1  ;;  %v9049_v38 = vld [vmem:[#allocation4 + $0x50] sm:$0xff] }
 0x9b8   :  { %8124 = vmatprep.mubr.msk.f32.mxu1 %vm11779_vm6, %v9028_v14  ;;  %vm11789_vm6 = vmmov %vm11769_vm1  ;;  %v9050_v14 = vld [vmem:[#allocation4 + $0x58] sm:$0xff] }
 0x9bb   :  { %8125 = vmatmul.mubr.msk.f32.gmra.mrb[72].mxu1 %vm11780_vm11, %v9029_v4  ;;  %v9051_v4 = vld [vmem:[#allocation4 + $0x60] sm:$0xff] }
 0x9bc   :  { %8127 = vmatprep.mubr.msk.f32.mxu1 %vm11781_vm14, %v9030_v35  ;;  %vm11790_vm14 = vcmask 64512   ;;  %v9052_v35 = vld [vmem:[#allocation4 + $0x68] sm:$0xff] }
 0x9bd   :  { %8145 = vmatmul.mubr.msk.f32.vlgmr.msra.gmra.mrb[52].mxu0 %vm11790_vm14, %v9040_v23 }
 0x9bf   :  { %8128 = vmatmul.mubr.msk.f32.gmra.mrb[74].mxu1 %vm11782_vm2, %v9031_v25  ;;  %v9053_v25 = vld [vmem:[#allocation4 + $0x70] sm:$0xff] }
 0x9c0   :  { %8130 = vmatprep.mubr.msk.f32.mxu1 %vm11783_vm3, %v9032_v26  ;;  %v4788_v26 = vld [vmem:[#allocation25 + $0x30] sm:$0xff] }
 0x9c3   :  { %8131 = vmatmul.mubr.msk.f32.gmra.mrb[76].mxu1 %vm11784_vm12, %v9033_v51  ;;  %vm11791_vm12 = vmmov %vm11790_vm14  ;;  %v4789_v51 = vld [vmem:[#allocation25 + $0x38] sm:$0xff] }
 0x9c4   :  { %8133 = vmatprep.mubr.msk.f32.mxu1 %vm11785_vm4, %v9034_v2  ;;  %8147 = vmatprep.mubr.msk.f32.mxu0 %vm11791_vm12, %v9041_v54  ;;  %vm11792_vm11 = vmmov %vm11791_vm12  ;;  %v5416_v2 = vld [vmem:[#allocation25 + $0x40] sm:$0xff]  ;;  %v5411_v54 = vld [vmem:[#allocation25 + $0x10] sm:$0xff] }
 0x9c5   :  { %8148 = vmatmul.mubr.msk.f32.gmra.mrb[54].mxu0 %vm11792_vm11, %v9042_v34  ;;  %vm11793_vm2 = vmmov %vm11792_vm11  ;;  %v5412_v34 = vld [vmem:[#allocation25 + $0x18] sm:$0xff] }
 0x9c6   :  { %8150 = vmatprep.mubr.msk.f32.mxu0 %vm11793_vm2, %v9043_v61  ;;  %vm11794_vm3 = vmmov %vm11793_vm2  ;;  %v11002_v61 = vpack.c.bf16 %v5412_v34, %v5411_v54 }
 0x9c7   :  { %8134 = vmatmul.mubr.msk.f32.gmra.mrb[78].mxu1 %vm11786_vm13, %v9035_v50  ;;  %vm11795_vm4 = vmmov %vm11793_vm2  ;;  %v8530_v50 = vpack.c.bf16 %v4789_v51, %v4788_v26 }
 0x9c8   :  { %8136 = vmatprep.mubr.msk.f32.mxu1 %vm11769_vm1, %v9036_v21  ;;  %vm11796_vm13 = vmmov %vm11793_vm2  ;;  %v5417_v21 = vld [vmem:[#allocation25 + $0x48] sm:$0xff] }
 0x9c9   :  { %8151 = vmatmul.mubr.msk.f32.gmra.mrb[56].mxu0 %vm11794_vm3, %v9044_v44  ;;  %vm11797_vm1 = vmmov %vm11793_vm2  ;;  %8531 = vmatprep.subr.bf16.mxu1 %v8530_v50  ;;  %vm11805_vm3 = vcmask 130048  }
 0x9ca   :  { %8153 = vmatprep.mubr.msk.f32.mxu0 %vm11795_vm4, %v9045_v27  ;;  %vm11801_vm14 = vmmov %vm11797_vm1  ;;  %8533 = vmatpush3.bf16.msra.mxu1 %v8530_v50 }
 0x9cb   :  { %8137 = vmatmul.mubr.msk.f32.gmra.mrb[80].mxu1 %vm11787_vm9, %v9037_v39  ;;  %vm11798_vm9 = vmmov %vm11797_vm1  ;;  %v9054_v39 = vld [vmem:[#allocation4 + $0x78] sm:$0xff] }
 0x9cc   :  { %8139 = vmatprep.mubr.msk.f32.mxu1 %vm11788_vm15, %v9038_v31  ;;  %vm11799_vm15 = vmmov %vm11797_vm1  ;;  %v8542_v31 = vpack.c.bf16 %v5417_v21, %v5416_v2 }
 0x9cd   :  { %8154 = vmatmul.mubr.msk.f32.gmra.mrb[58].mxu0 %vm11796_vm13, %v9046_v42  ;;  %vm11802_vm12 = vmmov %vm11797_vm1 }
 0x9ce   :  { %8156 = vmatprep.mubr.msk.f32.mxu0 %vm11797_vm1, %v9047_v20  ;;  %vm11803_vm11 = vmmov %vm11797_vm1  ;;  %8543 = vmatprep.subr.bf16.mxu0 %v8542_v31 }
 0x9cf   :  { %8140 = vmatmul.mubr.msk.f32.gmra.mrb[82].mxu1 %vm11789_vm6, %v9039_v60  ;;  %vm11800_vm6 = vmmov %vm11797_vm1  ;;  %8545 = vmatpush3.bf16.msra.mxu0 %v8542_v31  ;;  %v4783_v60 = vld [vmem:[#allocation25] sm:$0xff] }
 0x9d0   :  { %vm11804_vm2 = vmmov %vm11797_vm1  ;;  %v10999_v23 = vpack.c.bf16 %v4784_v19, %v4783_v60  ;;  %8547 = vmatprep.subr.bf16.mxu0 %v11002_v61 }
 0x9d1   :  { %8157 = vmatmul.mubr.msk.f32.gmra.mrb[60].mxu0 %vm11798_vm9, %v9048_v56  ;;  %vm11806_vm4 = vmmov %vm11805_vm3 }
 0x9d2   :  { %8159 = vmatprep.mubr.msk.f32.mxu0 %vm11799_vm15, %v9049_v38  ;;  %8535 = vmatprep.subr.bf16.mxu1 %v10999_v23  ;;  %vm11807_vm13 = vmmov %vm11805_vm3 }
 0x9d3   :  { %vm11808_vm1 = vmmov %vm11805_vm3 }
 0x9d4   :  { %vm11809_vm9 = vmmov %vm11808_vm1 }
 0x9d5   :  { %8160 = vmatmul.mubr.msk.f32.gmra.mrb[62].mxu0 %vm11800_vm6, %v9050_v14  ;;  %vm11810_vm15 = vmmov %vm11808_vm1 }
 0x9d6   :  { %8162 = vmatprep.mubr.msk.f32.mxu0 %vm11801_vm14, %v9051_v4  ;;  %vm11811_vm6 = vmmov %vm11808_vm1 }
 0x9d7   :  { %vm11812_vm14 = vmmov %vm11808_vm1 }
 0x9d9   :  { %8163 = vmatmul.mubr.msk.f32.gmra.mrb[64].mxu0 %vm11802_vm12, %v9052_v35  ;;  %vm11813_vm12 = vmmov %vm11808_vm1 }
 0x9da   :  { %8165 = vmatprep.mubr.msk.f32.mxu0 %vm11803_vm11, %v9053_v25  ;;  %vm11814_vm11 = vmmov %vm11808_vm1 }
 0x9dd   :  { %8166 = vmatmul.mubr.msk.f32.gmra.mrb[66].mxu0 %vm11804_vm2, %v9054_v39  ;;  %vm11815_vm2 = vmmov %vm11808_vm1 }
 0xa66   :  { %v8094_v44 = vpop.f32.mrb[52].mxu1 }
 0xa67   :  { %v4187_v27 = vpop.f32.mrb[53].mxu1  ;;  %v4415_v31 = vmul.f32 %v8094_v44, %v10646_v37 }
 0xa68   :  { %v4414_v60 = vmul.f32 %v4187_v27, %v10660_v17 }
 0xa6a   :  { %v8097_v42 = vpop.f32.mrb[54].mxu1 }
 0xa6b   :  { %v4197_v20 = vpop.f32.mrb[55].mxu1  ;;  %v4417_v53 = vmul.f32 %v8097_v42, %v10692_v12 }
 0xa6c   :  { %v4416_v29 = vmul.f32 %v4197_v20, %v10702_v49 }
 0xa6e   :  { %v8100_v56 = vpop.f32.mrb[56].mxu1 }
 0xa6f   :  { %v4207_v38 = vpop.f32.mrb[57].mxu1  ;;  %v4419_v27 = vmul.f32 %v8100_v56, %v10738_v48 }
 0xa70   :  { %v4418_v12 = vmul.f32 %v4207_v38, %v10749_v10 }
 0xa72   :  { %v8103_v14 = vpop.f32.mrb[58].mxu1 }
 0xa73   :  { %v4217_v4 = vpop.f32.mrb[59].mxu1 }
 0xa76   :  { %v8106_v35 = vpop.f32.mrb[60].mxu1 }
 0xa77   :  { %v4227_v25 = vpop.f32.mrb[61].mxu1 }
 0xa7a   :  { %v8109_v26 = vpop.f32.mrb[62].mxu1 }
 0xa7b   :  { %v11005_v51 = vpop.f32.mrb[63].mxu1 }
 0xa7e   :  { %v11007_v2 = vpop.f32.mrb[64].mxu1 }
 0xa7f   :  { %v11009_v50 = vpop.f32.mrb[65].mxu1 }
 0xa82   :  { %v11011_v21 = vpop.f32.mrb[66].mxu1 }
 0xa83   :  { %v11013_v39 = vpop.f32.mrb[67].mxu1 }
 0xa86   :  { %v8120_v19 = vpop.f32.mrb[68].mxu1 }
 0xa87   :  { %v11017_v54 = vadd.f32 %v8120_v19, %v4415_v31  ;;  %v4335_v34 = vpop.f32.mrb[69].mxu1 }
 0xa88   :  { %v11019_v8 = vadd.f32 %v4414_v60, %v4335_v34 }
 0xa89   :  { %v4447_v18 = vsub.f32 0.0, %v11017_v54 }
 0xa8a   :  { %v4446_v36 = vsub.f32 0.0, %v11019_v8  ;;  %v8123_v59 = vpop.f32.mrb[70].mxu1 }
 0xa8b   :  { %v4464_v3 = vmul.f32 1.442695, %v4447_v18  ;;  %v11025_v6 = vadd.f32 %v8123_v59, %v4417_v53  ;;  %v4345_v37 = vpop.f32.mrb[71].mxu1 }
 0xa8c   :  { %v4462_v17 = vmul.f32 1.442695, %v4446_v36  ;;  %v11027_v44 = vadd.f32 %v4416_v29, %v4345_v37  ;;  %v4421_v36 = vmul.f32 %v8103_v14, %v10776_v63  ;;  %v4422_v14 = vmul.f32 %v4227_v25, %v10816_v47 }
 0xa8d   :  { %8958 = vpow2.f32 %v4464_v3  ;;  %v4449_v31 = vsub.f32 0.0, %v11025_v6  ;;  %v4420_v3 = vmul.f32 %v4217_v4, %v10783_v33  ;;  %v4424_v25 = vmul.f32 %v11005_v51, %v10852_v52 }
 0xa8e   :  { %8960 = vpow2.f32 %v4462_v17  ;;  %v4448_v49 = vsub.f32 0.0, %v11027_v44  ;;  %v8126_v42 = vpop.f32.mrb[72].mxu1  ;;  %v4423_v17 = vmul.f32 %v8106_v35, %v10809_v55  ;;  %v4425_v55 = vmul.f32 %v8109_v26, %v10845_v57 }
 0xa8f   :  { %v4468_v20 = vmul.f32 1.442695, %v4449_v31  ;;  %v11033_v60 = vadd.f32 %v8126_v42, %v4419_v27  ;;  %v4355_v59 = vpop.f32.mrb[73].mxu1 }
 0xa90   :  { %v4466_v18 = vmul.f32 1.442695, %v4448_v49  ;;  %v11035_v53 = vadd.f32 %v4418_v12, %v4355_v59 }
 0xa91   :  { %8962 = vpow2.f32 %v4468_v20  ;;  %v4451_v48 = vsub.f32 0.0, %v11033_v60 }
 0xa92   :  { %8964 = vpow2.f32 %v4466_v18  ;;  %v4450_v10 = vsub.f32 0.0, %v11035_v53  ;;  %v8129_v29 = vpop.f32.mrb[74].mxu1 }
 0xa93   :  { %v4472_v56 = vmul.f32 1.442695, %v4451_v48  ;;  %v11041_v38 = vadd.f32 %v8129_v29, %v4421_v36  ;;  %v4365_v19 = vpop.f32.mrb[75].mxu1 }
 0xa94   :  { %v4470_v34 = vmul.f32 1.442695, %v4450_v10  ;;  %v11043_v37 = vadd.f32 %v4420_v3, %v4365_v19 }
 0xa95   :  { %8966 = vpow2.f32 %v4472_v56  ;;  %v4453_v63 = vsub.f32 0.0, %v11041_v38 }
 0xa96   :  { %8968 = vpow2.f32 %v4470_v34  ;;  %v4452_v33 = vsub.f32 0.0, %v11043_v37  ;;  %v8132_v4 = vpop.f32.mrb[76].mxu1 }
 0xa97   :  { %v8959_v27 = vpop.eup %8958  ;;  %v4476_v31 = vmul.f32 1.442695, %v4453_v63  ;;  %v11049_v12 = vadd.f32 %v8132_v4, %v4423_v17  ;;  %v4375_v49 = vpop.f32.mrb[77].mxu1  ;;  %v4427_v17 = vmul.f32 %v11007_v2, %v10877_v22  ;;  %v4426_v63 = vmul.f32 %v11009_v50, %v10885_v28 }
 0xa98   :  { %v8961_v42 = vpop.eup %8960  ;;  %v4495_v20 = vadd.f32 1.0, %v8959_v27  ;;  %v4474_v59 = vmul.f32 1.442695, %v4452_v33  ;;  %v11051_v18 = vadd.f32 %v4422_v14, %v4375_v49 }
 0xa99   :  { %v4494_v35 = vadd.f32 1.0, %v8961_v42  ;;  %8970 = vpow2.f32 %v4476_v31  ;;  %v4455_v47 = vsub.f32 0.0, %v11049_v12 }
 0xa9a   :  { %8972 = vrcp.f32 %v4495_v20  ;;  %v4454_v36 = vsub.f32 0.0, %v11051_v18  ;;  %v8135_v48 = vpop.f32.mrb[78].mxu1 }
 0xa9b   :  { %v8963_v3 = vpop.eup %8962  ;;  %8974 = vrcp.f32 %v4494_v35  ;;  %v4480_v10 = vmul.f32 1.442695, %v4455_v47  ;;  %v11058_v29 = vadd.f32 %v8135_v48, %v4425_v55  ;;  %v4385_v56 = vpop.f32.mrb[79].mxu1  ;;  %v4428_v55 = vmul.f32 %v11013_v39, %v10903_v9 }
 0xa9c   :  { %v8965_v19 = vpop.eup %8964  ;;  %v4497_v34 = vadd.f32 1.0, %v8963_v3  ;;  %8976 = vpow2.f32 %v4474_v59  ;;  %v4478_v57 = vmul.f32 1.442695, %v4454_v36  ;;  %v11060_v26 = vadd.f32 %v4424_v25, %v4385_v56 }
 0xa9d   :  { %v4496_v52 = vadd.f32 1.0, %v8965_v19  ;;  %8978 = vpow2.f32 %v4480_v10  ;;  %v4457_v51 = vsub.f32 0.0, %v11058_v29  ;;  %v4429_v59 = vmul.f32 %v11011_v21, %v10900_v58 }
 0xa9e   :  { %8980 = vrcp.f32 %v4497_v34  ;;  %v4456_v14 = vsub.f32 0.0, %v11060_v26  ;;  %v8138_v33 = vpop.f32.mrb[80].mxu1 }
 0xa9f   :  { %v8967_v4 = vpop.eup %8966  ;;  %8982 = vrcp.f32 %v4496_v52  ;;  %v4484_v27 = vmul.f32 1.442695, %v4457_v51  ;;  %v11068_v31 = vadd.f32 %v8138_v33, %v4427_v17  ;;  %v4395_v49 = vpop.f32.mrb[81].mxu1 }
 0xaa0   :  { %v8969_v42 = vpop.eup %8968  ;;  %v4499_v20 = vadd.f32 1.0, %v8967_v4  ;;  %8984 = vpow2.f32 %v4478_v57  ;;  %v4482_v22 = vmul.f32 1.442695, %v4456_v14  ;;  %v11070_v2 = vadd.f32 %v4426_v63, %v4395_v49 }
 0xaa1   :  { %v4498_v28 = vadd.f32 1.0, %v8969_v42  ;;  %8986 = vpow2.f32 %v4484_v27  ;;  %v4459_v50 = vsub.f32 0.0, %v11068_v31 }
 0xaa2   :  { %8988 = vrcp.f32 %v4499_v20  ;;  %v4458_v35 = vsub.f32 0.0, %v11070_v2  ;;  %v8141_v47 = vpop.f32.mrb[82].mxu1 }
 0xaa3   :  { %v8971_v25 = vpop.eup %8970  ;;  %8990 = vrcp.f32 %v4498_v28  ;;  %v4488_v36 = vmul.f32 1.442695, %v4459_v50  ;;  %v11078_v48 = vadd.f32 %v8141_v47, %v4429_v59  ;;  %v4405_v3 = vpop.f32.mrb[83].mxu1  ;;  %v5152_v50 = vld [vmem:[#allocation25 + $0x68] sm:$0xff] }
 0xaa4   :  { %v8973_v10 = vpop.eup %8972  ;;  %v4501_v56 = vadd.f32 1.0, %v8971_v25  ;;  %8992 = vpow2.f32 %v4482_v22  ;;  %v4486_v58 = vmul.f32 1.442695, %v4458_v35  ;;  %v11080_v21 = vadd.f32 %v4428_v55, %v4405_v3  ;;  %v5151_v22 = vld [vmem:[#allocation25 + $0x60] sm:$0xff]  ;;  %v5779_v55 = vld [vmem:[#allocation25 + $0x70] sm:$0xff]  ;;  %v5780_v35 = vld [vmem:[#allocation25 + $0x78] sm:$0xff] }
 0xaa5   :  { %v8975_v19 = vpop.eup %8974  ;;  %v4527_v34 = vmul.f32 %v8973_v10, %v11017_v54  ;;  %8994 = vpow2.f32 %v4488_v36  ;;  %v4461_v9 = vsub.f32 0.0, %v11078_v48 }
 0xaa6   :  { %v8977_v39 = vpop.eup %8976  ;;  %v4526_v57 = vmul.f32 %v8975_v19, %v11019_v8  ;;  %8996 = vrcp.f32 %v4501_v56  ;;  %v4460_v17 = vsub.f32 0.0, %v11080_v21  ;;  %v11101_v19 = vpack.c.bf16 %v5152_v50, %v5151_v22 }
 0xaa7   :  { %v8979_v52 = vpop.eup %8978  ;;  %4752 = vst.msk [vmem:[#allocation3 + $0x18] sm:$0xff] %vm11805_vm3, %v4527_v34  ;;  %v4500_v51 = vadd.f32 1.0, %v8977_v39  ;;  %8998 = vpow2.f32 %v4486_v58  ;;  %v4492_v63 = vmul.f32 1.442695, %v4461_v9  ;;  %v11103_v34 = vpack.c.bf16 %v5780_v35, %v5779_v55  ;;  %vm11816_vm3 = vmmov %vm11808_vm1 }
 0xaa8   :  { %v8981_v14 = vpop.eup %8980  ;;  %4751 = vst.msk [vmem:[#allocation3 + $0x10] sm:$0xff] %vm11806_vm4, %v4526_v57  ;;  %v4503_v33 = vadd.f32 1.0, %v8979_v52  ;;  %v4490_v54 = vmul.f32 1.442695, %v4460_v17  ;;  %vm11817_vm4 = vmmov %vm11808_vm1 }
 0xaa9   :  { %v8983_v4 = vpop.eup %8982  ;;  %v4529_v27 = vmul.f32 %v8981_v14, %v11025_v6  ;;  %9000 = vrcp.f32 %v4500_v51 }
 0xaaa   :  { %v8985_v49 = vpop.eup %8984  ;;  %v4528_v8 = vmul.f32 %v8983_v4, %v11027_v44  ;;  %9002 = vrcp.f32 %v4503_v33 }
 0xaab   :  { %v8987_v42 = vpop.eup %8986  ;;  %4754 = vst.msk [vmem:[#allocation3 + $0x28] sm:$0xff] %vm11807_vm13, %v4529_v27  ;;  %v4502_v20 = vadd.f32 1.0, %v8985_v49  ;;  %9004 = vpow2.f32 %v4492_v63  ;;  %vm11818_vm13 = vmmov %vm11808_vm1 }
 0xaac   :  { %v8989_v59 = vpop.eup %8988  ;;  %4753 = vst.msk [vmem:[#allocation3 + $0x20] sm:$0xff] %vm11808_vm1, %v4528_v8  ;;  %v4505_v28 = vadd.f32 1.0, %v8987_v42  ;;  %9006 = vpow2.f32 %v4490_v54 }
 0xaad   :  { %v8991_v6 = vpop.eup %8990  ;;  %v4531_v47 = vmul.f32 %v8989_v59, %v11033_v60  ;;  %9008 = vrcp.f32 %v4502_v20 }
 0xaae   :  { %v8993_v44 = vpop.eup %8992  ;;  %v4530_v25 = vmul.f32 %v8991_v6, %v11035_v53  ;;  %9010 = vrcp.f32 %v4505_v28  ;;  %v11110_v53 = vld [vmem:[#allocation3 + $0x18] sm:$0xff] }
 0xaaf   :  { %v8995_v36 = vpop.eup %8994  ;;  %4756 = vst.msk [vmem:[#allocation3 + $0x38] sm:$0xff] %vm11809_vm9, %v4531_v47  ;;  %v4504_v3 = vadd.f32 1.0, %v8993_v44  ;;  %v11095_v10 = vld [vmem:[#allocation3 + $0xf] sm:$0xff]  ;;  %v11099_v58 = vld [vmem:[#allocation3 + $0x17] sm:$0xff]  ;;  %vm11819_vm9 = vmmov %vm11808_vm1 }
 0xab0   :  { %v11097_v56 = vld [vmem:[#allocation3 + $0x10] sm:$0xff]  ;;  %v8997_v60 = vpop.eup %8996  ;;  %4755 = vst.msk [vmem:[#allocation3 + $0x30] sm:$0xff] %vm11810_vm15, %v4530_v25  ;;  %v4507_v9 = vadd.f32 1.0, %v8995_v36  ;;  %8172 = vmatprep.mubr.msk.f32.mxu1 %vm11811_vm6, %v11095_v10  ;;  %vm11820_vm15 = vmmov %vm11808_vm1 }
 0xab1   :  { %8256 = vmatprep.mubr.msk.f32.mxu0 %vm11812_vm14, %v11097_v56  ;;  %v8999_v39 = vpop.eup %8998  ;;  %v4533_v57 = vmul.f32 %v8997_v60, %v11041_v38  ;;  %9012 = vrcp.f32 %v4504_v3  ;;  %8173 = vmatmul.mubr.msk.f32.vlgmr.msra.gmra.mrb[84].mxu1 %vm11813_vm12, %v11099_v58  ;;  %vm11821_vm6 = vmmov %vm11808_vm1 }
 0xab2   :  { %8257 = vmatmul.mubr.msk.f32.vlgmr.msra.gmra.mrb[52].mxu0 %vm11814_vm11, %v11110_v53  ;;  %9014 = vrcp.f32 %v4507_v9  ;;  %v4506_v17 = vadd.f32 1.0, %v8999_v39  ;;  %8537 = vmatpush3.bf16.msra.mxu1 %v10999_v23  ;;  %v11133_v23 = vld [vmem:[#allocation3 + $0x28] sm:$0xff]  ;;  %vm11822_vm14 = vmmov %vm11808_vm1 }
 0xab3   :  { %8549 = vmatpush3.bf16.msra.mxu0 %v11002_v61  ;;  %v9001_v52 = vpop.eup %9000  ;;  %4758 = vst.msk [vmem:[#allocation3 + $0x48] sm:$0xff] %vm11815_vm2, %v4533_v57  ;;  %v11120_v51 = vld [vmem:[#allocation3 + $0x1f] sm:$0xff]  ;;  %v11124_v38 = vld [vmem:[#allocation3 + $0x27] sm:$0xff]  ;;  %8539 = vmatprep.subr.bf16.mxu1 %v11101_v19  ;;  %vm11823_vm12 = vmmov %vm11808_vm1 }
 0xab4   :  { %v11122_v63 = vld [vmem:[#allocation3 + $0x20] sm:$0xff]  ;;  %8551 = vmatprep.subr.bf16.mxu0 %v11103_v34  ;;  %v9003_v14 = vpop.eup %9002  ;;  %v4532_v33 = vmul.f32 %v9001_v52, %v11043_v37  ;;  %9016 = vrcp.f32 %v4506_v17  ;;  %8175 = vmatprep.mubr.msk.f32.mxu1 %vm11816_vm3, %v11120_v51  ;;  %vm11824_vm11 = vmmov %vm11808_vm1 }
 0xab5   :  { %8259 = vmatprep.mubr.msk.f32.mxu0 %vm11817_vm4, %v11122_v63  ;;  %v9005_v61 = vpop.eup %9004  ;;  %v4535_v54 = vmul.f32 %v9003_v14, %v11049_v12  ;;  %8176 = vmatmul.mubr.msk.f32.gmra.mrb[86].mxu1 %vm11818_vm13, %v11124_v38  ;;  %vm11825_vm2 = vmmov %vm11808_vm1 }
 0xab6   :  { %8260 = vmatmul.mubr.msk.f32.gmra.mrb[54].mxu0 %vm11808_vm1, %v11133_v23  ;;  %v9007_v4 = vpop.eup %9006  ;;  %4757 = vst.msk [vmem:[#allocation3 + $0x40] sm:$0xff] %vm11819_vm9, %v4532_v33  ;;  %v4509_v37 = vadd.f32 1.0, %v9005_v61  ;;  %v11153_v59 = vld [vmem:[#allocation3 + $0x38] sm:$0xff]  ;;  %vm11826_vm3 = vmmov %vm11808_vm1 }
 0xab7   :  { %v9009_v27 = vpop.eup %9008  ;;  %4760 = vst.msk [vmem:[#allocation3 + $0x78] sm:$0xff] %vm11820_vm15, %v4535_v54  ;;  %v4508_v49 = vadd.f32 1.0, %v9007_v4  ;;  %v11142_v8 = vld [vmem:[#allocation3 + $0x2f] sm:$0xff]  ;;  %v11146_v20 = vld [vmem:[#allocation3 + $0x37] sm:$0xff]  ;;  %vm11827_vm4 = vmmov %vm11808_vm1 }
 0xab8   :  { %v11144_v42 = vld [vmem:[#allocation3 + $0x30] sm:$0xff]  ;;  %v9011_v12 = vpop.eup %9010  ;;  %v4534_v22 = vmul.f32 %v9009_v27, %v11051_v18  ;;  %9018 = vrcp.f32 %v4509_v37  ;;  %8178 = vmatprep.mubr.msk.f32.mxu1 %vm11821_vm6, %v11142_v8  ;;  %vm11828_vm13 = vmmov %vm11808_vm1  ;;  %v4767_v4 = vld [vmem:[#allocation3 + $0x7] sm:$0xff] }
 0xab9   :  { %8262 = vmatprep.mubr.msk.f32.mxu0 %vm11822_vm14, %v11144_v42  ;;  %v4537_v28 = vmul.f32 %v9011_v12, %v11058_v29  ;;  %9020 = vrcp.f32 %v4508_v49  ;;  %8179 = vmatmul.mubr.msk.f32.gmra.mrb[88].mxu1 %vm11823_vm12, %v11146_v20  ;;  %vm11829_vm9 = vmmov %vm11808_vm1  ;;  %v5394_v37 = vld [vmem:[#allocation3 + $0x8] sm:$0xff] }
 0xaba   :  { %8263 = vmatmul.mubr.msk.f32.gmra.mrb[56].mxu0 %vm11824_vm11, %v11153_v59  ;;  %4759 = vst.msk [vmem:[#allocation3 + $0x70] sm:$0xff] %vm11825_vm2, %v4534_v22  ;;  %v11175_v25 = vld [vmem:[#allocation3 + $0x48] sm:$0xff]  ;;  %vm11830_vm15 = vmmov %vm11808_vm1 }
 0xabb   :  { %v9013_v18 = vpop.eup %9012  ;;  %4762 = vst.msk [vmem:[#allocation3 + $0x88] sm:$0xff] %vm11826_vm3, %v4537_v28  ;;  %vm11831_vm6 = vmmov %vm11808_vm1  ;;  %v6028_v28 = vld [vmem:[#allocation25 + $0x50] sm:$0xff] }
 0xabc   :  { %v9015_v50 = vpop.eup %9014  ;;  %v4536_v55 = vmul.f32 %v9013_v18, %v11060_v26  ;;  %vm11832_vm14 = vmmov %vm11808_vm1  ;;  %v6029_v18 = vld [vmem:[#allocation25 + $0x58] sm:$0xff] }
 0xabd   :  { %v4539_v35 = vmul.f32 %v9015_v50, %v11068_v31  ;;  %v11164_v6 = vld [vmem:[#allocation3 + $0x3f] sm:$0xff]  ;;  %v11168_v47 = vld [vmem:[#allocation3 + $0x47] sm:$0xff]  ;;  %vm11833_vm12 = vmmov %vm11808_vm1  ;;  %v8554_v50 = vpack.c.bf16 %v6029_v18, %v6028_v28 }
 0xabe   :  { %v11166_v29 = vld [vmem:[#allocation3 + $0x40] sm:$0xff]  ;;  %v9017_v44 = vpop.eup %9016  ;;  %4761 = vst.msk [vmem:[#allocation3 + $0x80] sm:$0xff] %vm11827_vm4, %v4536_v55  ;;  %8181 = vmatprep.mubr.msk.f32.mxu1 %vm11828_vm13, %v11164_v6  ;;  %vm11834_vm11 = vmmov %vm11808_vm1 }
 0xabf   :  { %8265 = vmatprep.mubr.msk.f32.mxu0 %vm11808_vm1, %v11166_v29  ;;  %4764 = vst.msk [vmem:[#allocation3 + $0x98] sm:$0xff] %vm11829_vm9, %v4539_v35  ;;  %v4538_v26 = vmul.f32 %v9017_v44, %v11070_v2  ;;  %8182 = vmatmul.mubr.msk.f32.gmra.mrb[90].mxu1 %vm11830_vm15, %v11168_v47  ;;  %v11194_v2 = vld [vmem:[#allocation3 + $0x78] sm:$0xff]  ;;  %vm11835_vm2 = vmmov %vm11808_vm1  ;;  %v6010_v35 = vld [vmem:[#allocation3 + $0x29] sm:$0xff] }
 0xac0   :  { %8266 = vmatmul.mubr.msk.f32.gmra.mrb[58].mxu0 %vm11831_vm6, %v11175_v25  ;;  %vm11836_vm3 = vmmov %vm11808_vm1  ;;  %v6025_v44 = vld [vmem:[#allocation3 + $0x49] sm:$0xff] }
 0xac1   :  { %4763 = vst.msk [vmem:[#allocation3 + $0x90] sm:$0xff] %vm11832_vm14, %v4538_v26  ;;  %v11184_v31 = vld [vmem:[#allocation3 + $0x6f] sm:$0xff]  ;;  %v11188_v3 = vld [vmem:[#allocation3 + $0x77] sm:$0xff]  ;;  %vm11837_vm4 = vmmov %vm11808_vm1 }
 0xac2   :  { %v11186_v36 = vld [vmem:[#allocation3 + $0x70] sm:$0xff]  ;;  %v9019_v60 = vpop.eup %9018  ;;  %8184 = vmatprep.mubr.msk.f32.mxu1 %vm11833_vm12, %v11184_v31  ;;  %vm11838_vm13 = vmmov %vm11808_vm1 }
 0xac3   :  { %8268 = vmatprep.mubr.msk.f32.mxu0 %vm11834_vm11, %v11186_v36  ;;  %v9021_v9 = vpop.eup %9020  ;;  %v4541_v39 = vmul.f32 %v9019_v60, %v11078_v48  ;;  %8185 = vmatmul.mubr.msk.f32.gmra.mrb[92].mxu1 %vm11835_vm2, %v11188_v3  ;;  %vm11839_vm9 = vmmov %vm11808_vm1  ;;  %v11214_v48 = vld [vmem:[#allocation3 + $0x88] sm:$0xff] }
 0xac4   :  { %8269 = vmatmul.mubr.msk.f32.gmra.mrb[60].mxu0 %vm11836_vm3, %v11194_v2  ;;  %v4540_v57 = vmul.f32 %v9021_v9, %v11080_v21  ;;  %vm11840_vm15 = vmmov %vm11808_vm1 }
 0xac5   :  { %4766 = vst.msk [vmem:[#allocation3 + $0xa8] sm:$0xff] %vm11837_vm4, %v4541_v39  ;;  %v11203_v17 = vld [vmem:[#allocation3 + $0x7f] sm:$0xff]  ;;  %v11207_v14 = vld [vmem:[#allocation3 + $0x87] sm:$0xff]  ;;  %vm11841_vm6 = vmmov %vm11808_vm1 }
 0xac6   :  { %v11205_v52 = vld [vmem:[#allocation3 + $0x80] sm:$0xff]  ;;  %4765 = vst.msk [vmem:[#allocation3 + $0xa0] sm:$0xff] %vm11838_vm13, %v4540_v57  ;;  %8187 = vmatprep.mubr.msk.f32.mxu1 %vm11808_vm1, %v11203_v17  ;;  %vm11842_vm14 = vmmov %vm11808_vm1  ;;  %v11230_v54 = vld [vmem:[#allocation3 + $0x98] sm:$0xff] }
 0xac7   :  { %8271 = vmatprep.mubr.msk.f32.mxu0 %vm11839_vm9, %v11205_v52  ;;  %8188 = vmatmul.mubr.msk.f32.gmra.mrb[94].mxu1 %vm11840_vm15, %v11207_v14  ;;  %vm11843_vm12 = vmmov %vm11808_vm1  ;;  %v6016_v26 = vld [vmem:[#allocation3 + $0x79] sm:$0xff]  ;;  %v6006_v39 = vld [vmem:[#allocation3 + $0x9] sm:$0xff] }
 0xac8   :  { %8272 = vmatmul.mubr.msk.f32.gmra.mrb[62].mxu0 %vm11841_vm6, %v11214_v48  ;;  %v11220_v21 = vld [vmem:[#allocation3 + $0x8f] sm:$0xff]  ;;  %v11224_v61 = vld [vmem:[#allocation3 + $0x97] sm:$0xff]  ;;  %vm11844_vm11 = vmmov %vm11808_vm1 }
 0xac9   :  { %v11222_v33 = vld [vmem:[#allocation3 + $0x90] sm:$0xff]  ;;  %8190 = vmatprep.mubr.msk.f32.mxu1 %vm11842_vm14, %v11220_v21  ;;  %vm11845_vm2 = vmmov %vm11808_vm1 }
 0xaca   :  { %8274 = vmatprep.mubr.msk.f32.mxu0 %vm11843_vm12, %v11222_v33  ;;  %vm11846_vm3 = vmmov %vm11808_vm1  ;;  %v6014_v57 = vld [vmem:[#allocation3 + $0x69] sm:$0xff] }
 0xacb   :  { %8191 = vmatmul.mubr.msk.f32.gmra.mrb[96].mxu1 %vm11844_vm11, %v11224_v61  ;;  %vm11847_vm4 = vmmov %vm11808_vm1 }
 0xacc   :  { %8275 = vmatmul.mubr.msk.f32.gmra.mrb[64].mxu0 %vm11845_vm2, %v11230_v54  ;;  %v11246_v22 = vld [vmem:[#allocation3 + $0xa8] sm:$0xff]  ;;  %vm11848_vm13 = vmmov %vm11808_vm1 }
 0xacd   :  { %v11236_v27 = vld [vmem:[#allocation3 + $0x9f] sm:$0xff]  ;;  %v11240_v12 = vld [vmem:[#allocation3 + $0xa7] sm:$0xff]  ;;  %vm11849_vm9 = vmmov %vm11808_vm1 }
 0xace   :  { %v11238_v49 = vld [vmem:[#allocation3 + $0xa0] sm:$0xff]  ;;  %8193 = vmatprep.mubr.msk.f32.mxu1 %vm11846_vm3, %v11236_v27  ;;  %vm11850_vm15 = vmmov %vm11808_vm1  ;;  %v6026_v9 = vld [vmem:[#allocation3 + $0xa9] sm:$0xff] }
 0xacf   :  { %8277 = vmatprep.mubr.msk.f32.mxu0 %vm11847_vm4, %v11238_v49  ;;  %8194 = vmatmul.mubr.msk.f32.gmra.mrb[98].mxu1 %vm11848_vm13, %v11240_v12  ;;  %vm11851_vm6 = vmmov %vm11808_vm1  ;;  %v6020_v60 = vld [vmem:[#allocation3 + $0x99] sm:$0xff] }
 0xad0   :  { %8278 = vmatmul.mubr.msk.f32.gmra.mrb[66].mxu0 %vm11808_vm1, %v11246_v22  ;;  %8200 = vmatprep.mubr.msk.f32.mxu1 %vm11849_vm9, %v4767_v4  ;;  %vm11852_vm14 = vmmov %vm11808_vm1 }
 0xad1   :  { %8284 = vmatprep.mubr.msk.f32.mxu0 %vm11850_vm15, %v5394_v37  ;;  %vm11853_vm12 = vmmov %vm11808_vm1 }
 0xad2   :  { %vm11854_vm11 = vmmov %vm11808_vm1 }
 0xad3   :  { %8201 = vmatmul.mubr.msk.f32.vlgmr.msra.gmra.mrb[84].mxu1 %vm11851_vm6, %v11095_v10  ;;  %vm11855_vm2 = vmmov %vm11808_vm1  ;;  %v4775_v10 = vld [vmem:[#allocation3 + $0x67] sm:$0xff] }
 0xad4   :  { %8285 = vmatmul.mubr.msk.f32.vlgmr.msra.gmra.mrb[52].mxu0 %vm11852_vm14, %v11097_v56  ;;  %8203 = vmatprep.mubr.msk.f32.mxu1 %vm11853_vm12, %v11099_v58  ;;  %vm11856_vm3 = vmmov %vm11808_vm1  ;;  %v5402_v56 = vld [vmem:[#allocation3 + $0x68] sm:$0xff] }
 0xad5   :  { %8287 = vmatprep.mubr.msk.f32.mxu0 %vm11854_vm11, %v11110_v53  ;;  %8541 = vmatpush3.bf16.msra.mxu1 %v11101_v19  ;;  %vm11857_vm4 = vmmov %vm11808_vm1  ;;  %v6023_v19 = vld [vmem:[#allocation25 + $0x20] sm:$0xff] }
 0xad6   :  { %8553 = vmatpush3.bf16.msra.mxu0 %v11103_v34  ;;  %8555 = vmatprep.subr.bf16.mxu1 %v8554_v50  ;;  %vm11858_vm13 = vmmov %vm11808_vm1  ;;  %v6024_v34 = vld [vmem:[#allocation25 + $0x28] sm:$0xff] }
 0xad7   :  { %8204 = vmatmul.mubr.msk.f32.gmra.mrb[86].mxu1 %vm11855_vm2, %v11120_v51  ;;  %vm11859_vm9 = vmmov %vm11808_vm1  ;;  %v8558_v55 = vpack.c.bf16 %v6024_v34, %v6023_v19 }
 0xad8   :  { %8288 = vmatmul.mubr.msk.f32.gmra.mrb[54].mxu0 %vm11856_vm3, %v11122_v63  ;;  %8206 = vmatprep.mubr.msk.f32.mxu1 %vm11857_vm4, %v11124_v38  ;;  %vm11860_vm15 = vmmov %vm11808_vm1 }
 0xad9   :  { %8290 = vmatprep.mubr.msk.f32.mxu0 %vm11858_vm13, %v11133_v23  ;;  %vm11861_vm6 = vmmov %vm11808_vm1 }
 0xada   :  { %vm11862_vm14 = vmmov %vm11808_vm1 }
 0xadb   :  { %8207 = vmatmul.mubr.msk.f32.gmra.mrb[88].mxu1 %vm11808_vm1, %v11142_v8  ;;  %vm11863_vm12 = vmmov %vm11808_vm1 }
 0xadc   :  { %8291 = vmatmul.mubr.msk.f32.gmra.mrb[56].mxu0 %vm11859_vm9, %v11144_v42  ;;  %8209 = vmatprep.mubr.msk.f32.mxu1 %vm11860_vm15, %v11146_v20  ;;  %vm11864_vm11 = vmmov %vm11808_vm1 }
 0xadd   :  { %8293 = vmatprep.mubr.msk.f32.mxu0 %vm11861_vm6, %v11153_v59  ;;  %vm11865_vm2 = vmmov %vm11808_vm1 }
 0xade   :  { %vm11866_vm3 = vmmov %vm11808_vm1 }
 0xadf   :  { %8210 = vmatmul.mubr.msk.f32.gmra.mrb[90].mxu1 %vm11862_vm14, %v11164_v6  ;;  %vm11867_vm4 = vmmov %vm11808_vm1 }
 0xae0   :  { %8294 = vmatmul.mubr.msk.f32.gmra.mrb[58].mxu0 %vm11863_vm12, %v11166_v29  ;;  %8212 = vmatprep.mubr.msk.f32.mxu1 %vm11864_vm11, %v4775_v10  ;;  %vm11868_vm13 = vmmov %vm11808_vm1 }
 0xae1   :  { %8296 = vmatprep.mubr.msk.f32.mxu0 %vm11865_vm2, %v5402_v56  ;;  %vm11869_vm9 = vmmov %vm11808_vm1 }
 0xae2   :  { %vm11870_vm15 = vmmov %vm11808_vm1 }
 0xae3   :  { %8213 = vmatmul.mubr.msk.f32.gmra.mrb[92].mxu1 %vm11866_vm3, %v11184_v31  ;;  %vm11871_vm6 = vmmov %vm11808_vm1  ;;  %v6017_v31 = vld [vmem:[#allocation3 + $0x81] sm:$0xff] }
 0xae4   :  { %8297 = vmatmul.mubr.msk.f32.gmra.mrb[60].mxu0 %vm11867_vm4, %v11186_v36  ;;  %8215 = vmatprep.mubr.msk.f32.mxu1 %vm11868_vm13, %v11188_v3  ;;  %vm11872_vm14 = vmmov %vm11808_vm1  ;;  %v6018_v36 = vld [vmem:[#allocation3 + $0x89] sm:$0xff] }
 0xae5   :  { %8299 = vmatprep.mubr.msk.f32.mxu0 %vm11808_vm1, %v11194_v2  ;;  %vm11873_vm12 = vmmov %vm11808_vm1 }
 0xae6   :  { %vm11874_vm11 = vmmov %vm11808_vm1 }
 0xae7   :  { %8216 = vmatmul.mubr.msk.f32.gmra.mrb[94].mxu1 %vm11869_vm9, %v11203_v17  ;;  %vm11875_vm2 = vmmov %vm11808_vm1 }
 0xae8   :  { %8300 = vmatmul.mubr.msk.f32.gmra.mrb[62].mxu0 %vm11870_vm15, %v11205_v52  ;;  %8218 = vmatprep.mubr.msk.f32.mxu1 %vm11871_vm6, %v11207_v14  ;;  %vm11876_vm3 = vmmov %vm11808_vm1 }
 0xae9   :  { %8302 = vmatprep.mubr.msk.f32.mxu0 %vm11872_vm14, %v11214_v48  ;;  %vm11877_vm4 = vmmov %vm11808_vm1 }
 0xaea   :  { %vm11878_vm13 = vmmov %vm11808_vm1 }
 0xaeb   :  { %8219 = vmatmul.mubr.msk.f32.gmra.mrb[96].mxu1 %vm11873_vm12, %v11220_v21  ;;  %vm11879_vm9 = vmmov %vm11808_vm1 }
 0xaec   :  { %8303 = vmatmul.mubr.msk.f32.gmra.mrb[64].mxu0 %vm11874_vm11, %v11222_v33  ;;  %8221 = vmatprep.mubr.msk.f32.mxu1 %vm11875_vm2, %v11224_v61  ;;  %vm11880_vm15 = vmmov %vm11808_vm1 }
 0xaed   :  { %8305 = vmatprep.mubr.msk.f32.mxu0 %vm11876_vm3, %v11230_v54  ;;  %vm11881_vm6 = vmmov %vm11808_vm1 }
 0xaee   :  { %vm11882_vm14 = vmmov %vm11808_vm1 }
 0xaef   :  { %8222 = vmatmul.mubr.msk.f32.gmra.mrb[98].mxu1 %vm11877_vm4, %v11236_v27  ;;  %vm11883_vm12 = vmmov %vm11808_vm1 }
 0xaf0   :  { %8306 = vmatmul.mubr.msk.f32.gmra.mrb[66].mxu0 %vm11878_vm13, %v11238_v49  ;;  %8228 = vmatprep.mubr.msk.f32.mxu1 %vm11808_vm1, %v11099_v58  ;;  %vm11884_vm11 = vmmov %vm11808_vm1  ;;  %v5769_v58 = vld [vmem:[#allocation3 + $0x50] sm:$0xff] }
 0xaf1   :  { %8312 = vmatprep.mubr.msk.f32.mxu0 %vm11879_vm9, %v11110_v53  ;;  %vm11885_vm2 = vmmov %vm11808_vm1  ;;  %v5141_v53 = vld [vmem:[#allocation3 + $0x4f] sm:$0xff] }
 0xaf2   :  { %vm11886_vm3 = vmmov %vm11808_vm1 }
 0xaf3   :  { %8229 = vmatmul.mubr.msk.f32.vlgmr.msra.gmra.mrb[84].mxu1 %vm11880_vm15, %v11120_v51  ;;  %vm11887_vm4 = vmmov %vm11808_vm1  ;;  %v5777_v51 = vld [vmem:[#allocation3 + $0xb0] sm:$0xff] }
 0xaf4   :  { %8313 = vmatmul.mubr.msk.f32.vlgmr.msra.gmra.mrb[52].mxu0 %vm11881_vm6, %v11122_v63  ;;  %8231 = vmatprep.mubr.msk.f32.mxu1 %vm11882_vm14, %v11124_v38  ;;  %vm11888_vm13 = vmmov %vm11808_vm1  ;;  %v5149_v63 = vld [vmem:[#allocation3 + $0xaf] sm:$0xff]  ;;  %v6391_v38 = vld [vmem:[#allocation25 + $0x80] sm:$0xff] }
 0xaf5   :  { %8315 = vmatprep.mubr.msk.f32.mxu0 %vm11883_vm12, %v11133_v23  ;;  %8557 = vmatpush3.bf16.msra.mxu1 %v8554_v50  ;;  %vm11889_vm9 = vmmov %vm11808_vm1  ;;  %v6392_v23 = vld [vmem:[#allocation25 + $0x88] sm:$0xff] }
 0xaf6   :  { %8559 = vmatprep.subr.bf16.mxu1 %v8558_v55  ;;  %vm11890_vm15 = vmmov %vm11808_vm1 }
 0xaf7   :  { %8232 = vmatmul.mubr.msk.f32.gmra.mrb[86].mxu1 %vm11884_vm11, %v11142_v8  ;;  %vm11891_vm6 = vmmov %vm11808_vm1  ;;  %v6007_v8 = vld [vmem:[#allocation3 + $0x11] sm:$0xff] }
 0xaf8   :  { %8316 = vmatmul.mubr.msk.f32.gmra.mrb[54].mxu0 %vm11885_vm2, %v11144_v42  ;;  %8234 = vmatprep.mubr.msk.f32.mxu1 %vm11886_vm3, %v11146_v20  ;;  %vm11892_vm14 = vmmov %vm11808_vm1  ;;  %v8562_v42 = vpack.c.bf16 %v6392_v23, %v6391_v38  ;;  %v6008_v20 = vld [vmem:[#allocation3 + $0x19] sm:$0xff] }
 0xaf9   :  { %8318 = vmatprep.mubr.msk.f32.mxu0 %vm11887_vm4, %v11153_v59  ;;  %vm11893_vm12 = vmmov %vm11808_vm1  ;;  %v6009_v59 = vld [vmem:[#allocation3 + $0x21] sm:$0xff]  ;;  %v11954_v23 = vld [vmem:[#allocation50_spill] sm:$0xff] }
 0xafa   :  { %vm11894_vm11 = vmmov %vm11808_vm1 }
 0xafb   :  { %8235 = vmatmul.mubr.msk.f32.gmra.mrb[88].mxu1 %vm11888_vm13, %v11164_v6  ;;  %vm11895_vm2 = vmmov %vm11808_vm1  ;;  %v6011_v6 = vld [vmem:[#allocation3 + $0x31] sm:$0xff] }
 0xafc   :  { %8319 = vmatmul.mubr.msk.f32.gmra.mrb[56].mxu0 %vm11808_vm1, %v11166_v29  ;;  %8237 = vmatprep.mubr.msk.f32.mxu1 %vm11889_vm9, %v11168_v47  ;;  %vm11896_vm3 = vmmov %vm11808_vm1  ;;  %v6012_v29 = vld [vmem:[#allocation3 + $0x39] sm:$0xff]  ;;  %v6013_v47 = vld [vmem:[#allocation3 + $0x41] sm:$0xff] }
 0xafd   :  { %8321 = vmatprep.mubr.msk.f32.mxu0 %vm11890_vm15, %v11175_v25  ;;  %vm11897_vm4 = vmmov %vm11808_vm1  ;;  %v6015_v25 = vld [vmem:[#allocation3 + $0x71] sm:$0xff] }
 0xafe   :  { %vm11898_vm13 = vmmov %vm11808_vm1 }
 0xaff   :  { %8238 = vmatmul.mubr.msk.f32.gmra.mrb[90].mxu1 %vm11891_vm6, %v5141_v53  ;;  %vm11899_vm9 = vmmov %vm11808_vm1  ;;  %v11952_v53 = vld [vmem:[#allocation48_spill] sm:$0xff] }
 0xb00   :  { %8322 = vmatmul.mubr.msk.f32.gmra.mrb[58].mxu0 %vm11892_vm14, %v5769_v58  ;;  %8240 = vmatprep.mubr.msk.f32.mxu1 %vm11893_vm12, %v11188_v3  ;;  %vm11900_vm15 = vmmov %vm11808_vm1  ;;  %v6019_v3 = vld [vmem:[#allocation3 + $0x91] sm:$0xff] }
 0xb01   :  { %8324 = vmatprep.mubr.msk.f32.mxu0 %vm11894_vm11, %v11194_v2  ;;  %vm11901_vm6 = vmmov %vm11808_vm1  ;;  %v6021_v2 = vld [vmem:[#allocation3 + $0xa1] sm:$0xff] }
 0xb02   :  { %vm11902_vm14 = vmmov %vm11808_vm1 }
 0xb03   :  { %8241 = vmatmul.mubr.msk.f32.gmra.mrb[92].mxu1 %vm11895_vm2, %v11203_v17  ;;  %vm11903_vm12 = vmmov %vm11808_vm1  ;;  %v6381_v17 = vld [vmem:[#allocation3 + $0x51] sm:$0xff] }
 0xb04   :  { %8325 = vmatmul.mubr.msk.f32.gmra.mrb[60].mxu0 %vm11896_vm3, %v11205_v52  ;;  %8243 = vmatprep.mubr.msk.f32.mxu1 %vm11897_vm4, %v11207_v14  ;;  %vm11904_vm11 = vmmov %vm11808_vm1  ;;  %v6389_v52 = vld [vmem:[#allocation3 + $0xb1] sm:$0xff]  ;;  %v11422_v14 = vld [vmem:[#allocation13] ss:$0 sm:$0xff] }
 0xb05   :  { %8327 = vmatprep.mubr.msk.f32.mxu0 %vm11898_vm13, %v11214_v48  ;;  %vm11905_vm2 = vmmov %vm11808_vm1 }
 0xb06   :  { %vm11906_vm3 = vmmov %vm11808_vm1 }
 0xb07   :  { %8244 = vmatmul.mubr.msk.f32.gmra.mrb[94].mxu1 %vm11808_vm1, %v11220_v21  ;;  %vm11907_vm4 = vmmov %vm11808_vm1 }
 0xb08   :  { %8328 = vmatmul.mubr.msk.f32.gmra.mrb[62].mxu0 %vm11899_vm9, %v11222_v33  ;;  %8246 = vmatprep.mubr.msk.f32.mxu1 %vm11900_vm15, %v11224_v61  ;;  %vm11908_vm13 = vmmov %vm11808_vm1 }
 0xb09   :  { %8330 = vmatprep.mubr.msk.f32.mxu0 %vm11901_vm6, %v11230_v54  ;;  %vm11909_vm9 = vmmov %vm11808_vm1 }
 0xb0a   :  { %vm11910_vm15 = vmmov %vm11808_vm1 }
 0xb0b   :  { %8247 = vmatmul.mubr.msk.f32.gmra.mrb[96].mxu1 %vm11902_vm14, %v11236_v27  ;;  %vm11911_vm6 = vmmov %vm11808_vm1 }
 0xb0c   :  { %8331 = vmatmul.mubr.msk.f32.gmra.mrb[64].mxu0 %vm11903_vm12, %v11238_v49  ;;  %8249 = vmatprep.mubr.msk.f32.mxu1 %vm11904_vm11, %v11240_v12  ;;  %vm11912_vm14 = vmmov %vm11808_vm1 }
 0xb0d   :  { %8333 = vmatprep.mubr.msk.f32.mxu0 %vm11905_vm2, %v11246_v22  ;;  %vm11913_vm12 = vmmov %vm11808_vm1 }
 0xb0e   :  { %vm11914_vm11 = vmmov %vm11808_vm1 }
 0xb0f   :  { %8250 = vmatmul.mubr.msk.f32.gmra.mrb[98].mxu1 %vm11906_vm3, %v5149_v63  ;;  %vm11915_vm2 = vmmov %vm11808_vm1 }
 0xb10   :  { %8334 = vmatmul.mubr.msk.f32.gmra.mrb[66].mxu0 %vm11907_vm4, %v5777_v51  ;;  %8340 = vmatprep.mubr.msk.f32.mxu1 %vm11908_vm13, %v6007_v8  ;;  %vm11916_vm3 = vmmov %vm11808_vm1 }
 0xb11   :  { %vm11917_vm4 = vmmov %vm11808_vm1 }
 0xb12   :  { %vm11918_vm13 = vmmov %vm11808_vm1 }
 0xb13   :  { %8341 = vmatmul.mubr.msk.f32.vlgmr.msra.gmra.mrb[100].mxu1 %vm11808_vm1, %v6008_v20 }
 0xb14   :  { %8343 = vmatprep.mubr.msk.f32.mxu1 %vm11909_vm9, %v6009_v59  ;;  %8561 = vmatpush3.bf16.msra.mxu1 %v8558_v55  ;;  %vm11919_vm9 = vmmov %vm11808_vm1 }
 0xb15   :  { %8563 = vmatprep.subr.bf16.mxu1 %v8562_v42 }
 0xb17   :  { %8344 = vmatmul.mubr.msk.f32.gmra.mrb[102].mxu1 %vm11910_vm15, %v6010_v35  ;;  %vm11920_vm15 = vmmov %vm11808_vm1 }
 0xb18   :  { %8346 = vmatprep.mubr.msk.f32.mxu1 %vm11911_vm6, %v6011_v6  ;;  %vm11921_vm6 = vmmov %vm11808_vm1 }
 0xb1b   :  { %8347 = vmatmul.mubr.msk.f32.gmra.mrb[104].mxu1 %vm11912_vm14, %v6012_v29  ;;  %vm11922_vm14 = vmmov %vm11808_vm1 }
 0xb1c   :  { %8349 = vmatprep.mubr.msk.f32.mxu1 %vm11913_vm12, %v6013_v47  ;;  %vm11923_vm12 = vmmov %vm11808_vm1 }
 0xb1f   :  { %8350 = vmatmul.mubr.msk.f32.gmra.mrb[106].mxu1 %vm11914_vm11, %v6025_v44  ;;  %vm11924_vm11 = vmmov %vm11808_vm1 }
 0xb20   :  { %8352 = vmatprep.mubr.msk.f32.mxu1 %vm11915_vm2, %v6015_v25  ;;  %vm11925_vm2 = vmmov %vm11808_vm1 }
 0xb23   :  { %8353 = vmatmul.mubr.msk.f32.gmra.mrb[108].mxu1 %vm11916_vm3, %v6016_v26  ;;  %vm11926_vm3 = vmmov %vm11808_vm1 }
 0xb24   :  { %8355 = vmatprep.mubr.msk.f32.mxu1 %vm11917_vm4, %v6017_v31  ;;  %vm11927_vm4 = vmmov %vm11808_vm1 }
 0xb27   :  { %8356 = vmatmul.mubr.msk.f32.gmra.mrb[110].mxu1 %vm11918_vm13, %v6018_v36  ;;  %vm11928_vm13 = vmmov %vm11808_vm1 }
 0xb28   :  { %8358 = vmatprep.mubr.msk.f32.mxu1 %vm11808_vm1, %v6019_v3 }
 0xb2b   :  { %8359 = vmatmul.mubr.msk.f32.gmra.mrb[112].mxu1 %vm11919_vm9, %v6020_v60  ;;  %vm11929_vm9 = vmmov %vm11808_vm1 }
 0xb2c   :  { %8361 = vmatprep.mubr.msk.f32.mxu1 %vm11920_vm15, %v6021_v2  ;;  %vm11930_vm15 = vmmov %vm11808_vm1 }
 0xb2f   :  { %8362 = vmatmul.mubr.msk.f32.gmra.mrb[114].mxu1 %vm11921_vm6, %v6026_v9  ;;  %vm11931_vm6 = vmmov %vm11808_vm1 }
 0xb30   :  { %8368 = vmatprep.mubr.msk.f32.mxu1 %vm11922_vm14, %v6006_v39  ;;  %vm11932_vm14 = vmmov %vm11808_vm1 }
 0xb33   :  { %8369 = vmatmul.mubr.msk.f32.vlgmr.msra.gmra.mrb[100].mxu1 %vm11923_vm12, %v6007_v8  ;;  %vm11933_vm12 = vmmov %vm11808_vm1 }
 0xb34   :  { %8371 = vmatprep.mubr.msk.f32.mxu1 %vm11924_vm11, %v6008_v20  ;;  %8565 = vmatpush3.bf16.msra.mxu1 %v8562_v42  ;;  %vm11934_vm11 = vmmov %vm11808_vm1 }
 0xb37   :  { %8372 = vmatmul.mubr.msk.f32.gmra.mrb[102].mxu1 %vm11925_vm2, %v6009_v59  ;;  %vm11935_vm2 = vmmov %vm11808_vm1 }
 0xb38   :  { %8374 = vmatprep.mubr.msk.f32.mxu1 %vm11926_vm3, %v6010_v35  ;;  %vm11936_vm3 = vmmov %vm11808_vm1 }
 0xb3b   :  { %8375 = vmatmul.mubr.msk.f32.gmra.mrb[104].mxu1 %vm11927_vm4, %v6011_v6  ;;  %vm11937_vm4 = vmmov %vm11808_vm1 }
 0xb3c   :  { %8377 = vmatprep.mubr.msk.f32.mxu1 %vm11928_vm13, %v6012_v29  ;;  %vm11938_vm13 = vmmov %vm11808_vm1 }
 0xb3f   :  { %8378 = vmatmul.mubr.msk.f32.gmra.mrb[106].mxu1 %vm11808_vm1, %v6013_v47 }
 0xb40   :  { %8380 = vmatprep.mubr.msk.f32.mxu1 %vm11929_vm9, %v6014_v57  ;;  %vm11939_vm9 = vmmov %vm11808_vm1 }
 0xb43   :  { %8381 = vmatmul.mubr.msk.f32.gmra.mrb[108].mxu1 %vm11930_vm15, %v6015_v25  ;;  %vm11940_vm15 = vmmov %vm11808_vm1 }
 0xb44   :  { %8383 = vmatprep.mubr.msk.f32.mxu1 %vm11931_vm6, %v6016_v26  ;;  %vm11941_vm6 = vmmov %vm11808_vm1 }
 0xb47   :  { %8384 = vmatmul.mubr.msk.f32.gmra.mrb[110].mxu1 %vm11932_vm14, %v6017_v31  ;;  %vm11942_vm14 = vmmov %vm11808_vm1 }
 0xb48   :  { %8386 = vmatprep.mubr.msk.f32.mxu1 %vm11933_vm12, %v6018_v36  ;;  %vm11943_vm12 = vmmov %vm11808_vm1 }
 0xb4b   :  { %8387 = vmatmul.mubr.msk.f32.gmra.mrb[112].mxu1 %vm11934_vm11, %v6019_v3  ;;  %vm11944_vm11 = vmmov %vm11808_vm1 }
 0xb4c   :  { %8389 = vmatprep.mubr.msk.f32.mxu1 %vm11935_vm2, %v6020_v60  ;;  %vm11945_vm2 = vmmov %vm11808_vm1 }
 0xb4f   :  { %8390 = vmatmul.mubr.msk.f32.gmra.mrb[114].mxu1 %vm11936_vm3, %v6021_v2  ;;  %vm11946_vm3 = vmmov %vm11808_vm1 }
 0xb50   :  { %8396 = vmatprep.mubr.msk.f32.mxu1 %vm11937_vm4, %v6008_v20  ;;  %vm11947_vm4 = vmmov %vm11808_vm1 }
 0xb53   :  { %8397 = vmatmul.mubr.msk.f32.vlgmr.msra.gmra.mrb[100].mxu1 %vm11938_vm13, %v6009_v59  ;;  %vm11948_vm13 = vmmov %vm11808_vm1 }
 0xb54   :  { %8399 = vmatprep.mubr.msk.f32.mxu1 %vm11808_vm1, %v6010_v35 }
 0xb57   :  { %8400 = vmatmul.mubr.msk.f32.gmra.mrb[102].mxu1 %vm11939_vm9, %v6011_v6  ;;  %vm11949_vm9 = vmmov %vm11808_vm1 }
 0xb58   :  { %8402 = vmatprep.mubr.msk.f32.mxu1 %vm11940_vm15, %v6012_v29  ;;  %vm11950_vm15 = vmmov %vm11808_vm1 }
 0xb5b   :  { %8403 = vmatmul.mubr.msk.f32.gmra.mrb[104].mxu1 %vm11941_vm6, %v6013_v47  ;;  %vm11956_vm6 = vnez %v11701_v46 }
 0xb5c   :  { %8405 = vmatprep.mubr.msk.f32.mxu1 %vm11942_vm14, %v6025_v44  ;;  %vm11958_vm14 = vnez %v11711_v11 }
 0xb5f   :  { %8406 = vmatmul.mubr.msk.f32.gmra.mrb[106].mxu1 %vm11943_vm12, %v6381_v17  ;;  %vm11960_vm12 = vnez %v11721_v13 }
 0xb60   :  { %8408 = vmatprep.mubr.msk.f32.mxu1 %vm11944_vm11, %v6016_v26  ;;  %vm11961_vm11 = vnez %v11728_v62 }
 0xb63   :  { %8409 = vmatmul.mubr.msk.f32.gmra.mrb[108].mxu1 %vm11945_vm2, %v6017_v31  ;;  %vm11962_vm2 = vnez %v11736_v41 }
 0xb64   :  { %8411 = vmatprep.mubr.msk.f32.mxu1 %vm11946_vm3, %v6018_v36  ;;  %vm11963_vm3 = vnez %v11738_v24 }
 0xb67   :  { %8412 = vmatmul.mubr.msk.f32.gmra.mrb[110].mxu1 %vm11947_vm4, %v6019_v3 }
 0xb68   :  { %8414 = vmatprep.mubr.msk.f32.mxu1 %vm11948_vm13, %v6020_v60 }
 0xb6b   :  { %8415 = vmatmul.mubr.msk.f32.gmra.mrb[112].mxu1 %vm11808_vm1, %v6021_v2 }
 0xb6c   :  { %8417 = vmatprep.mubr.msk.f32.mxu1 %vm11949_vm9, %v6026_v9  ;;  %vm11968_vm9 = vmmov %vm11808_vm1 }
 0xb6f   :  { %8418 = vmatmul.mubr.msk.f32.gmra.mrb[114].mxu1 %vm11950_vm15, %v6389_v52 }
 0xbc6   :  { %v8230_v48 = vpop.f32.mrb[84].mxu1 }
 0xbc7   :  { %v8314_v21 = vpop.f32.mrb[52].mxu0  ;;  %v5363_v33 = vsel %vm10543_vm7, %v8230_v48, 0.0  ;;  %v5267_v61 = vpop.f32.mrb[85].mxu1  ;;  %vm11951_vm7 = vnez %v11680_v30 }
 0xbc8   :  { %v5895_v54 = vpop.f32.mrb[53].mxu0  ;;  %v8600_v4 = vadd.f32 %v11422_v14, %v5363_v33  ;;  %v5362_v37 = vsel %vm10547_vm8, %v5267_v61, 0.0  ;;  %vm11953_vm8 = vnez %v11952_v53 }
 0xbc9   :  { %v8602_v27 = vadd.f32 %v11422_v14, %v5362_v37 }
 0xbca   :  { %v11430_v49 = vadd.f32 %v8600_v4, %v8314_v21  ;;  %v8233_v12 = vpop.f32.mrb[86].mxu1 }
 0xbcb   :  { %v8317_v22 = vpop.f32.mrb[54].mxu0  ;;  %v11432_v28 = vadd.f32 %v8602_v27, %v5895_v54  ;;  %v5365_v18 = vsel %vm10556_vm10, %v8233_v12, 0.0  ;;  %v5277_v45 = vpop.f32.mrb[87].mxu1  ;;  %vm11955_vm10 = vnez %v11954_v23 }
 0xbcc   :  { %v5905_v50 = vpop.f32.mrb[55].mxu0  ;;  %v8604_v10 = vadd.f32 %v11422_v14, %v5365_v18  ;;  %v5364_v56 = vsel %vm11951_vm7, %v5277_v45, 0.0 }
 0xbcd   :  { %v8606_v16 = vadd.f32 %v11422_v14, %v5364_v56 }
 0xbce   :  { %v11440_v19 = vadd.f32 %v8604_v10, %v8317_v22  ;;  %v8236_v34 = vpop.f32.mrb[88].mxu1 }
 0xbcf   :  { %v8320_v55 = vpop.f32.mrb[56].mxu0  ;;  %v11442_v58 = vadd.f32 %v8606_v16, %v5905_v50  ;;  %v5367_v51 = vsel %vm11953_vm8, %v8236_v34, 0.0  ;;  %v5287_v15 = vpop.f32.mrb[89].mxu1  ;;  %vm11973_vm8 = vmmov %vm11808_vm1 }
 0xbd0   :  { %v5915_v63 = vpop.f32.mrb[57].mxu0  ;;  %v8608_v38 = vadd.f32 %v11422_v14, %v5367_v51  ;;  %v5366_v8 = vsel %vm11955_vm10, %v5287_v15, 0.0  ;;  %vm11974_vm10 = vmmov %vm11808_vm1 }
 0xbd1   :  { %v8610_v30 = vadd.f32 %v11422_v14, %v5366_v8 }
 0xbd2   :  { %v11450_v42 = vadd.f32 %v8608_v38, %v8320_v55  ;;  %v8239_v20 = vpop.f32.mrb[90].mxu1 }
 0xbd3   :  { %v8323_v59 = vpop.f32.mrb[58].mxu0  ;;  %v11452_v35 = vadd.f32 %v8610_v30, %v5915_v63  ;;  %v5369_v6 = vsel %vm10604_vm5, %v8239_v20, 0.0  ;;  %v5297_v29 = vpop.f32.mrb[91].mxu1  ;;  %vm11957_vm5 = vnez %v11709_v43  ;;  %v11964_v30 = vld [vmem:[#allocation45_spill] sm:$0xff] }
 0xbd4   :  { %v5925_v47 = vpop.f32.mrb[59].mxu0  ;;  %v8612_v44 = vadd.f32 %v11422_v14, %v5369_v6  ;;  %v5368_v25 = vsel %vm11956_vm6, %v5297_v29, 0.0  ;;  %vm11965_vm4 = vnez %v11964_v30  ;;  %v11966_v6 = vld [vmem:[#allocation46_spill] sm:$0xff] }
 0xbd5   :  { %v8614_v26 = vadd.f32 %v11422_v14, %v5368_v25  ;;  %vm11967_vm13 = vnez %v11966_v6 }
 0xbd6   :  { %v11460_v31 = vadd.f32 %v8612_v44, %v8323_v59  ;;  %v8242_v36 = vpop.f32.mrb[92].mxu1 }
 0xbd7   :  { %v8326_v3 = vpop.f32.mrb[60].mxu0  ;;  %v11462_v60 = vadd.f32 %v8614_v26, %v5925_v47  ;;  %v5371_v2 = vsel %vm10630_vm0, %v8242_v36, 0.0  ;;  %v5307_v1 = vpop.f32.mrb[93].mxu1  ;;  %vm11959_vm0 = vnez %v11713_v40  ;;  %v11971_v36 = vld [vmem:[#allocation49_spill] sm:$0xff] }
 0xbd8   :  { %v5935_v9 = vpop.f32.mrb[61].mxu0  ;;  %v8616_v39 = vadd.f32 %v11422_v14, %v5371_v2  ;;  %v5370_v57 = vsel %vm11957_vm5, %v5307_v1, 0.0  ;;  %vm11972_vm7 = vnez %v11971_v36  ;;  %vm11977_vm5 = vnez %v11699_v7 }
 0xbd9   :  { %v8618_v46 = vadd.f32 %v11422_v14, %v5370_v57 }
 0xbda   :  { %v11470_v17 = vadd.f32 %v8616_v39, %v8326_v3  ;;  %v8245_v52 = vpop.f32.mrb[94].mxu1 }
 0xbdb   :  { %v8329_v48 = vpop.f32.mrb[62].mxu0  ;;  %v11472_v21 = vadd.f32 %v8618_v46, %v5935_v9  ;;  %v5373_v33 = vsel %vm11958_vm14, %v8245_v52, 0.0  ;;  %v5317_v0 = vpop.f32.mrb[95].mxu1  ;;  %vm11978_vm14 = vmmov %vm11808_vm1 }
 0xbdc   :  { %v5945_v61 = vpop.f32.mrb[63].mxu0  ;;  %v8620_v54 = vadd.f32 %v11422_v14, %v5373_v33  ;;  %v5372_v4 = vsel %vm11959_vm0, %v5317_v0, 0.0  ;;  %vm11979_vm0 = vmmov %vm11808_vm1 }
 0xbdd   :  { %v8622_v43 = vadd.f32 %v11422_v14, %v5372_v4 }
 0xbde   :  { %v11480_v37 = vadd.f32 %v8620_v54, %v8329_v48  ;;  %v8248_v27 = vpop.f32.mrb[96].mxu1  ;;  %v11986_v54 = vld [vmem:[#allocation53_spill] sm:$0xff] }
 0xbdf   :  { %v8332_v12 = vpop.f32.mrb[64].mxu0  ;;  %v11482_v22 = vadd.f32 %v8622_v43, %v5945_v61  ;;  %v5375_v18 = vsel %vm11960_vm12, %v8248_v27, 0.0  ;;  %v5327_v11 = vpop.f32.mrb[97].mxu1  ;;  %vm11980_vm12 = vnez %v11705_v32 }
 0xbe0   :  { %v5955_v45 = vpop.f32.mrb[65].mxu0  ;;  %v8624_v50 = vadd.f32 %v11422_v14, %v5375_v18  ;;  %v5374_v10 = vsel %vm11961_vm11, %v5327_v11, 0.0  ;;  %vm11981_vm11 = vnez %v11707_v5  ;;  %v11992_v18 = vld [vmem:[#allocation55_spill] sm:$0xff] }
 0xbe1   :  { %v8626_v40 = vadd.f32 %v11422_v14, %v5374_v10 }
 0xbe2   :  { %v11490_v56 = vadd.f32 %v8624_v50, %v8332_v12  ;;  %v8251_v16 = vpop.f32.mrb[98].mxu1 }
 0xbe3   :  { %v8335_v34 = vpop.f32.mrb[66].mxu0  ;;  %v8627_v55 = vadd.f32 %v8626_v40, %v5955_v45  ;;  %v5377_v53 = vsel %vm11962_vm2, %v8251_v16, 0.0  ;;  %v5337_v51 = vpop.f32.mrb[99].mxu1  ;;  %vm11982_vm2 = vmmov %vm11979_vm0  ;;  %v11998_v16 = vld [vmem:[#allocation57_spill] sm:$0xff] }
 0xbe4   :  { %v5965_v13 = vpop.f32.mrb[67].mxu0  ;;  %v8628_v15 = vadd.f32 %v11422_v14, %v5377_v53  ;;  %v5376_v63 = vsel %vm11963_vm3, %v5337_v51, 0.0  ;;  %vm11983_vm3 = vmmov %vm11979_vm0 }
 0xbe5   :  { %v8630_v62 = vadd.f32 %v11422_v14, %v5376_v63  ;;  %v11969_v14 = vld [vmem:[#allocation47_spill] sm:$0xff] }
 0xbe6   :  { %v11498_v38 = vadd.f32 %v8628_v15, %v8335_v34  ;;  %vm11970_vm15 = vnez %v11969_v14  ;;  %v12003_v63 = vld [vmem:[#allocation59_spill] sm:$0xff] }
 0xbe7   :  { %v11500_v23 = vadd.f32 %v8630_v62, %v5965_v13 }
 0xc26   :  { %v8398_v8 = vpop.f32.mrb[100].mxu1 }
 0xc27   :  { %v6603_v20 = vsel %vm11965_vm4, %v8398_v8, 0.0  ;;  %v6507_v59 = vpop.f32.mrb[101].mxu1 }
 0xc28   :  { %v6619_v41 = vadd.f32 %v11430_v49, %v6603_v20  ;;  %v6602_v29 = vsel %vm11967_vm13, %v6507_v59, 0.0  ;;  %vm11987_vm13 = vnez %v11986_v54 }
 0xc29   :  { %v6618_v47 = vadd.f32 %v11432_v28, %v6602_v29  ;;  %v11975_v28 = vld [vmem:[#allocation51_spill] sm:$0xff] }
 0xc2a   :  { %6635 = vst.msk [vmem:[#allocation33 + $0x8] sm:$0xff] %vm11808_vm1, %v6619_v41  ;;  %v8401_v24 = vpop.f32.mrb[102].mxu1  ;;  %vm11976_vm6 = vnez %v11975_v28  ;;  %vm11988_vm1 = vmmov %vm11979_vm0 }
 0xc2b   :  { %6634 = vst.msk [vmem:[#allocation33] sm:$0xff] %vm11968_vm9, %v6618_v47  ;;  %v6605_v44 = vsel %vm11970_vm15, %v8401_v24, 0.0  ;;  %v6517_v25 = vpop.f32.mrb[103].mxu1  ;;  %vm11989_vm9 = vmmov %vm11979_vm0 }
 0xc2c   :  { %v6621_v26 = vadd.f32 %v11440_v19, %v6605_v44  ;;  %v6604_v3 = vsel %vm11972_vm7, %v6517_v25, 0.0  ;;  %vm11993_vm7 = vnez %v11992_v18 }
 0xc2d   :  { %v6620_v49 = vadd.f32 %v11442_v58, %v6604_v3 }
 0xc2e   :  { %6637 = vst.msk [vmem:[#allocation33 + $0x18] sm:$0xff] %vm11973_vm8, %v6621_v26  ;;  %v8404_v2 = vpop.f32.mrb[104].mxu1  ;;  %vm11994_vm8 = vmmov %vm11979_vm0 }
 0xc2f   :  { %6636 = vst.msk [vmem:[#allocation33 + $0x10] sm:$0xff] %vm11974_vm10, %v6620_v49  ;;  %v6607_v1 = vsel %vm11976_vm6, %v8404_v2, 0.0  ;;  %v6527_v9 = vpop.f32.mrb[105].mxu1  ;;  %vm11995_vm10 = vmmov %vm11979_vm0 }
 0xc30   :  { %v6623_v39 = vadd.f32 %v11450_v42, %v6607_v1  ;;  %v6606_v57 = vsel %vm11977_vm5, %v6527_v9, 0.0  ;;  %vm11999_vm5 = vnez %v11998_v16 }
 0xc31   :  { %v6622_v19 = vadd.f32 %v11452_v35, %v6606_v57  ;;  %v11984_v35 = vld [vmem:[#allocation52_spill] sm:$0xff] }
 0xc32   :  { %6639 = vst.msk [vmem:[#allocation33 + $0x28] sm:$0xff] %vm11978_vm14, %v6623_v39  ;;  %v8407_v46 = vpop.f32.mrb[106].mxu1  ;;  %vm11985_vm4 = vnez %v11984_v35  ;;  %vm12000_vm14 = vmmov %vm11979_vm0 }
 0xc33   :  { %6638 = vst.msk [vmem:[#allocation33 + $0x20] sm:$0xff] %vm11979_vm0, %v6622_v19  ;;  %v6609_v58 = vsel %vm11980_vm12, %v8407_v46, 0.0  ;;  %v6537_v52 = vpop.f32.mrb[107].mxu1 }
 0xc34   :  { %v6625_v48 = vadd.f32 %v11460_v31, %v6609_v58  ;;  %v6608_v33 = vsel %vm11981_vm11, %v6537_v52, 0.0  ;;  %vm12004_vm11 = vnez %v12003_v63 }
 0xc35   :  { %v6624_v42 = vadd.f32 %v11462_v60, %v6608_v33  ;;  %v11990_v60 = vld [vmem:[#allocation54_spill] sm:$0xff] }
 0xc36   :  { %6641 = vst.msk [vmem:[#allocation33 + $0x38] sm:$0xff] %vm11982_vm2, %v6625_v48  ;;  %v8410_v7 = vpop.f32.mrb[108].mxu1  ;;  %vm11991_vm15 = vnez %v11990_v60  ;;  %vm12005_vm2 = vmmov %vm11979_vm0 }
 0xc37   :  { %6640 = vst.msk [vmem:[#allocation33 + $0x30] sm:$0xff] %vm11983_vm3, %v6624_v42  ;;  %v6611_v0 = vsel %vm11985_vm4, %v8410_v7, 0.0  ;;  %v6547_v61 = vpop.f32.mrb[109].mxu1  ;;  %vm12006_vm3 = vmmov %vm11979_vm0 }
 0xc38   :  { %v6627_v32 = vadd.f32 %v11470_v17, %v6611_v0  ;;  %v6610_v4 = vsel %vm11987_vm13, %v6547_v61, 0.0 }
 0xc39   :  { %v6626_v31 = vadd.f32 %v11472_v21, %v6610_v4  ;;  %v11996_v21 = vld [vmem:[#allocation56_spill] sm:$0xff] }
 0xc3a   :  { %6643 = vst.msk [vmem:[#allocation33 + $0x48] sm:$0xff] %vm11988_vm1, %v6627_v32  ;;  %v8413_v5 = vpop.f32.mrb[110].mxu1  ;;  %vm11997_vm6 = vnez %v11996_v21 }
 0xc3b   :  { %6642 = vst.msk [vmem:[#allocation33 + $0x40] sm:$0xff] %vm11989_vm9, %v6626_v31  ;;  %v6613_v43 = vsel %vm11991_vm15, %v8413_v5, 0.0  ;;  %v6557_v27 = vpop.f32.mrb[111].mxu1 }
 0xc3c   :  { %v6629_v12 = vadd.f32 %v11480_v37, %v6613_v43  ;;  %v6612_v11 = vsel %vm11993_vm7, %v6557_v27, 0.0 }
 0xc3d   :  { %v6628_v17 = vadd.f32 %v11482_v22, %v6612_v11  ;;  %v12001_v22 = vld [vmem:[#allocation58_spill] sm:$0xff] }
 0xc3e   :  { %6645 = vst.msk [vmem:[#allocation33 + $0x58] sm:$0xff] %vm11994_vm8, %v6629_v12  ;;  %v8416_v45 = vpop.f32.mrb[112].mxu1  ;;  %vm12002_vm12 = vnez %v12001_v22 }
 0xc3f   :  { %6644 = vst.msk [vmem:[#allocation33 + $0x50] sm:$0xff] %vm11995_vm10, %v6628_v17  ;;  %v6615_v50 = vsel %vm11997_vm6, %v8416_v45, 0.0  ;;  %v6567_v10 = vpop.f32.mrb[113].mxu1 }
 0xc40   :  { %v6631_v40 = vadd.f32 %v11490_v56, %v6615_v50  ;;  %v6614_v34 = vsel %vm11999_vm5, %v6567_v10, 0.0 }
 0xc41   :  { %v6630_v37 = vadd.f32 %v8627_v55, %v6614_v34 }
 0xc42   :  { %6647 = vst.msk [vmem:[#allocation33 + $0x68] sm:$0xff] %vm12000_vm14, %v6631_v40  ;;  %v8419_v53 = vpop.f32.mrb[114].mxu1 }
 0xc43   :  { %6646 = vst.msk [vmem:[#allocation33 + $0x60] sm:$0xff] %vm11979_vm0, %v6630_v37  ;;  %v6617_v51 = vsel %vm12002_vm12, %v8419_v53, 0.0  ;;  %v6577_v13 = vpop.f32.mrb[115].mxu1 }
 0xc44   :  { %v6633_v15 = vadd.f32 %v11498_v38, %v6617_v51  ;;  %v6616_v56 = vsel %vm12004_vm11, %v6577_v13, 0.0 }
 0xc45   :  { %v6632_v62 = vadd.f32 %v11500_v23, %v6616_v56 }
 0xc46   :  { %6649 = vst.msk [vmem:[#allocation33 + $0x78] sm:$0xff] %vm12005_vm2, %v6633_v15 }
 0xc47   :  { %6648 = vst.msk [vmem:[#allocation33 + $0x70] sm:$0xff] %vm12006_vm3, %v6632_v62 }
 0xc48   :  { %9462 = shalt.err (!%p9459_p8)
}
 0xc49   :  { %s12007_s8 = sld [smem:[#allocation64_spill]] }
 0xc4f   :  { %s9463_s13 = scalar_lea.hbm %s12007_s8, 2048 }
 0xc50   :  { %p9464_p9 = scmp.ne.s32.totalorder %s12007_s8, %s9463_s13  ;;  %p9467_p10 = scmp.lt.u32.totalorder %s9463_s13, %s12007_s8 }
 0xc52   :  { %p9469_p11 = pnand %p9467_p10, %p9464_p9 }
 0xc54   :  { %9472 = shalt.err (!%p9469_p11)
}
 0xc55   :  { %6661 = dma.vmem_to_hbm [thread:$0]  %s6656_s4, 2048, %s12007_s8, [#allocation6], %s9500_s0, %s9500_s0, %s9501_s23  }
 0xc56   :  { %9493 = dma.done.wait [#allocation6], 2048  }
 0xc57   :  { %9494 = vsyncadd [#allocation6], 4294965248 }
 0xc58   :  { %6665 = vsyncpa [#allocation5], 1 }
 0xc59   :  { %6666 = vsyncpa [#allocation8], 1 }
 0xc5a   :  { %6667 = vsyncpa [#allocation11], 1 }
 0xc5b   :  { %6668 = vsyncpa [#allocation14], 1 }
 0xc5c   :  { %6669 = vsyncpa [#allocation17], 1 }
 0xc5d   :  { %6670 = vsyncpa [#allocation20], 1 }
 0xc5e   :  { %6671 = vsyncpa [#allocation23], 1 }
 0xc5f   :  { %6672 = vsyncpa [#allocation26], 1 }
 0xc60   :  { %6673 = vsyncpa [#allocation29], 1 }
 0xc61   :  { %6674 = vsyncpa [#allocation32], 1 }
 0xc62   :  { %6675 = vsyncpa [#allocation6], 1 }

</bundles_post_ra>
